<compile_context>
chip_gen: v5e
topology: v5e:2x2
jax: 0.10.0
libtpu: 0.0.40
codegen_flags: <defaults>
</compile_context>

<pallas_src>
import jax
import jax.numpy as jnp
import numpy as np
from jax.experimental import pallas as pl
from jax.experimental.pallas import tpu as pltpu


def _round_up(x, m):
    return ((x + m - 1) // m) * m


def _choose_time_block(L, cap=16):
    """Largest divisor of L that is <= cap (time steps per grid iteration)."""
    t = min(L, cap)
    while L % t:
        t -= 1
    return t


# ----------------------------------------------------------------------------
# Fused kernel: LSTM recurrence + vocab projection, T time steps per grid step.
#   xg_ref     (T, B, 4*Hp)  precomputed input gates (x@W_ih^T + bias), padded
#   whh_ref    (Hp, 4*Hp)    hidden->gates weights (padded, gate-aligned)
#   wproj_ref  (Hp, Vp)      vocab projection weights (padded, transposed)
#   bproj_ref  (1, Vp)       vocab projection bias (padded)
#   h0/c0      (B, Hp)       initial state (padded)
#   scores_ref (T, B, Vp)    per-step vocab scores (output block for this tile)
#   hn/cn      (B, Hp)       final hidden/cell; constant block index => resident
#                            in VMEM across the grid, doubles as the carry.
# ----------------------------------------------------------------------------
def lstm_fused_kernel(xg_ref, whh_ref, wproj_ref, bproj_ref, h0_ref, c0_ref,
                      scores_ref, hn_ref, cn_ref):
    g = pl.program_id(0)
    T = xg_ref.shape[0]
    Hp = hn_ref.shape[-1]

    @pl.when(g == 0)
    def _():
        hn_ref[...] = h0_ref[...]
        cn_ref[...] = c0_ref[...]

    # Hoisted once per grid step; constant block index keeps them resident.
    whh = whh_ref[...]
    wproj = wproj_ref[...]
    bproj = bproj_ref[...]

    def step(t, carry):
        h = hn_ref[...]
        c = cn_ref[...]
        # gates = (x_t @ W_ih^T + b)  [precomputed, gathered]  +  h @ W_hh^T
        gates = xg_ref[t] + jnp.dot(h, whh, preferred_element_type=jnp.float32)
        # PyTorch gate order i, f, g, o; each slice is a 128-lane-aligned block.
        i_g = jax.nn.sigmoid(gates[:, 0 * Hp:1 * Hp])
        f_g = jax.nn.sigmoid(gates[:, 1 * Hp:2 * Hp])
        g_g = jnp.tanh(gates[:, 2 * Hp:3 * Hp])
        o_g = jax.nn.sigmoid(gates[:, 3 * Hp:4 * Hp])
        c_new = f_g * c + i_g * g_g
        h_new = o_g * jnp.tanh(c_new)
        hn_ref[...] = h_new
        cn_ref[...] = c_new
        # Fused, lane-dense vocab projection for this time step.
        scores_ref[t] = (jnp.dot(h_new, wproj,
                                 preferred_element_type=jnp.float32) + bproj)
        return carry

    jax.lax.fori_loop(0, T, step, 0, unroll=True)


# ----------------------------------------------------------------------------
# One-time parameter preparation (gate table, padded / transposed weights).
# ----------------------------------------------------------------------------
def prepare_params(params):
    emb = params["emb"].astype(jnp.float32)          # (V_emb, E)
    w_ih = params["w_ih"].astype(jnp.float32)        # (4H, E)
    w_hh = params["w_hh"].astype(jnp.float32)        # (4H, H)
    b_ih = params["b_ih"].astype(jnp.float32)        # (4H,)
    b_hh = params["b_hh"].astype(jnp.float32)        # (4H,)
    w_proj = params["w_proj"].astype(jnp.float32)    # (V, H)
    b_proj = params["b_proj"].astype(jnp.float32)    # (V,)

    H = w_hh.shape[1]
    V = w_proj.shape[0]
    V_emb = emb.shape[0]
    Hp = _round_up(H, 128)       # lane-dense hidden size
    Vp = _round_up(V, 128)       # lane-dense vocab size

    # Input-projection gate table: row v = emb[v] @ W_ih^T + (b_ih + b_hh).
    gate_raw = emb @ w_ih.T + (b_ih + b_hh)[None, :]         # (V_emb, 4H)
    whh_raw = w_hh.T                                         # (H, 4H)

    # Scatter each gate's H columns to an Hp-aligned slot so in-kernel gate
    # slices are whole-vreg views; padded lanes are zero.
    gate_tbl = jnp.zeros((V_emb, 4 * Hp), jnp.float32)
    whh_pad = jnp.zeros((Hp, 4 * Hp), jnp.float32)
    for k in range(4):
        gate_tbl = gate_tbl.at[:, k * Hp:k * Hp + H].set(
            gate_raw[:, k * H:(k + 1) * H])
        whh_pad = whh_pad.at[:H, k * Hp:k * Hp + H].set(
            whh_raw[:, k * H:(k + 1) * H])

    wproj_pad = jnp.zeros((Hp, Vp), jnp.float32).at[:H, :V].set(w_proj.T)
    bproj_pad = jnp.zeros((1, Vp), jnp.float32).at[:, :V].set(b_proj[None, :])

    return dict(gate_table=gate_tbl, whh_pad=whh_pad,
                wproj_pad=wproj_pad, bproj_pad=bproj_pad,
                H=H, Hp=Hp, V=V, Vp=Vp)


# ----------------------------------------------------------------------------
# Forward wrapper.
# ----------------------------------------------------------------------------
def char_decoder_forward(char_input, prep, dec_hidden=None):
    """char_input: (L, B) int32. Returns (scores (L,B,V), (h (1,B,H), c (1,B,H)))."""
    L, B = char_input.shape
    H, Hp, V, Vp = prep["H"], prep["Hp"], prep["V"], prep["Vp"]

    # Embedding + input projection collapsed into one gather (XLA glue).
    x_gates = jnp.take(prep["gate_table"], char_input, axis=0)   # (L, B, 4*Hp)

    if dec_hidden is None:
        h0 = jnp.zeros((B, Hp), jnp.float32)
        c0 = jnp.zeros((B, Hp), jnp.float32)
    else:
        h0 = jnp.zeros((B, Hp), jnp.float32).at[:, :H].set(
            dec_hidden[0].reshape(B, H).astype(jnp.float32))
        c0 = jnp.zeros((B, Hp), jnp.float32).at[:, :H].set(
            dec_hidden[1].reshape(B, H).astype(jnp.float32))

    T = _choose_time_block(L)

    scores_pad, h_last, c_last = pl.pallas_call(
        lstm_fused_kernel,
        out_shape=(
            jax.ShapeDtypeStruct((L, B, Vp), jnp.float32),
            jax.ShapeDtypeStruct((B, Hp), jnp.float32),
            jax.ShapeDtypeStruct((B, Hp), jnp.float32),
        ),
        grid_spec=pltpu.PrefetchScalarGridSpec(
            num_scalar_prefetch=0,
            grid=(L // T,),
            in_specs=[
                pl.BlockSpec((T, B, 4 * Hp), lambda g: (g, 0, 0)),   # x gates
                pl.BlockSpec((Hp, 4 * Hp), lambda g: (0, 0)),        # W_hh^T
                pl.BlockSpec((Hp, Vp), lambda g: (0, 0)),            # W_proj^T
                pl.BlockSpec((1, Vp), lambda g: (0, 0)),             # b_proj
                pl.BlockSpec((B, Hp), lambda g: (0, 0)),             # h0
                pl.BlockSpec((B, Hp), lambda g: (0, 0)),             # c0
            ],
            out_specs=[
                pl.BlockSpec((T, B, Vp), lambda g: (g, 0, 0)),       # scores
                pl.BlockSpec((B, Hp), lambda g: (0, 0)),             # h_n (carry)
                pl.BlockSpec((B, Hp), lambda g: (0, 0)),             # c_n (carry)
            ],
        ),
        compiler_params=pltpu.CompilerParams(
            dimension_semantics=("arbitrary",)),   # time axis is sequential
    )(x_gates, prep["whh_pad"], prep["wproj_pad"], prep["bproj_pad"], h0, c0)

    scores = scores_pad[:, :, :V]
    h_n = h_last[:, :H][None]
    c_n = c_last[:, :H][None]
    return scores, (h_n, c_n)


# ----------------------------------------------------------------------------
# Pure-JAX reference (lax.scan LSTM) for correctness checking.
# ----------------------------------------------------------------------------
def char_decoder_reference(char_input, params, dec_hidden=None):
    emb, w_ih, w_hh, b_ih, b_hh, w_proj, b_proj = (
        params["emb"], params["w_ih"], params["w_hh"], params["b_ih"],
        params["b_hh"], params["w_proj"], params["b_proj"])
    L, B = char_input.shape
    H = w_hh.shape[1]
    x_emb = jnp.take(emb, char_input, axis=0)
    if dec_hidden is None:
        h0 = jnp.zeros((B, H), jnp.float32)
        c0 = jnp.zeros((B, H), jnp.float32)
    else:
        h0, c0 = dec_hidden[0].reshape(B, H), dec_hidden[1].reshape(B, H)

    def step(carry, x_t):
        h, c = carry
        gates = x_t @ w_ih.T + h @ w_hh.T + b_ih + b_hh
        i = jax.nn.sigmoid(gates[:, 0:H])
        f = jax.nn.sigmoid(gates[:, H:2 * H])
        g = jnp.tanh(gates[:, 2 * H:3 * H])
        o = jax.nn.sigmoid(gates[:, 3 * H:4 * H])
        c_new = f * c + i * g
        h_new = o * jnp.tanh(c_new)
        return (h_new, c_new), h_new @ w_proj.T + b_proj

    (h_last, c_last), scores = jax.lax.scan(step, (h0, c0), x_emb)
    return scores, (h_last[None], c_last[None])


if __name__ == "__main__":
    # Small, module-consistent shapes: seq length 8, batch 4, char-emb 50,
    # hidden 32, char vocab 30 (pad index 0).
    L, B, E, H, V = 8, 4, 50, 32, 30
    PAD_IDX = 0

    key = jax.random.PRNGKey(0)
    ks = jax.random.split(key, 9)

    emb = 0.1 * jax.random.normal(ks[0], (V, E), jnp.float32)
    emb = emb.at[PAD_IDX].set(0.0)  # nn.Embedding padding_idx row is zero
    params = {
        "emb": emb,
        "w_ih": 0.1 * jax.random.normal(ks[1], (4 * H, E), jnp.float32),
        "w_hh": 0.1 * jax.random.normal(ks[2], (4 * H, H), jnp.float32),
        "b_ih": 0.1 * jax.random.normal(ks[3], (4 * H,), jnp.float32),
        "b_hh": 0.1 * jax.random.normal(ks[4], (4 * H,), jnp.float32),
        "w_proj": 0.1 * jax.random.normal(ks[5], (V, H), jnp.float32),
        "b_proj": 0.1 * jax.random.normal(ks[6], (V,), jnp.float32),
    }

    char_input = jax.random.randint(ks[7], (L, B), 0, V, jnp.int32)  # (length, batch)
    h0 = 0.1 * jax.random.normal(ks[8], (1, B, H), jnp.float32)
    c0 = 0.1 * jax.random.normal(jax.random.fold_in(key, 99), (1, B, H), jnp.float32)

    prep = prepare_params(params)   # one-time weight prep (transposes, gate table)

    scores, (h_n, c_n) = char_decoder_forward(char_input, prep, (h0, c0))
    jax.block_until_ready((scores, h_n, c_n))

    ref_scores, (ref_h, ref_c) = char_decoder_reference(char_input, params, (h0, c0))

    assert scores.shape == (L, B, V)
    assert h_n.shape == (1, B, H) and c_n.shape == (1, B, H)
    np.testing.assert_allclose(np.asarray(scores), np.asarray(ref_scores),
                               rtol=1e-4, atol=1e-4)
    np.testing.assert_allclose(np.asarray(h_n), np.asarray(ref_h),
                               rtol=1e-4, atol=1e-4)
    np.testing.assert_allclose(np.asarray(c_n), np.asarray(ref_c),
                               rtol=1e-4, atol=1e-4)

    # Also exercise the dec_hidden=None path once (zero initial state).
    scores0, _ = char_decoder_forward(char_input, prep, None)
    ref_scores0, _ = char_decoder_reference(char_input, params, None)
    np.testing.assert_allclose(np.asarray(scores0), np.asarray(ref_scores0),
                               rtol=1e-4, atol=1e-4)

    # TODO(synk): train_forward (masked sum cross-entropy) and decode_greedy
    # (host-side greedy sampling loop over vocab strings) are control flow
    # around this forward pass and are not kernelized.
    print("KERNEL_OK")
</pallas_src>

<mosaic_0001>
module attributes {stable_mosaic.version = 11 : i64} {
  func.func @lstm_fused_kernel(%arg0: i32, %arg1: memref<8x4x512xf32, #tpu.memory_space<vmem>>, %arg2: memref<128x512xf32, #tpu.memory_space<vmem>>, %arg3: memref<128x128xf32, #tpu.memory_space<vmem>>, %arg4: memref<1x128xf32, #tpu.memory_space<vmem>>, %arg5: memref<4x128xf32, #tpu.memory_space<vmem>>, %arg6: memref<4x128xf32, #tpu.memory_space<vmem>>, %arg7: memref<8x4x128xf32, #tpu.memory_space<vmem>>, %arg8: memref<4x128xf32, #tpu.memory_space<vmem>>, %arg9: memref<4x128xf32, #tpu.memory_space<vmem>>) attributes {dimension_semantics = [#tpu.dimension_semantics<arbitrary>], iteration_bounds = array<i64: 1>, scalar_prefetch = 0 : i64, scratch_operands = 0 : i64, tpu.core_type = #tpu.core_type<tc>, window_params = [{transform_indices = @transform_0, window_bounds = array<i64: 8, 4, 512>}, {pipeline_mode = #tpu.pipeline_mode<synchronous>, transform_indices = @transform_1, window_bounds = array<i64: 128, 512>}, {pipeline_mode = #tpu.pipeline_mode<synchronous>, transform_indices = @transform_2, window_bounds = array<i64: 128, 128>}, {pipeline_mode = #tpu.pipeline_mode<synchronous>, transform_indices = @transform_3, window_bounds = array<i64: 1, 128>}, {pipeline_mode = #tpu.pipeline_mode<synchronous>, transform_indices = @transform_4, window_bounds = array<i64: 4, 128>}, {pipeline_mode = #tpu.pipeline_mode<synchronous>, transform_indices = @transform_5, window_bounds = array<i64: 4, 128>}, {transform_indices = @transform_6, window_bounds = array<i64: 8, 4, 128>}, {pipeline_mode = #tpu.pipeline_mode<synchronous>, transform_indices = @transform_7, window_bounds = array<i64: 4, 128>}, {pipeline_mode = #tpu.pipeline_mode<synchronous>, transform_indices = @transform_8, window_bounds = array<i64: 4, 128>}]} {
    %c0_i32 = arith.constant 0 : i32
    %0 = arith.cmpi eq, %arg0, %c0_i32 : i32
    %1 = arith.extui %0 : i1 to i32
    %c0_i32_0 = arith.constant 0 : i32
    %2 = arith.cmpi ne, %1, %c0_i32_0 : i32
    scf.if %2 {
      %c0_142 = arith.constant 0 : index
      %c0_143 = arith.constant 0 : index
      %334 = vector.load %arg5[%c0_142, %c0_143] : memref<4x128xf32, #tpu.memory_space<vmem>>, vector<4x128xf32>
      %c0_144 = arith.constant 0 : index
      %c0_145 = arith.constant 0 : index
      %335 = vector.load %arg8[%c0_144, %c0_145] : memref<4x128xf32, #tpu.memory_space<vmem>>, vector<4x128xf32>
      tpu.vector_store %arg8[%c0_144, %c0_145], %334 {strides = array<i32>} : memref<4x128xf32, #tpu.memory_space<vmem>>, vector<4x128xf32>,
      %c0_146 = arith.constant 0 : index
      %c0_147 = arith.constant 0 : index
      %336 = vector.load %arg6[%c0_146, %c0_147] : memref<4x128xf32, #tpu.memory_space<vmem>>, vector<4x128xf32>
      %c0_148 = arith.constant 0 : index
      %c0_149 = arith.constant 0 : index
      %337 = vector.load %arg9[%c0_148, %c0_149] : memref<4x128xf32, #tpu.memory_space<vmem>>, vector<4x128xf32>
      tpu.vector_store %arg9[%c0_148, %c0_149], %336 {strides = array<i32>} : memref<4x128xf32, #tpu.memory_space<vmem>>, vector<4x128xf32>,
    } else {
    }
    %c0 = arith.constant 0 : index
    %c0_1 = arith.constant 0 : index
    %3 = vector.load %arg2[%c0, %c0_1] : memref<128x512xf32, #tpu.memory_space<vmem>>, vector<128x512xf32>
    %c0_2 = arith.constant 0 : index
    %c0_3 = arith.constant 0 : index
    %4 = vector.load %arg3[%c0_2, %c0_3] : memref<128x128xf32, #tpu.memory_space<vmem>>, vector<128x128xf32>
    %c0_4 = arith.constant 0 : index
    %c0_5 = arith.constant 0 : index
    %5 = vector.load %arg4[%c0_4, %c0_5] : memref<1x128xf32, #tpu.memory_space<vmem>>, vector<1x128xf32>
    %c0_i32_6 = arith.constant 0 : i32
    %c0_7 = arith.constant 0 : index
    %c0_8 = arith.constant 0 : index
    %6 = vector.load %arg8[%c0_7, %c0_8] : memref<4x128xf32, #tpu.memory_space<vmem>>, vector<4x128xf32>
    %c0_9 = arith.constant 0 : index
    %c0_10 = arith.constant 0 : index
    %7 = vector.load %arg9[%c0_9, %c0_10] : memref<4x128xf32, #tpu.memory_space<vmem>>, vector<4x128xf32>
    %8 = arith.index_cast %c0_i32_6 : i32 to index
    %c0_11 = arith.constant 0 : index
    %c0_12 = arith.constant 0 : index
    %9 = vector.load %arg1[%8, %c0_11, %c0_12] : memref<8x4x512xf32, #tpu.memory_space<vmem>>, vector<1x4x512xf32>
    %10 = vector.shape_cast %9 : vector<1x4x512xf32> to vector<4x512xf32>
    %cst = arith.constant dense<0.000000e+00> : vector<4x512xf32>
    %11 = tpu.matmul %6, %3, %cst {dimension_numbers = #tpu.dot_dimension_numbers<[1], [0], [0], [1], [0, 0, 1, 1], [], []>} : vector<4x128xf32>, vector<128x512xf32>, vector<4x512xf32> -> vector<4x512xf32>
    %12 = arith.addf %10, %11 : vector<4x512xf32>
    %13 = vector.extract_strided_slice %12 {offsets = [0, 0], sizes = [4, 128], strides = [1, 1]} : vector<4x512xf32> to vector<4x128xf32>
    %14 = arith.negf %13 : vector<4x128xf32>
    %15 = math.exp %14 : vector<4x128xf32>
    %cst_13 = arith.constant 1.000000e+00 : f32
    %16 = vector.broadcast %cst_13 : f32 to vector<4x128xf32>
    %17 = arith.addf %16, %15 : vector<4x128xf32>
    %18 = arith.divf %16, %17 : vector<4x128xf32>
    %19 = vector.extract_strided_slice %12 {offsets = [0, 128], sizes = [4, 128], strides = [1, 1]} : vector<4x512xf32> to vector<4x128xf32>
    %20 = arith.negf %19 : vector<4x128xf32>
    %21 = math.exp %20 : vector<4x128xf32>
    %cst_14 = arith.constant 1.000000e+00 : f32
    %22 = vector.broadcast %cst_14 : f32 to vector<4x128xf32>
    %23 = arith.addf %22, %21 : vector<4x128xf32>
    %24 = arith.divf %22, %23 : vector<4x128xf32>
    %25 = vector.extract_strided_slice %12 {offsets = [0, 256], sizes = [4, 128], strides = [1, 1]} : vector<4x512xf32> to vector<4x128xf32>
    %26 = math.tanh %25 : vector<4x128xf32>
    %27 = vector.extract_strided_slice %12 {offsets = [0, 384], sizes = [4, 128], strides = [1, 1]} : vector<4x512xf32> to vector<4x128xf32>
    %28 = arith.negf %27 : vector<4x128xf32>
    %29 = math.exp %28 : vector<4x128xf32>
    %cst_15 = arith.constant 1.000000e+00 : f32
    %30 = vector.broadcast %cst_15 : f32 to vector<4x128xf32>
    %31 = arith.addf %30, %29 : vector<4x128xf32>
    %32 = arith.divf %30, %31 : vector<4x128xf32>
    %33 = arith.mulf %24, %7 : vector<4x128xf32>
    %34 = arith.mulf %18, %26 : vector<4x128xf32>
    %35 = arith.addf %33, %34 : vector<4x128xf32>
    %36 = math.tanh %35 : vector<4x128xf32>
    %37 = arith.mulf %32, %36 : vector<4x128xf32>
    %c0_16 = arith.constant 0 : index
    %c0_17 = arith.constant 0 : index
    %38 = vector.load %arg8[%c0_16, %c0_17] : memref<4x128xf32, #tpu.memory_space<vmem>>, vector<4x128xf32>
    tpu.vector_store %arg8[%c0_16, %c0_17], %37 {strides = array<i32>} : memref<4x128xf32, #tpu.memory_space<vmem>>, vector<4x128xf32>,
    %c0_18 = arith.constant 0 : index
    %c0_19 = arith.constant 0 : index
    %39 = vector.load %arg9[%c0_18, %c0_19] : memref<4x128xf32, #tpu.memory_space<vmem>>, vector<4x128xf32>
    tpu.vector_store %arg9[%c0_18, %c0_19], %35 {strides = array<i32>} : memref<4x128xf32, #tpu.memory_space<vmem>>, vector<4x128xf32>,
    %cst_20 = arith.constant dense<0.000000e+00> : vector<4x128xf32>
    %40 = tpu.matmul %37, %4, %cst_20 {dimension_numbers = #tpu.dot_dimension_numbers<[1], [0], [0], [1], [0, 0, 1, 1], [], []>} : vector<4x128xf32>, vector<128x128xf32>, vector<4x128xf32> -> vector<4x128xf32>
    %41 = vector.broadcast %5 : vector<1x128xf32> to vector<4x128xf32>
    %42 = arith.addf %40, %41 : vector<4x128xf32>
    %43 = arith.index_cast %c0_i32_6 : i32 to index
    %c0_21 = arith.constant 0 : index
    %c0_22 = arith.constant 0 : index
    %44 = vector.load %arg7[%43, %c0_21, %c0_22] : memref<8x4x128xf32, #tpu.memory_space<vmem>>, vector<1x4x128xf32>
    %45 = vector.shape_cast %44 : vector<1x4x128xf32> to vector<4x128xf32>
    %46 = vector.shape_cast %42 : vector<4x128xf32> to vector<1x4x128xf32>
    tpu.vector_store %arg7[%43, %c0_21, %c0_22], %46 {strides = array<i32>} : memref<8x4x128xf32, #tpu.memory_space<vmem>>, vector<1x4x128xf32>,
    %c1_i32 = arith.constant 1 : i32
    %c0_23 = arith.constant 0 : index
    %c0_24 = arith.constant 0 : index
    %47 = vector.load %arg8[%c0_23, %c0_24] : memref<4x128xf32, #tpu.memory_space<vmem>>, vector<4x128xf32>
    %c0_25 = arith.constant 0 : index
    %c0_26 = arith.constant 0 : index
    %48 = vector.load %arg9[%c0_25, %c0_26] : memref<4x128xf32, #tpu.memory_space<vmem>>, vector<4x128xf32>
    %49 = arith.index_cast %c1_i32 : i32 to index
    %c0_27 = arith.constant 0 : index
    %c0_28 = arith.constant 0 : index
    %50 = vector.load %arg1[%49, %c0_27, %c0_28] : memref<8x4x512xf32, #tpu.memory_space<vmem>>, vector<1x4x512xf32>
    %51 = vector.shape_cast %50 : vector<1x4x512xf32> to vector<4x512xf32>
    %cst_29 = arith.constant dense<0.000000e+00> : vector<4x512xf32>
    %52 = tpu.matmul %47, %3, %cst_29 {dimension_numbers = #tpu.dot_dimension_numbers<[1], [0], [0], [1], [0, 0, 1, 1], [], []>} : vector<4x128xf32>, vector<128x512xf32>, vector<4x512xf32> -> vector<4x512xf32>
    %53 = arith.addf %51, %52 : vector<4x512xf32>
    %54 = vector.extract_strided_slice %53 {offsets = [0, 0], sizes = [4, 128], strides = [1, 1]} : vector<4x512xf32> to vector<4x128xf32>
    %55 = arith.negf %54 : vector<4x128xf32>
    %56 = math.exp %55 : vector<4x128xf32>
    %cst_30 = arith.constant 1.000000e+00 : f32
    %57 = vector.broadcast %cst_30 : f32 to vector<4x128xf32>
    %58 = arith.addf %57, %56 : vector<4x128xf32>
    %59 = arith.divf %57, %58 : vector<4x128xf32>
    %60 = vector.extract_strided_slice %53 {offsets = [0, 128], sizes = [4, 128], strides = [1, 1]} : vector<4x512xf32> to vector<4x128xf32>
    %61 = arith.negf %60 : vector<4x128xf32>
    %62 = math.exp %61 : vector<4x128xf32>
    %cst_31 = arith.constant 1.000000e+00 : f32
    %63 = vector.broadcast %cst_31 : f32 to vector<4x128xf32>
    %64 = arith.addf %63, %62 : vector<4x128xf32>
    %65 = arith.divf %63, %64 : vector<4x128xf32>
    %66 = vector.extract_strided_slice %53 {offsets = [0, 256], sizes = [4, 128], strides = [1, 1]} : vector<4x512xf32> to vector<4x128xf32>
    %67 = math.tanh %66 : vector<4x128xf32>
    %68 = vector.extract_strided_slice %53 {offsets = [0, 384], sizes = [4, 128], strides = [1, 1]} : vector<4x512xf32> to vector<4x128xf32>
    %69 = arith.negf %68 : vector<4x128xf32>
    %70 = math.exp %69 : vector<4x128xf32>
    %cst_32 = arith.constant 1.000000e+00 : f32
    %71 = vector.broadcast %cst_32 : f32 to vector<4x128xf32>
    %72 = arith.addf %71, %70 : vector<4x128xf32>
    %73 = arith.divf %71, %72 : vector<4x128xf32>
    %74 = arith.mulf %65, %48 : vector<4x128xf32>
    %75 = arith.mulf %59, %67 : vector<4x128xf32>
    %76 = arith.addf %74, %75 : vector<4x128xf32>
    %77 = math.tanh %76 : vector<4x128xf32>
    %78 = arith.mulf %73, %77 : vector<4x128xf32>
    %c0_33 = arith.constant 0 : index
    %c0_34 = arith.constant 0 : index
    %79 = vector.load %arg8[%c0_33, %c0_34] : memref<4x128xf32, #tpu.memory_space<vmem>>, vector<4x128xf32>
    tpu.vector_store %arg8[%c0_33, %c0_34], %78 {strides = array<i32>} : memref<4x128xf32, #tpu.memory_space<vmem>>, vector<4x128xf32>,
    %c0_35 = arith.constant 0 : index
    %c0_36 = arith.constant 0 : index
    %80 = vector.load %arg9[%c0_35, %c0_36] : memref<4x128xf32, #tpu.memory_space<vmem>>, vector<4x128xf32>
    tpu.vector_store %arg9[%c0_35, %c0_36], %76 {strides = array<i32>} : memref<4x128xf32, #tpu.memory_space<vmem>>, vector<4x128xf32>,
    %cst_37 = arith.constant dense<0.000000e+00> : vector<4x128xf32>
    %81 = tpu.matmul %78, %4, %cst_37 {dimension_numbers = #tpu.dot_dimension_numbers<[1], [0], [0], [1], [0, 0, 1, 1], [], []>} : vector<4x128xf32>, vector<128x128xf32>, vector<4x128xf32> -> vector<4x128xf32>
    %82 = vector.broadcast %5 : vector<1x128xf32> to vector<4x128xf32>
    %83 = arith.addf %81, %82 : vector<4x128xf32>
    %84 = arith.index_cast %c1_i32 : i32 to index
    %c0_38 = arith.constant 0 : index
    %c0_39 = arith.constant 0 : index
    %85 = vector.load %arg7[%84, %c0_38, %c0_39] : memref<8x4x128xf32, #tpu.memory_space<vmem>>, vector<1x4x128xf32>
    %86 = vector.shape_cast %85 : vector<1x4x128xf32> to vector<4x128xf32>
    %87 = vector.shape_cast %83 : vector<4x128xf32> to vector<1x4x128xf32>
    tpu.vector_store %arg7[%84, %c0_38, %c0_39], %87 {strides = array<i32>} : memref<8x4x128xf32, #tpu.memory_space<vmem>>, vector<1x4x128xf32>,
    %c2_i32 = arith.constant 2 : i32
    %c0_40 = arith.constant 0 : index
    %c0_41 = arith.constant 0 : index
    %88 = vector.load %arg8[%c0_40, %c0_41] : memref<4x128xf32, #tpu.memory_space<vmem>>, vector<4x128xf32>
    %c0_42 = arith.constant 0 : index
    %c0_43 = arith.constant 0 : index
    %89 = vector.load %arg9[%c0_42, %c0_43] : memref<4x128xf32, #tpu.memory_space<vmem>>, vector<4x128xf32>
    %90 = arith.index_cast %c2_i32 : i32 to index
    %c0_44 = arith.constant 0 : index
    %c0_45 = arith.constant 0 : index
    %91 = vector.load %arg1[%90, %c0_44, %c0_45] : memref<8x4x512xf32, #tpu.memory_space<vmem>>, vector<1x4x512xf32>
    %92 = vector.shape_cast %91 : vector<1x4x512xf32> to vector<4x512xf32>
    %cst_46 = arith.constant dense<0.000000e+00> : vector<4x512xf32>
    %93 = tpu.matmul %88, %3, %cst_46 {dimension_numbers = #tpu.dot_dimension_numbers<[1], [0], [0], [1], [0, 0, 1, 1], [], []>} : vector<4x128xf32>, vector<128x512xf32>, vector<4x512xf32> -> vector<4x512xf32>
    %94 = arith.addf %92, %93 : vector<4x512xf32>
    %95 = vector.extract_strided_slice %94 {offsets = [0, 0], sizes = [4, 128], strides = [1, 1]} : vector<4x512xf32> to vector<4x128xf32>
    %96 = arith.negf %95 : vector<4x128xf32>
    %97 = math.exp %96 : vector<4x128xf32>
    %cst_47 = arith.constant 1.000000e+00 : f32
    %98 = vector.broadcast %cst_47 : f32 to vector<4x128xf32>
    %99 = arith.addf %98, %97 : vector<4x128xf32>
    %100 = arith.divf %98, %99 : vector<4x128xf32>
    %101 = vector.extract_strided_slice %94 {offsets = [0, 128], sizes = [4, 128], strides = [1, 1]} : vector<4x512xf32> to vector<4x128xf32>
    %102 = arith.negf %101 : vector<4x128xf32>
    %103 = math.exp %102 : vector<4x128xf32>
    %cst_48 = arith.constant 1.000000e+00 : f32
    %104 = vector.broadcast %cst_48 : f32 to vector<4x128xf32>
    %105 = arith.addf %104, %103 : vector<4x128xf32>
    %106 = arith.divf %104, %105 : vector<4x128xf32>
    %107 = vector.extract_strided_slice %94 {offsets = [0, 256], sizes = [4, 128], strides = [1, 1]} : vector<4x512xf32> to vector<4x128xf32>
    %108 = math.tanh %107 : vector<4x128xf32>
    %109 = vector.extract_strided_slice %94 {offsets = [0, 384], sizes = [4, 128], strides = [1, 1]} : vector<4x512xf32> to vector<4x128xf32>
    %110 = arith.negf %109 : vector<4x128xf32>
    %111 = math.exp %110 : vector<4x128xf32>
    %cst_49 = arith.constant 1.000000e+00 : f32
    %112 = vector.broadcast %cst_49 : f32 to vector<4x128xf32>
    %113 = arith.addf %112, %111 : vector<4x128xf32>
    %114 = arith.divf %112, %113 : vector<4x128xf32>
    %115 = arith.mulf %106, %89 : vector<4x128xf32>
    %116 = arith.mulf %100, %108 : vector<4x128xf32>
    %117 = arith.addf %115, %116 : vector<4x128xf32>
    %118 = math.tanh %117 : vector<4x128xf32>
    %119 = arith.mulf %114, %118 : vector<4x128xf32>
    %c0_50 = arith.constant 0 : index
    %c0_51 = arith.constant 0 : index
    %120 = vector.load %arg8[%c0_50, %c0_51] : memref<4x128xf32, #tpu.memory_space<vmem>>, vector<4x128xf32>
    tpu.vector_store %arg8[%c0_50, %c0_51], %119 {strides = array<i32>} : memref<4x128xf32, #tpu.memory_space<vmem>>, vector<4x128xf32>,
    %c0_52 = arith.constant 0 : index
    %c0_53 = arith.constant 0 : index
    %121 = vector.load %arg9[%c0_52, %c0_53] : memref<4x128xf32, #tpu.memory_space<vmem>>, vector<4x128xf32>
    tpu.vector_store %arg9[%c0_52, %c0_53], %117 {strides = array<i32>} : memref<4x128xf32, #tpu.memory_space<vmem>>, vector<4x128xf32>,
    %cst_54 = arith.constant dense<0.000000e+00> : vector<4x128xf32>
    %122 = tpu.matmul %119, %4, %cst_54 {dimension_numbers = #tpu.dot_dimension_numbers<[1], [0], [0], [1], [0, 0, 1, 1], [], []>} : vector<4x128xf32>, vector<128x128xf32>, vector<4x128xf32> -> vector<4x128xf32>
    %123 = vector.broadcast %5 : vector<1x128xf32> to vector<4x128xf32>
    %124 = arith.addf %122, %123 : vector<4x128xf32>
    %125 = arith.index_cast %c2_i32 : i32 to index
    %c0_55 = arith.constant 0 : index
    %c0_56 = arith.constant 0 : index
    %126 = vector.load %arg7[%125, %c0_55, %c0_56] : memref<8x4x128xf32, #tpu.memory_space<vmem>>, vector<1x4x128xf32>
    %127 = vector.shape_cast %126 : vector<1x4x128xf32> to vector<4x128xf32>
    %128 = vector.shape_cast %124 : vector<4x128xf32> to vector<1x4x128xf32>
    tpu.vector_store %arg7[%125, %c0_55, %c0_56], %128 {strides = array<i32>} : memref<8x4x128xf32, #tpu.memory_space<vmem>>, vector<1x4x128xf32>,
    %c3_i32 = arith.constant 3 : i32
    %c0_57 = arith.constant 0 : index
    %c0_58 = arith.constant 0 : index
    %129 = vector.load %arg8[%c0_57, %c0_58] : memref<4x128xf32, #tpu.memory_space<vmem>>, vector<4x128xf32>
    %c0_59 = arith.constant 0 : index
    %c0_60 = arith.constant 0 : index
    %130 = vector.load %arg9[%c0_59, %c0_60] : memref<4x128xf32, #tpu.memory_space<vmem>>, vector<4x128xf32>
    %131 = arith.index_cast %c3_i32 : i32 to index
    %c0_61 = arith.constant 0 : index
    %c0_62 = arith.constant 0 : index
    %132 = vector.load %arg1[%131, %c0_61, %c0_62] : memref<8x4x512xf32, #tpu.memory_space<vmem>>, vector<1x4x512xf32>
    %133 = vector.shape_cast %132 : vector<1x4x512xf32> to vector<4x512xf32>
    %cst_63 = arith.constant dense<0.000000e+00> : vector<4x512xf32>
    %134 = tpu.matmul %129, %3, %cst_63 {dimension_numbers = #tpu.dot_dimension_numbers<[1], [0], [0], [1], [0, 0, 1, 1], [], []>} : vector<4x128xf32>, vector<128x512xf32>, vector<4x512xf32> -> vector<4x512xf32>
    %135 = arith.addf %133, %134 : vector<4x512xf32>
    %136 = vector.extract_strided_slice %135 {offsets = [0, 0], sizes = [4, 128], strides = [1, 1]} : vector<4x512xf32> to vector<4x128xf32>
    %137 = arith.negf %136 : vector<4x128xf32>
    %138 = math.exp %137 : vector<4x128xf32>
    %cst_64 = arith.constant 1.000000e+00 : f32
    %139 = vector.broadcast %cst_64 : f32 to vector<4x128xf32>
    %140 = arith.addf %139, %138 : vector<4x128xf32>
    %141 = arith.divf %139, %140 : vector<4x128xf32>
    %142 = vector.extract_strided_slice %135 {offsets = [0, 128], sizes = [4, 128], strides = [1, 1]} : vector<4x512xf32> to vector<4x128xf32>
    %143 = arith.negf %142 : vector<4x128xf32>
    %144 = math.exp %143 : vector<4x128xf32>
    %cst_65 = arith.constant 1.000000e+00 : f32
    %145 = vector.broadcast %cst_65 : f32 to vector<4x128xf32>
    %146 = arith.addf %145, %144 : vector<4x128xf32>
    %147 = arith.divf %145, %146 : vector<4x128xf32>
    %148 = vector.extract_strided_slice %135 {offsets = [0, 256], sizes = [4, 128], strides = [1, 1]} : vector<4x512xf32> to vector<4x128xf32>
    %149 = math.tanh %148 : vector<4x128xf32>
    %150 = vector.extract_strided_slice %135 {offsets = [0, 384], sizes = [4, 128], strides = [1, 1]} : vector<4x512xf32> to vector<4x128xf32>
    %151 = arith.negf %150 : vector<4x128xf32>
    %152 = math.exp %151 : vector<4x128xf32>
    %cst_66 = arith.constant 1.000000e+00 : f32
    %153 = vector.broadcast %cst_66 : f32 to vector<4x128xf32>
    %154 = arith.addf %153, %152 : vector<4x128xf32>
    %155 = arith.divf %153, %154 : vector<4x128xf32>
    %156 = arith.mulf %147, %130 : vector<4x128xf32>
    %157 = arith.mulf %141, %149 : vector<4x128xf32>
    %158 = arith.addf %156, %157 : vector<4x128xf32>
    %159 = math.tanh %158 : vector<4x128xf32>
    %160 = arith.mulf %155, %159 : vector<4x128xf32>
    %c0_67 = arith.constant 0 : index
    %c0_68 = arith.constant 0 : index
    %161 = vector.load %arg8[%c0_67, %c0_68] : memref<4x128xf32, #tpu.memory_space<vmem>>, vector<4x128xf32>
    tpu.vector_store %arg8[%c0_67, %c0_68], %160 {strides = array<i32>} : memref<4x128xf32, #tpu.memory_space<vmem>>, vector<4x128xf32>,
    %c0_69 = arith.constant 0 : index
    %c0_70 = arith.constant 0 : index
    %162 = vector.load %arg9[%c0_69, %c0_70] : memref<4x128xf32, #tpu.memory_space<vmem>>, vector<4x128xf32>
    tpu.vector_store %arg9[%c0_69, %c0_70], %158 {strides = array<i32>} : memref<4x128xf32, #tpu.memory_space<vmem>>, vector<4x128xf32>,
    %cst_71 = arith.constant dense<0.000000e+00> : vector<4x128xf32>
    %163 = tpu.matmul %160, %4, %cst_71 {dimension_numbers = #tpu.dot_dimension_numbers<[1], [0], [0], [1], [0, 0, 1, 1], [], []>} : vector<4x128xf32>, vector<128x128xf32>, vector<4x128xf32> -> vector<4x128xf32>
    %164 = vector.broadcast %5 : vector<1x128xf32> to vector<4x128xf32>
    %165 = arith.addf %163, %164 : vector<4x128xf32>
    %166 = arith.index_cast %c3_i32 : i32 to index
    %c0_72 = arith.constant 0 : index
    %c0_73 = arith.constant 0 : index
    %167 = vector.load %arg7[%166, %c0_72, %c0_73] : memref<8x4x128xf32, #tpu.memory_space<vmem>>, vector<1x4x128xf32>
    %168 = vector.shape_cast %167 : vector<1x4x128xf32> to vector<4x128xf32>
    %169 = vector.shape_cast %165 : vector<4x128xf32> to vector<1x4x128xf32>
    tpu.vector_store %arg7[%166, %c0_72, %c0_73], %169 {strides = array<i32>} : memref<8x4x128xf32, #tpu.memory_space<vmem>>, vector<1x4x128xf32>,
    %c4_i32 = arith.constant 4 : i32
    %c0_74 = arith.constant 0 : index
    %c0_75 = arith.constant 0 : index
    %170 = vector.load %arg8[%c0_74, %c0_75] : memref<4x128xf32, #tpu.memory_space<vmem>>, vector<4x128xf32>
    %c0_76 = arith.constant 0 : index
    %c0_77 = arith.constant 0 : index
    %171 = vector.load %arg9[%c0_76, %c0_77] : memref<4x128xf32, #tpu.memory_space<vmem>>, vector<4x128xf32>
    %172 = arith.index_cast %c4_i32 : i32 to index
    %c0_78 = arith.constant 0 : index
    %c0_79 = arith.constant 0 : index
    %173 = vector.load %arg1[%172, %c0_78, %c0_79] : memref<8x4x512xf32, #tpu.memory_space<vmem>>, vector<1x4x512xf32>
    %174 = vector.shape_cast %173 : vector<1x4x512xf32> to vector<4x512xf32>
    %cst_80 = arith.constant dense<0.000000e+00> : vector<4x512xf32>
    %175 = tpu.matmul %170, %3, %cst_80 {dimension_numbers = #tpu.dot_dimension_numbers<[1], [0], [0], [1], [0, 0, 1, 1], [], []>} : vector<4x128xf32>, vector<128x512xf32>, vector<4x512xf32> -> vector<4x512xf32>
    %176 = arith.addf %174, %175 : vector<4x512xf32>
    %177 = vector.extract_strided_slice %176 {offsets = [0, 0], sizes = [4, 128], strides = [1, 1]} : vector<4x512xf32> to vector<4x128xf32>
    %178 = arith.negf %177 : vector<4x128xf32>
    %179 = math.exp %178 : vector<4x128xf32>
    %cst_81 = arith.constant 1.000000e+00 : f32
    %180 = vector.broadcast %cst_81 : f32 to vector<4x128xf32>
    %181 = arith.addf %180, %179 : vector<4x128xf32>
    %182 = arith.divf %180, %181 : vector<4x128xf32>
    %183 = vector.extract_strided_slice %176 {offsets = [0, 128], sizes = [4, 128], strides = [1, 1]} : vector<4x512xf32> to vector<4x128xf32>
    %184 = arith.negf %183 : vector<4x128xf32>
    %185 = math.exp %184 : vector<4x128xf32>
    %cst_82 = arith.constant 1.000000e+00 : f32
    %186 = vector.broadcast %cst_82 : f32 to vector<4x128xf32>
    %187 = arith.addf %186, %185 : vector<4x128xf32>
    %188 = arith.divf %186, %187 : vector<4x128xf32>
    %189 = vector.extract_strided_slice %176 {offsets = [0, 256], sizes = [4, 128], strides = [1, 1]} : vector<4x512xf32> to vector<4x128xf32>
    %190 = math.tanh %189 : vector<4x128xf32>
    %191 = vector.extract_strided_slice %176 {offsets = [0, 384], sizes = [4, 128], strides = [1, 1]} : vector<4x512xf32> to vector<4x128xf32>
    %192 = arith.negf %191 : vector<4x128xf32>
    %193 = math.exp %192 : vector<4x128xf32>
    %cst_83 = arith.constant 1.000000e+00 : f32
    %194 = vector.broadcast %cst_83 : f32 to vector<4x128xf32>
    %195 = arith.addf %194, %193 : vector<4x128xf32>
    %196 = arith.divf %194, %195 : vector<4x128xf32>
    %197 = arith.mulf %188, %171 : vector<4x128xf32>
    %198 = arith.mulf %182, %190 : vector<4x128xf32>
    %199 = arith.addf %197, %198 : vector<4x128xf32>
    %200 = math.tanh %199 : vector<4x128xf32>
    %201 = arith.mulf %196, %200 : vector<4x128xf32>
    %c0_84 = arith.constant 0 : index
    %c0_85 = arith.constant 0 : index
    %202 = vector.load %arg8[%c0_84, %c0_85] : memref<4x128xf32, #tpu.memory_space<vmem>>, vector<4x128xf32>
    tpu.vector_store %arg8[%c0_84, %c0_85], %201 {strides = array<i32>} : memref<4x128xf32, #tpu.memory_space<vmem>>, vector<4x128xf32>,
    %c0_86 = arith.constant 0 : index
    %c0_87 = arith.constant 0 : index
    %203 = vector.load %arg9[%c0_86, %c0_87] : memref<4x128xf32, #tpu.memory_space<vmem>>, vector<4x128xf32>
    tpu.vector_store %arg9[%c0_86, %c0_87], %199 {strides = array<i32>} : memref<4x128xf32, #tpu.memory_space<vmem>>, vector<4x128xf32>,
    %cst_88 = arith.constant dense<0.000000e+00> : vector<4x128xf32>
    %204 = tpu.matmul %201, %4, %cst_88 {dimension_numbers = #tpu.dot_dimension_numbers<[1], [0], [0], [1], [0, 0, 1, 1], [], []>} : vector<4x128xf32>, vector<128x128xf32>, vector<4x128xf32> -> vector<4x128xf32>
    %205 = vector.broadcast %5 : vector<1x128xf32> to vector<4x128xf32>
    %206 = arith.addf %204, %205 : vector<4x128xf32>
    %207 = arith.index_cast %c4_i32 : i32 to index
    %c0_89 = arith.constant 0 : index
    %c0_90 = arith.constant 0 : index
    %208 = vector.load %arg7[%207, %c0_89, %c0_90] : memref<8x4x128xf32, #tpu.memory_space<vmem>>, vector<1x4x128xf32>
    %209 = vector.shape_cast %208 : vector<1x4x128xf32> to vector<4x128xf32>
    %210 = vector.shape_cast %206 : vector<4x128xf32> to vector<1x4x128xf32>
    tpu.vector_store %arg7[%207, %c0_89, %c0_90], %210 {strides = array<i32>} : memref<8x4x128xf32, #tpu.memory_space<vmem>>, vector<1x4x128xf32>,
    %c5_i32 = arith.constant 5 : i32
    %c0_91 = arith.constant 0 : index
    %c0_92 = arith.constant 0 : index
    %211 = vector.load %arg8[%c0_91, %c0_92] : memref<4x128xf32, #tpu.memory_space<vmem>>, vector<4x128xf32>
    %c0_93 = arith.constant 0 : index
    %c0_94 = arith.constant 0 : index
    %212 = vector.load %arg9[%c0_93, %c0_94] : memref<4x128xf32, #tpu.memory_space<vmem>>, vector<4x128xf32>
    %213 = arith.index_cast %c5_i32 : i32 to index
    %c0_95 = arith.constant 0 : index
    %c0_96 = arith.constant 0 : index
    %214 = vector.load %arg1[%213, %c0_95, %c0_96] : memref<8x4x512xf32, #tpu.memory_space<vmem>>, vector<1x4x512xf32>
    %215 = vector.shape_cast %214 : vector<1x4x512xf32> to vector<4x512xf32>
    %cst_97 = arith.constant dense<0.000000e+00> : vector<4x512xf32>
    %216 = tpu.matmul %211, %3, %cst_97 {dimension_numbers = #tpu.dot_dimension_numbers<[1], [0], [0], [1], [0, 0, 1, 1], [], []>} : vector<4x128xf32>, vector<128x512xf32>, vector<4x512xf32> -> vector<4x512xf32>
    %217 = arith.addf %215, %216 : vector<4x512xf32>
    %218 = vector.extract_strided_slice %217 {offsets = [0, 0], sizes = [4, 128], strides = [1, 1]} : vector<4x512xf32> to vector<4x128xf32>
    %219 = arith.negf %218 : vector<4x128xf32>
    %220 = math.exp %219 : vector<4x128xf32>
    %cst_98 = arith.constant 1.000000e+00 : f32
    %221 = vector.broadcast %cst_98 : f32 to vector<4x128xf32>
    %222 = arith.addf %221, %220 : vector<4x128xf32>
    %223 = arith.divf %221, %222 : vector<4x128xf32>
    %224 = vector.extract_strided_slice %217 {offsets = [0, 128], sizes = [4, 128], strides = [1, 1]} : vector<4x512xf32> to vector<4x128xf32>
    %225 = arith.negf %224 : vector<4x128xf32>
    %226 = math.exp %225 : vector<4x128xf32>
    %cst_99 = arith.constant 1.000000e+00 : f32
    %227 = vector.broadcast %cst_99 : f32 to vector<4x128xf32>
    %228 = arith.addf %227, %226 : vector<4x128xf32>
    %229 = arith.divf %227, %228 : vector<4x128xf32>
    %230 = vector.extract_strided_slice %217 {offsets = [0, 256], sizes = [4, 128], strides = [1, 1]} : vector<4x512xf32> to vector<4x128xf32>
    %231 = math.tanh %230 : vector<4x128xf32>
    %232 = vector.extract_strided_slice %217 {offsets = [0, 384], sizes = [4, 128], strides = [1, 1]} : vector<4x512xf32> to vector<4x128xf32>
    %233 = arith.negf %232 : vector<4x128xf32>
    %234 = math.exp %233 : vector<4x128xf32>
    %cst_100 = arith.constant 1.000000e+00 : f32
    %235 = vector.broadcast %cst_100 : f32 to vector<4x128xf32>
    %236 = arith.addf %235, %234 : vector<4x128xf32>
    %237 = arith.divf %235, %236 : vector<4x128xf32>
    %238 = arith.mulf %229, %212 : vector<4x128xf32>
    %239 = arith.mulf %223, %231 : vector<4x128xf32>
    %240 = arith.addf %238, %239 : vector<4x128xf32>
    %241 = math.tanh %240 : vector<4x128xf32>
    %242 = arith.mulf %237, %241 : vector<4x128xf32>
    %c0_101 = arith.constant 0 : index
    %c0_102 = arith.constant 0 : index
    %243 = vector.load %arg8[%c0_101, %c0_102] : memref<4x128xf32, #tpu.memory_space<vmem>>, vector<4x128xf32>
    tpu.vector_store %arg8[%c0_101, %c0_102], %242 {strides = array<i32>} : memref<4x128xf32, #tpu.memory_space<vmem>>, vector<4x128xf32>,
    %c0_103 = arith.constant 0 : index
    %c0_104 = arith.constant 0 : index
    %244 = vector.load %arg9[%c0_103, %c0_104] : memref<4x128xf32, #tpu.memory_space<vmem>>, vector<4x128xf32>
    tpu.vector_store %arg9[%c0_103, %c0_104], %240 {strides = array<i32>} : memref<4x128xf32, #tpu.memory_space<vmem>>, vector<4x128xf32>,
    %cst_105 = arith.constant dense<0.000000e+00> : vector<4x128xf32>
    %245 = tpu.matmul %242, %4, %cst_105 {dimension_numbers = #tpu.dot_dimension_numbers<[1], [0], [0], [1], [0, 0, 1, 1], [], []>} : vector<4x128xf32>, vector<128x128xf32>, vector<4x128xf32> -> vector<4x128xf32>
    %246 = vector.broadcast %5 : vector<1x128xf32> to vector<4x128xf32>
    %247 = arith.addf %245, %246 : vector<4x128xf32>
    %248 = arith.index_cast %c5_i32 : i32 to index
    %c0_106 = arith.constant 0 : index
    %c0_107 = arith.constant 0 : index
    %249 = vector.load %arg7[%248, %c0_106, %c0_107] : memref<8x4x128xf32, #tpu.memory_space<vmem>>, vector<1x4x128xf32>
    %250 = vector.shape_cast %249 : vector<1x4x128xf32> to vector<4x128xf32>
    %251 = vector.shape_cast %247 : vector<4x128xf32> to vector<1x4x128xf32>
    tpu.vector_store %arg7[%248, %c0_106, %c0_107], %251 {strides = array<i32>} : memref<8x4x128xf32, #tpu.memory_space<vmem>>, vector<1x4x128xf32>,
    %c6_i32 = arith.constant 6 : i32
    %c0_108 = arith.constant 0 : index
    %c0_109 = arith.constant 0 : index
    %252 = vector.load %arg8[%c0_108, %c0_109] : memref<4x128xf32, #tpu.memory_space<vmem>>, vector<4x128xf32>
    %c0_110 = arith.constant 0 : index
    %c0_111 = arith.constant 0 : index
    %253 = vector.load %arg9[%c0_110, %c0_111] : memref<4x128xf32, #tpu.memory_space<vmem>>, vector<4x128xf32>
    %254 = arith.index_cast %c6_i32 : i32 to index
    %c0_112 = arith.constant 0 : index
    %c0_113 = arith.constant 0 : index
    %255 = vector.load %arg1[%254, %c0_112, %c0_113] : memref<8x4x512xf32, #tpu.memory_space<vmem>>, vector<1x4x512xf32>
    %256 = vector.shape_cast %255 : vector<1x4x512xf32> to vector<4x512xf32>
    %cst_114 = arith.constant dense<0.000000e+00> : vector<4x512xf32>
    %257 = tpu.matmul %252, %3, %cst_114 {dimension_numbers = #tpu.dot_dimension_numbers<[1], [0], [0], [1], [0, 0, 1, 1], [], []>} : vector<4x128xf32>, vector<128x512xf32>, vector<4x512xf32> -> vector<4x512xf32>
    %258 = arith.addf %256, %257 : vector<4x512xf32>
    %259 = vector.extract_strided_slice %258 {offsets = [0, 0], sizes = [4, 128], strides = [1, 1]} : vector<4x512xf32> to vector<4x128xf32>
    %260 = arith.negf %259 : vector<4x128xf32>
    %261 = math.exp %260 : vector<4x128xf32>
    %cst_115 = arith.constant 1.000000e+00 : f32
    %262 = vector.broadcast %cst_115 : f32 to vector<4x128xf32>
    %263 = arith.addf %262, %261 : vector<4x128xf32>
    %264 = arith.divf %262, %263 : vector<4x128xf32>
    %265 = vector.extract_strided_slice %258 {offsets = [0, 128], sizes = [4, 128], strides = [1, 1]} : vector<4x512xf32> to vector<4x128xf32>
    %266 = arith.negf %265 : vector<4x128xf32>
    %267 = math.exp %266 : vector<4x128xf32>
    %cst_116 = arith.constant 1.000000e+00 : f32
    %268 = vector.broadcast %cst_116 : f32 to vector<4x128xf32>
    %269 = arith.addf %268, %267 : vector<4x128xf32>
    %270 = arith.divf %268, %269 : vector<4x128xf32>
    %271 = vector.extract_strided_slice %258 {offsets = [0, 256], sizes = [4, 128], strides = [1, 1]} : vector<4x512xf32> to vector<4x128xf32>
    %272 = math.tanh %271 : vector<4x128xf32>
    %273 = vector.extract_strided_slice %258 {offsets = [0, 384], sizes = [4, 128], strides = [1, 1]} : vector<4x512xf32> to vector<4x128xf32>
    %274 = arith.negf %273 : vector<4x128xf32>
    %275 = math.exp %274 : vector<4x128xf32>
    %cst_117 = arith.constant 1.000000e+00 : f32
    %276 = vector.broadcast %cst_117 : f32 to vector<4x128xf32>
    %277 = arith.addf %276, %275 : vector<4x128xf32>
    %278 = arith.divf %276, %277 : vector<4x128xf32>
    %279 = arith.mulf %270, %253 : vector<4x128xf32>
    %280 = arith.mulf %264, %272 : vector<4x128xf32>
    %281 = arith.addf %279, %280 : vector<4x128xf32>
    %282 = math.tanh %281 : vector<4x128xf32>
    %283 = arith.mulf %278, %282 : vector<4x128xf32>
    %c0_118 = arith.constant 0 : index
    %c0_119 = arith.constant 0 : index
    %284 = vector.load %arg8[%c0_118, %c0_119] : memref<4x128xf32, #tpu.memory_space<vmem>>, vector<4x128xf32>
    tpu.vector_store %arg8[%c0_118, %c0_119], %283 {strides = array<i32>} : memref<4x128xf32, #tpu.memory_space<vmem>>, vector<4x128xf32>,
    %c0_120 = arith.constant 0 : index
    %c0_121 = arith.constant 0 : index
    %285 = vector.load %arg9[%c0_120, %c0_121] : memref<4x128xf32, #tpu.memory_space<vmem>>, vector<4x128xf32>
    tpu.vector_store %arg9[%c0_120, %c0_121], %281 {strides = array<i32>} : memref<4x128xf32, #tpu.memory_space<vmem>>, vector<4x128xf32>,
    %cst_122 = arith.constant dense<0.000000e+00> : vector<4x128xf32>
    %286 = tpu.matmul %283, %4, %cst_122 {dimension_numbers = #tpu.dot_dimension_numbers<[1], [0], [0], [1], [0, 0, 1, 1], [], []>} : vector<4x128xf32>, vector<128x128xf32>, vector<4x128xf32> -> vector<4x128xf32>
    %287 = vector.broadcast %5 : vector<1x128xf32> to vector<4x128xf32>
    %288 = arith.addf %286, %287 : vector<4x128xf32>
    %289 = arith.index_cast %c6_i32 : i32 to index
    %c0_123 = arith.constant 0 : index
    %c0_124 = arith.constant 0 : index
    %290 = vector.load %arg7[%289, %c0_123, %c0_124] : memref<8x4x128xf32, #tpu.memory_space<vmem>>, vector<1x4x128xf32>
    %291 = vector.shape_cast %290 : vector<1x4x128xf32> to vector<4x128xf32>
    %292 = vector.shape_cast %288 : vector<4x128xf32> to vector<1x4x128xf32>
    tpu.vector_store %arg7[%289, %c0_123, %c0_124], %292 {strides = array<i32>} : memref<8x4x128xf32, #tpu.memory_space<vmem>>, vector<1x4x128xf32>,
    %c7_i32 = arith.constant 7 : i32
    %c0_125 = arith.constant 0 : index
    %c0_126 = arith.constant 0 : index
    %293 = vector.load %arg8[%c0_125, %c0_126] : memref<4x128xf32, #tpu.memory_space<vmem>>, vector<4x128xf32>
    %c0_127 = arith.constant 0 : index
    %c0_128 = arith.constant 0 : index
    %294 = vector.load %arg9[%c0_127, %c0_128] : memref<4x128xf32, #tpu.memory_space<vmem>>, vector<4x128xf32>
    %295 = arith.index_cast %c7_i32 : i32 to index
    %c0_129 = arith.constant 0 : index
    %c0_130 = arith.constant 0 : index
    %296 = vector.load %arg1[%295, %c0_129, %c0_130] : memref<8x4x512xf32, #tpu.memory_space<vmem>>, vector<1x4x512xf32>
    %297 = vector.shape_cast %296 : vector<1x4x512xf32> to vector<4x512xf32>
    %cst_131 = arith.constant dense<0.000000e+00> : vector<4x512xf32>
    %298 = tpu.matmul %293, %3, %cst_131 {dimension_numbers = #tpu.dot_dimension_numbers<[1], [0], [0], [1], [0, 0, 1, 1], [], []>} : vector<4x128xf32>, vector<128x512xf32>, vector<4x512xf32> -> vector<4x512xf32>
    %299 = arith.addf %297, %298 : vector<4x512xf32>
    %300 = vector.extract_strided_slice %299 {offsets = [0, 0], sizes = [4, 128], strides = [1, 1]} : vector<4x512xf32> to vector<4x128xf32>
    %301 = arith.negf %300 : vector<4x128xf32>
    %302 = math.exp %301 : vector<4x128xf32>
    %cst_132 = arith.constant 1.000000e+00 : f32
    %303 = vector.broadcast %cst_132 : f32 to vector<4x128xf32>
    %304 = arith.addf %303, %302 : vector<4x128xf32>
    %305 = arith.divf %303, %304 : vector<4x128xf32>
    %306 = vector.extract_strided_slice %299 {offsets = [0, 128], sizes = [4, 128], strides = [1, 1]} : vector<4x512xf32> to vector<4x128xf32>
    %307 = arith.negf %306 : vector<4x128xf32>
    %308 = math.exp %307 : vector<4x128xf32>
    %cst_133 = arith.constant 1.000000e+00 : f32
    %309 = vector.broadcast %cst_133 : f32 to vector<4x128xf32>
    %310 = arith.addf %309, %308 : vector<4x128xf32>
    %311 = arith.divf %309, %310 : vector<4x128xf32>
    %312 = vector.extract_strided_slice %299 {offsets = [0, 256], sizes = [4, 128], strides = [1, 1]} : vector<4x512xf32> to vector<4x128xf32>
    %313 = math.tanh %312 : vector<4x128xf32>
    %314 = vector.extract_strided_slice %299 {offsets = [0, 384], sizes = [4, 128], strides = [1, 1]} : vector<4x512xf32> to vector<4x128xf32>
    %315 = arith.negf %314 : vector<4x128xf32>
    %316 = math.exp %315 : vector<4x128xf32>
    %cst_134 = arith.constant 1.000000e+00 : f32
    %317 = vector.broadcast %cst_134 : f32 to vector<4x128xf32>
    %318 = arith.addf %317, %316 : vector<4x128xf32>
    %319 = arith.divf %317, %318 : vector<4x128xf32>
    %320 = arith.mulf %311, %294 : vector<4x128xf32>
    %321 = arith.mulf %305, %313 : vector<4x128xf32>
    %322 = arith.addf %320, %321 : vector<4x128xf32>
    %323 = math.tanh %322 : vector<4x128xf32>
    %324 = arith.mulf %319, %323 : vector<4x128xf32>
    %c0_135 = arith.constant 0 : index
    %c0_136 = arith.constant 0 : index
    %325 = vector.load %arg8[%c0_135, %c0_136] : memref<4x128xf32, #tpu.memory_space<vmem>>, vector<4x128xf32>
    tpu.vector_store %arg8[%c0_135, %c0_136], %324 {strides = array<i32>} : memref<4x128xf32, #tpu.memory_space<vmem>>, vector<4x128xf32>,
    %c0_137 = arith.constant 0 : index
    %c0_138 = arith.constant 0 : index
    %326 = vector.load %arg9[%c0_137, %c0_138] : memref<4x128xf32, #tpu.memory_space<vmem>>, vector<4x128xf32>
    tpu.vector_store %arg9[%c0_137, %c0_138], %322 {strides = array<i32>} : memref<4x128xf32, #tpu.memory_space<vmem>>, vector<4x128xf32>,
    %cst_139 = arith.constant dense<0.000000e+00> : vector<4x128xf32>
    %327 = tpu.matmul %324, %4, %cst_139 {dimension_numbers = #tpu.dot_dimension_numbers<[1], [0], [0], [1], [0, 0, 1, 1], [], []>} : vector<4x128xf32>, vector<128x128xf32>, vector<4x128xf32> -> vector<4x128xf32>
    %328 = vector.broadcast %5 : vector<1x128xf32> to vector<4x128xf32>
    %329 = arith.addf %327, %328 : vector<4x128xf32>
    %330 = arith.index_cast %c7_i32 : i32 to index
    %c0_140 = arith.constant 0 : index
    %c0_141 = arith.constant 0 : index
    %331 = vector.load %arg7[%330, %c0_140, %c0_141] : memref<8x4x128xf32, #tpu.memory_space<vmem>>, vector<1x4x128xf32>
    %332 = vector.shape_cast %331 : vector<1x4x128xf32> to vector<4x128xf32>
    %333 = vector.shape_cast %329 : vector<4x128xf32> to vector<1x4x128xf32>
    tpu.vector_store %arg7[%330, %c0_140, %c0_141], %333 {strides = array<i32>} : memref<8x4x128xf32, #tpu.memory_space<vmem>>, vector<1x4x128xf32>,
    %c8_i32 = arith.constant 8 : i32
    return
  }
  func.func @transform_0(%arg0: i32) -> (i32, i32, i32) {
    %c0_i32 = arith.constant 0 : i32
    %c0_i32_0 = arith.constant 0 : i32
    %c0_i32_1 = arith.constant 0 : i32
    return %arg0, %c0_i32, %c0_i32_0 : i32, i32, i32
  }
  func.func @transform_1(%arg0: i32) -> (i32, i32) {
    %c0_i32 = arith.constant 0 : i32
    %c0_i32_0 = arith.constant 0 : i32
    %c0_i32_1 = arith.constant 0 : i32
    return %c0_i32, %c0_i32_0 : i32, i32
  }
  func.func @transform_2(%arg0: i32) -> (i32, i32) {
    %c0_i32 = arith.constant 0 : i32
    %c0_i32_0 = arith.constant 0 : i32
    %c0_i32_1 = arith.constant 0 : i32
    return %c0_i32, %c0_i32_0 : i32, i32
  }
  func.func @transform_3(%arg0: i32) -> (i32, i32) {
    %c0_i32 = arith.constant 0 : i32
    %c0_i32_0 = arith.constant 0 : i32
    %c0_i32_1 = arith.constant 0 : i32
    return %c0_i32, %c0_i32_0 : i32, i32
  }
  func.func @transform_4(%arg0: i32) -> (i32, i32) {
    %c0_i32 = arith.constant 0 : i32
    %c0_i32_0 = arith.constant 0 : i32
    %c0_i32_1 = arith.constant 0 : i32
    return %c0_i32, %c0_i32_0 : i32, i32
  }
  func.func @transform_5(%arg0: i32) -> (i32, i32) {
    %c0_i32 = arith.constant 0 : i32
    %c0_i32_0 = arith.constant 0 : i32
    %c0_i32_1 = arith.constant 0 : i32
    return %c0_i32, %c0_i32_0 : i32, i32
  }
  func.func @transform_6(%arg0: i32) -> (i32, i32, i32) {
    %c0_i32 = arith.constant 0 : i32
    %c0_i32_0 = arith.constant 0 : i32
    %c0_i32_1 = arith.constant 0 : i32
    return %arg0, %c0_i32, %c0_i32_0 : i32, i32, i32
  }
  func.func @transform_7(%arg0: i32) -> (i32, i32) {
    %c0_i32 = arith.constant 0 : i32
    %c0_i32_0 = arith.constant 0 : i32
    %c0_i32_1 = arith.constant 0 : i32
    return %c0_i32, %c0_i32_0 : i32, i32
  }
  func.func @transform_8(%arg0: i32) -> (i32, i32) {
    %c0_i32 = arith.constant 0 : i32
    %c0_i32_0 = arith.constant 0 : i32
    %c0_i32_1 = arith.constant 0 : i32
    return %c0_i32, %c0_i32_0 : i32, i32
  }
}

</mosaic_0001>

<bundles_post_ra>
// kernel: tpu_custom_call.1
= control target key start
LH: loop header
LB: loop body
LE: loop exit
PB: predicated region body
PF: predicated region fallthrough
CT: control target
= control target key end

     0   :  { %14 = vsyncpa [#allocation3], 0  ;;  %s3338_s0 = inlined_call_operand.hbm [shape: f32[8,4,512], index: 0, kind: input, shape index: {}]   ;;  %s3339_s1 = inlined_call_operand.hbm [shape: f32[128,512], index: 1, kind: input, shape index: {}]   ;;  %s3340_s2 = inlined_call_operand.hbm [shape: f32[128,128], index: 2, kind: input, shape index: {}]   ;;  %s3341_s3 = inlined_call_operand.hbm [shape: f32[1,128], index: 3, kind: input, shape index: {}]   ;;  %s3342_s4 = inlined_call_operand.hbm [shape: f32[4,128], index: 4, kind: input, shape index: {}]   ;;  %s3343_s5 = inlined_call_operand.vmem [shape: f32[4,128], index: 5, kind: input, shape index: {}]   ;;  %s3344_s6 = inlined_call_operand.hbm [shape: f32[8,4,128], index: 6, kind: output, shape index: {0}]   ;;  %s3345_s7 = inlined_call_operand.hbm [shape: f32[4,128], index: 7, kind: output, shape index: {1}]   ;;  %s3346_s8 = inlined_call_operand.hbm [shape: f32[4,128], index: 8, kind: output, shape index: {2}]  }
   0x1   :  { %15 = vsyncpa [#allocation6], 0 }
   0x2   :  { %16 = vsyncpa [#allocation9], 0 }
   0x3   :  { %17 = vsyncpa [#allocation4], 0  ;;  %s36_s29 = sshll.u32 %s3339_s1, 4  ;;  %s37_s29 = int_to_ptr.hbm [resolvable:$true] %s36_s29 }
   0x4   :  { %18 = vsyncpa [#allocation13], 0  ;;  %s2259_s30 = smov [#allocation5]   ;;  %s63_s12 = sshll.u32 %s3341_s3, 4  ;;  %s64_s12 = int_to_ptr.hbm [resolvable:$true] %s63_s12 }
   0x5   :  { %s38_s9 = sshll.u32 %s2259_s30, 4  ;;  %s2260_s13 = smov 512   ;;  %s39_s9 = int_to_ptr.vmem [resolvable:$true] %s38_s9 }
   0x6   :  { %s2261_s14 = smov 32   ;;  %s2262_s15 = smov [#allocation8]  }
   0x7   :  { %44 = dma.hbm_to_vmem [thread:$0]  %s37_s29, 8192, %s39_s9, [#allocation6], %s2260_s13, %s2260_s13, %s2261_s14  }
   0x8   :  { %s65_s16 = sshll.u32 %s2262_s15, 4  ;;  %s23_s19 = sshll.u32 %s3338_s0, 4  ;;  %s66_s16 = int_to_ptr.vmem [resolvable:$true] %s65_s16  ;;  %s24_s19 = int_to_ptr.hbm [resolvable:$true] %s23_s19 }
   0x9   :  { %68 = dma.hbm_to_vmem [thread:$0]  %s64_s12, 16, %s66_s16, [#allocation9]  }
   0xa   :  { %s2263_s1 = smov [#allocation2]   ;;  %s49_s3 = sshll.u32 %s3340_s2, 4  ;;  %s50_s3 = int_to_ptr.hbm [resolvable:$true] %s49_s3 }
   0xb   :  { %s25_s20 = sshll.u32 %s2263_s1, 4  ;;  %s2264_s23 = smov 256   ;;  %s26_s20 = int_to_ptr.vmem [resolvable:$true] %s25_s20 }
   0xc   :  { %s2265_s24 = smov 16   ;;  %s2266_s25 = smov [#allocation7]  }
   0xd   :  { %31 = dma.hbm_to_vmem [thread:$0]  %s24_s19, 2048, %s26_s20, [#allocation3], %s2264_s23, %s2264_s23, %s2265_s24  }
   0xe   :  { %s51_s26 = sshll.u32 %s2266_s25, 4  ;;  %s2267_s27 = smov 128   ;;  %s52_s26 = int_to_ptr.vmem [resolvable:$true] %s51_s26 }
   0xf   :  { %s2268_s28 = smov 8   ;;  %s74_s30 = sshll.u32 %s3342_s4, 4  ;;  %s75_s30 = int_to_ptr.hbm [resolvable:$true] %s74_s30 }
  0x10   :  { %57 = dma.hbm_to_vmem [thread:$0]  %s50_s3, 2048, %s52_s26, [#allocation6], %s2267_s27, %s2267_s27, %s2268_s28  }
  0x11   :  { %s2269_s9 = smov [#allocation10]  }
  0x12   :  { %s76_s10 = sshll.u32 %s2269_s9, 4  ;;  %s77_s10 = int_to_ptr.vmem [resolvable:$true] %s76_s10 }
  0x13   :  { %79 = dma.hbm_to_vmem [thread:$0]  %s75_s30, 64, %s77_s10, [#allocation9]  }
  0x14   :  { %2249 = dma.done.wait [#allocation3], 2048  }
  0x15   :  { %2250 = vsyncadd [#allocation3], 4294965248 }
  0x16   :  { %2251 = dma.done.wait [#allocation6], 10240  }
  0x17   :  { %2252 = vsyncadd [#allocation6], 4294957056 }
  0x18   :  { %2253 = dma.done.wait [#allocation9], 80  }
  0x19   :  { %2254 = vsyncadd [#allocation9], 4294967216  ;;  %v2335_v0 = vld [vmem:[#allocation5 + $0x1e8] sm:$0xff]  ;;  %v2337_v1 = vld [vmem:[#allocation5 + $0x1f8] sm:$0xff]  ;;  %vm281_vm0 = vcmask 1043456   ;;  %s1733_s12 = sshll.u32 %s3345_s7, 4  ;;  %s1734_s12 = int_to_ptr.hbm [resolvable:$true] %s1733_s12 }
  0x1a   :  { %3494 = vst [vmem:[#allocation20_spill] sm:$0xff] %v2335_v0  ;;  %v2339_v2 = vld [vmem:[#allocation5 + $0x1e0] sm:$0xff]  ;;  %215 = vmatpush.msra.mxu1 %v2335_v0  ;;  %255 = vmatpush.msra.mxu3 %v2337_v1  ;;  %v2343_v3 = vld [vmem:[#allocation5 + $0x1c8] sm:$0xff]  ;;  %v2345_v4 = vld [vmem:[#allocation5 + $0x1f0] sm:$0xff]  ;;  %s2270_s13 = smov [#allocation12]   ;;  %s1744_s17 = sshll.u32 %s3346_s8, 4  ;;  %s1745_s17 = int_to_ptr.hbm [resolvable:$true] %s1744_s17 }
  0x1b   :  { %3495 = vst [vmem:[#allocation21_spill] sm:$0xff] %v2343_v3  ;;  %v2347_v5 = vld [vmem:[#allocation5 + $0x1d8] sm:$0xff]  ;;  %195 = vmatpush.msra.mxu0 %v2339_v2  ;;  %235 = vmatpush.msra.mxu2 %v2345_v4  ;;  %v2351_v6 = vld [vmem:[#allocation5 + $0x1c0] sm:$0xff]  ;;  %v2353_v7 = vld [vmem:[#allocation5 + $0x1a8] sm:$0xff]  ;;  %s1731_s14 = sshll.u32 %s2270_s13, 4  ;;  %s2271_s18 = smov [#allocation14]   ;;  %s1732_s14 = int_to_ptr.vmem [resolvable:$true] %s1731_s14 }
  0x1c   :  { %3496 = vst [vmem:[#allocation22_spill] sm:$0xff] %v2353_v7  ;;  %v2355_v8 = vld [vmem:[#allocation5 + $0x1d0] sm:$0xff]  ;;  %216 = vmatpush.msra.mxu1 %v2343_v3  ;;  %256 = vmatpush.msra.mxu3 %v2347_v5  ;;  %v2359_v9 = vld [vmem:[#allocation5 + $0x1b8] sm:$0xff]  ;;  %v2361_v10 = vld [vmem:[#allocation5 + $0x1a0] sm:$0xff]  ;;  %s1742_s19 = sshll.u32 %s2271_s18, 4  ;;  %s2272_s1 = smov [#allocation11]   ;;  %s1743_s19 = int_to_ptr.vmem [resolvable:$true] %s1742_s19 }
  0x1d   :  { %196 = vmatpush.msra.mxu0 %v2351_v6  ;;  %236 = vmatpush.msra.mxu2 %v2355_v8  ;;  %v2365_v11 = vld [vmem:[#allocation5 + $0x188] sm:$0xff]  ;;  %v2367_v12 = vld [vmem:[#allocation5 + $0x1b0] sm:$0xff]  ;;  %v2369_v13 = vld [vmem:[#allocation5 + $0x198] sm:$0xff]  ;;  %s1717_s20 = sshll.u32 %s2272_s1, 4  ;;  %s1719_s7 = sshll.u32 %s3344_s6, 4  ;;  %s1718_s20 = int_to_ptr.vmem [resolvable:$true] %s1717_s20  ;;  %s1720_s7 = int_to_ptr.hbm [resolvable:$true] %s1719_s7 }
  0x1e   :  { %3497 = vst [vmem:[#allocation23_spill] sm:$0xff] %v2365_v11  ;;  %217 = vmatpush.msra.mxu1 %v2353_v7  ;;  %257 = vmatpush.msra.mxu3 %v2359_v9  ;;  %v2373_v14 = vld [vmem:[#allocation5 + $0x180] sm:$0xff]  ;;  %v2375_v15 = vld [vmem:[#allocation5 + $0x190] sm:$0xff]  ;;  %v2379_v16 = vld [vmem:[#allocation5 + $0x168] sm:$0xff]  ;;  %s2273_s3 = smov 64   ;;  %s2274_s23 = smov 4  }
  0x1f   :  { %197 = vmatpush.msra.mxu0 %v2361_v10  ;;  %237 = vmatpush.msra.mxu2 %v2367_v12  ;;  %3498 = vst [vmem:[#allocation24_spill] sm:$0xff] %v2379_v16  ;;  %v2381_v17 = vld [vmem:[#allocation5 + $0x178] sm:$0xff]  ;;  %v2385_v18 = vld [vmem:[#allocation5 + $0x160] sm:$0xff]  ;;  %v2387_v19 = vld [vmem:[#allocation5 + $0x170] sm:$0xff] }
  0x20   :  { %218 = vmatpush.msra.mxu1 %v2365_v11  ;;  %258 = vmatpush.msra.mxu3 %v2369_v13  ;;  %v2391_v20 = vld [vmem:[#allocation5 + $0x148] sm:$0xff]  ;;  %v2393_v21 = vld [vmem:[#allocation5 + $0x158] sm:$0xff]  ;;  %v2397_v22 = vld [vmem:[#allocation5 + $0x140] sm:$0xff] }
  0x21   :  { %198 = vmatpush.msra.mxu0 %v2373_v14  ;;  %238 = vmatpush.msra.mxu2 %v2375_v15  ;;  %3499 = vst [vmem:[#allocation25_spill] sm:$0xff] %v2391_v20  ;;  %v2399_v23 = vld [vmem:[#allocation5 + $0x150] sm:$0xff]  ;;  %v2403_v24 = vld [vmem:[#allocation5 + $0x128] sm:$0xff]  ;;  %v2405_v25 = vld [vmem:[#allocation5 + $0x138] sm:$0xff] }
  0x22   :  { %219 = vmatpush.msra.mxu1 %v2379_v16  ;;  %259 = vmatpush.msra.mxu3 %v2381_v17  ;;  %3500 = vst [vmem:[#allocation26_spill] sm:$0xff] %v2403_v24  ;;  %v2409_v26 = vld [vmem:[#allocation5 + $0x120] sm:$0xff]  ;;  %v2411_v27 = vld [vmem:[#allocation5 + $0x130] sm:$0xff]  ;;  %v2415_v28 = vld [vmem:[#allocation5 + $0x108] sm:$0xff] }
  0x23   :  { %199 = vmatpush.msra.mxu0 %v2385_v18  ;;  %239 = vmatpush.msra.mxu2 %v2387_v19  ;;  %3501 = vst [vmem:[#allocation27_spill] sm:$0xff] %v2415_v28  ;;  %v2417_v29 = vld [vmem:[#allocation5 + $0x118] sm:$0xff]  ;;  %v2421_v30 = vld [vmem:[#allocation5 + $0x100] sm:$0xff]  ;;  %v2423_v31 = vld [vmem:[#allocation5 + $0x110] sm:$0xff] }
  0x24   :  { %220 = vmatpush.msra.mxu1 %v2391_v20  ;;  %260 = vmatpush.msra.mxu3 %v2393_v21  ;;  %v2427_v32 = vld [vmem:[#allocation5 + $0xe8] sm:$0xff]  ;;  %v2429_v33 = vld [vmem:[#allocation5 + $0xf8] sm:$0xff]  ;;  %v2433_v34 = vld [vmem:[#allocation5 + $0xe0] sm:$0xff] }
  0x25   :  { %200 = vmatpush.msra.mxu0 %v2397_v22  ;;  %240 = vmatpush.msra.mxu2 %v2399_v23  ;;  %3502 = vst [vmem:[#allocation28_spill] sm:$0xff] %v2427_v32  ;;  %v2435_v35 = vld [vmem:[#allocation5 + $0xf0] sm:$0xff]  ;;  %v2439_v36 = vld [vmem:[#allocation5 + $0xc8] sm:$0xff]  ;;  %v2441_v37 = vld [vmem:[#allocation5 + $0xd8] sm:$0xff] }
  0x26   :  { %221 = vmatpush.msra.mxu1 %v2403_v24  ;;  %261 = vmatpush.msra.mxu3 %v2405_v25  ;;  %3503 = vst [vmem:[#allocation29_spill] sm:$0xff] %v2433_v34  ;;  %v2445_v38 = vld [vmem:[#allocation5 + $0xc0] sm:$0xff]  ;;  %v2447_v39 = vld [vmem:[#allocation5 + $0xd0] sm:$0xff]  ;;  %v2451_v40 = vld [vmem:[#allocation5 + $0xa8] sm:$0xff] }
  0x27   :  { %201 = vmatpush.msra.mxu0 %v2409_v26  ;;  %241 = vmatpush.msra.mxu2 %v2411_v27  ;;  %3504 = vst [vmem:[#allocation30_spill] sm:$0xff] %v2439_v36  ;;  %v2453_v41 = vld [vmem:[#allocation5 + $0xb8] sm:$0xff]  ;;  %v2457_v42 = vld [vmem:[#allocation5 + $0xa0] sm:$0xff]  ;;  %v2459_v43 = vld [vmem:[#allocation5 + $0xb0] sm:$0xff] }
  0x28   :  { %222 = vmatpush.msra.mxu1 %v2415_v28  ;;  %262 = vmatpush.msra.mxu3 %v2417_v29  ;;  %3505 = vst [vmem:[#allocation31_spill] sm:$0xff] %v2441_v37  ;;  %v2463_v44 = vld [vmem:[#allocation5 + $0x88] sm:$0xff]  ;;  %v2465_v45 = vld [vmem:[#allocation5 + $0x98] sm:$0xff]  ;;  %v106_v46 = vld [vmem:[#allocation10] sm:$0xf] }
  0x29   :  { %202 = vmatpush.msra.mxu0 %v2421_v30  ;;  %242 = vmatpush.msra.mxu2 %v2423_v31  ;;  %3506 = vst [vmem:[#allocation32_spill] sm:$0xff] %v2445_v38  ;;  %v2469_v47 = vld [vmem:[#allocation5 + $0x80] sm:$0xff]  ;;  %v2471_v48 = vld [vmem:[#allocation5 + $0x90] sm:$0xff]  ;;  %v2475_v49 = vld [vmem:[#allocation5 + $0x68] sm:$0xff] }
  0x2a   :  { %223 = vmatpush.msra.mxu1 %v2427_v32  ;;  %263 = vmatpush.msra.mxu3 %v2429_v33  ;;  %3507 = vst [vmem:[#allocation33_spill] sm:$0xff] %v2451_v40  ;;  %v2477_v50 = vld [vmem:[#allocation5 + $0x78] sm:$0xff]  ;;  %v2481_v51 = vld [vmem:[#allocation5 + $0x60] sm:$0xff]  ;;  %v2483_v52 = vld [vmem:[#allocation5 + $0x70] sm:$0xff] }
  0x2b   :  { %203 = vmatpush.msra.mxu0 %v2433_v34  ;;  %243 = vmatpush.msra.mxu2 %v2435_v35  ;;  %3508 = vst [vmem:[#allocation34_spill] sm:$0xff] %v2453_v41  ;;  %v2487_v53 = vld [vmem:[#allocation5 + $0x48] sm:$0xff]  ;;  %v2489_v54 = vld [vmem:[#allocation5 + $0x58] sm:$0xff]  ;;  %v2493_v55 = vld [vmem:[#allocation5 + $0x40] sm:$0xff] }
  0x2c   :  { %224 = vmatpush.msra.mxu1 %v2439_v36  ;;  %264 = vmatpush.msra.mxu3 %v2441_v37  ;;  %3509 = vst [vmem:[#allocation35_spill] sm:$0xff] %v2457_v42  ;;  %v2495_v56 = vld [vmem:[#allocation5 + $0x50] sm:$0xff]  ;;  %v2499_v57 = vld [vmem:[#allocation5 + $0x28] sm:$0xff]  ;;  %v2501_v58 = vld [vmem:[#allocation5 + $0x38] sm:$0xff] }
  0x2d   :  { %204 = vmatpush.msra.mxu0 %v2445_v38  ;;  %244 = vmatpush.msra.mxu2 %v2447_v39  ;;  %3510 = vst [vmem:[#allocation36_spill] sm:$0xff] %v2463_v44  ;;  %v2505_v59 = vld [vmem:[#allocation5 + $0x20] sm:$0xff]  ;;  %v2507_v60 = vld [vmem:[#allocation5 + $0x30] sm:$0xff]  ;;  %v2511_v61 = vld [vmem:[#allocation5 + $0x8] sm:$0xff] }
  0x2e   :  { %3511 = vst [vmem:[#allocation37_spill] sm:$0xff] %v2465_v45  ;;  %225 = vmatpush.msra.mxu1 %v2451_v40  ;;  %265 = vmatpush.msra.mxu3 %v2453_v41  ;;  %v2513_v62 = vld [vmem:[#allocation5 + $0x18] sm:$0xff] }
  0x2f   :  { %3512 = vst [vmem:[#allocation38_spill] sm:$0xff] %v2469_v47  ;;  %205 = vmatpush.msra.mxu0 %v2457_v42  ;;  %245 = vmatpush.msra.mxu2 %v2459_v43 }
  0x30   :  { %107 = vst [vmem:[#allocation12] sm:$0xf] %v106_v46  ;;  %226 = vmatpush.msra.mxu1 %v2463_v44  ;;  %266 = vmatpush.msra.mxu3 %v2465_v45  ;;  %v2519_v46 = vld [vmem:[#allocation5] sm:$0xff]  ;;  %v2533_v45 = vld [vmem:[#allocation7 + $0x68] sm:$0xff] }
  0x31   :  { %3513 = vst [vmem:[#allocation39_spill] sm:$0xff] %v2475_v49  ;;  %206 = vmatpush.msra.mxu0 %v2469_v47  ;;  %246 = vmatpush.msra.mxu2 %v2471_v48 }
  0x32   :  { %3514 = vst [vmem:[#allocation40_spill] sm:$0xff] %v2477_v50  ;;  %227 = vmatpush.msra.mxu1 %v2475_v49  ;;  %267 = vmatpush.msra.mxu3 %v2477_v50  ;;  %v2525_v50 = vld [vmem:[#allocation7 + $0x78] sm:$0xff] }
  0x33   :  { %3515 = vst [vmem:[#allocation41_spill] sm:$0xff] %v2481_v51  ;;  %207 = vmatpush.msra.mxu0 %v2481_v51  ;;  %247 = vmatpush.msra.mxu2 %v2483_v52 }
  0x34   :  { %3516 = vst [vmem:[#allocation42_spill] sm:$0xff] %v2487_v53  ;;  %228 = vmatpush.msra.mxu1 %v2487_v53  ;;  %268 = vmatpush.msra.mxu3 %v2489_v54 }
  0x35   :  { %3517 = vst [vmem:[#allocation43_spill] sm:$0xff] %v2489_v54  ;;  %208 = vmatpush.msra.mxu0 %v2493_v55  ;;  %248 = vmatpush.msra.mxu2 %v2495_v56  ;;  %v2521_v54 = vld [vmem:[#allocation5 + $0x10] sm:$0xff] }
  0x36   :  { %3518 = vst [vmem:[#allocation44_spill] sm:$0xff] %v2493_v55  ;;  %229 = vmatpush.msra.mxu1 %v2499_v57  ;;  %269 = vmatpush.msra.mxu3 %v2501_v58 }
  0x37   :  { %3519 = vst [vmem:[#allocation45_spill] sm:$0xff] %v2495_v56  ;;  %v191_v63 = vld [vmem:[#allocation12] sm:$0xf]  ;;  %209 = vmatpush.msra.mxu0 %v2505_v59  ;;  %249 = vmatpush.msra.mxu2 %v2507_v60 }
  0x38   :  { %3520 = vst [vmem:[#allocation46_spill] sm:$0xff] %v2499_v57  ;;  %230 = vmatpush.msra.mxu1 %v2511_v61  ;;  %270 = vmatpush.msra.mxu3 %v2513_v62 }
  0x39   :  { %3521 = vst [vmem:[#allocation47_spill] sm:$0xff] %v2501_v58  ;;  %231 = vmatmul.f32.vlgmr.msra.gmra.mxu1 %v191_v63  ;;  %271 = vmatmul.f32.vlgmr.msra.gmra.mxu3 %v191_v63  ;;  %v2529_v58 = vld [vmem:[#allocation7 + $0x70] sm:$0xff] }
  0x3a   :  { %3522 = vst [vmem:[#allocation48_spill] sm:$0xff] %v2505_v59  ;;  %210 = vmatpush.msra.mxu0 %v2519_v46  ;;  %250 = vmatpush.msra.mxu2 %v2521_v54 }
  0x3b   :  { %3523 = vst [vmem:[#allocation49_spill] sm:$0xff] %v2507_v60  ;;  %211 = vmatmul.f32.vlgmr.msra.gmra.mxu0 %v191_v63  ;;  %251 = vmatmul.f32.vlgmr.msra.gmra.mxu2 %v191_v63  ;;  %v2619_v63 = vld [vmem:[#allocation7 + $0x60] sm:$0xff] }
  0x3c   :  { %3524 = vst [vmem:[#allocation50_spill] sm:$0xff] %v2511_v61  ;;  %362 = vmatpush.msrb.mxu0 %v2525_v50  ;;  %388 = vmatpush.msrb.mxu1 %v2339_v2 }
  0x3d   :  { %3525 = vst [vmem:[#allocation51_spill] sm:$0xff] %v2513_v62  ;;  %408 = vmatpush.msrb.mxu2 %v2335_v0  ;;  %428 = vmatpush.msrb.mxu3 %v2345_v4 }
  0x3e   :  { %3526 = vst [vmem:[#allocation52_spill] sm:$0xff] %v2519_v46  ;;  %363 = vmatpush.msrb.mxu0 %v2529_v58  ;;  %389 = vmatpush.msrb.mxu1 %v2351_v6 }
  0x3f   :  { %3527 = vst [vmem:[#allocation53_spill] sm:$0xff] %v2521_v54  ;;  %409 = vmatpush.msrb.mxu2 %v2343_v3  ;;  %429 = vmatpush.msrb.mxu3 %v2355_v8 }
  0x40   :  { %364 = vmatpush.msrb.mxu0 %v2533_v45  ;;  %390 = vmatpush.msrb.mxu1 %v2361_v10 }
  0x41   :  { %410 = vmatpush.msrb.mxu2 %v2353_v7  ;;  %430 = vmatpush.msrb.mxu3 %v2367_v12 }
  0x42   :  { %391 = vmatpush.msrb.mxu1 %v2373_v14  ;;  %365 = vmatpush.msrb.mxu0 %v2619_v63 }
  0x43   :  { %411 = vmatpush.msrb.mxu2 %v2365_v11  ;;  %431 = vmatpush.msrb.mxu3 %v2375_v15 }
  0x44   :  { %392 = vmatpush.msrb.mxu1 %v2385_v18 }
  0x45   :  { %412 = vmatpush.msrb.mxu2 %v2379_v16  ;;  %432 = vmatpush.msrb.mxu3 %v2387_v19 }
  0x46   :  { %393 = vmatpush.msrb.mxu1 %v2397_v22 }
  0x47   :  { %413 = vmatpush.msrb.mxu2 %v2391_v20  ;;  %433 = vmatpush.msrb.mxu3 %v2399_v23 }
  0x48   :  { %394 = vmatpush.msrb.mxu1 %v2409_v26 }
  0x49   :  { %414 = vmatpush.msrb.mxu2 %v2403_v24  ;;  %434 = vmatpush.msrb.mxu3 %v2411_v27 }
  0x4a   :  { %395 = vmatpush.msrb.mxu1 %v2421_v30 }
  0x4b   :  { %415 = vmatpush.msrb.mxu2 %v2415_v28  ;;  %435 = vmatpush.msrb.mxu3 %v2423_v31 }
  0x4c   :  { %396 = vmatpush.msrb.mxu1 %v2433_v34 }
  0x4d   :  { %416 = vmatpush.msrb.mxu2 %v2427_v32  ;;  %436 = vmatpush.msrb.mxu3 %v2435_v35 }
  0x4e   :  { %397 = vmatpush.msrb.mxu1 %v2445_v38 }
  0x4f   :  { %417 = vmatpush.msrb.mxu2 %v2439_v36  ;;  %437 = vmatpush.msrb.mxu3 %v2447_v39 }
  0x50   :  { %398 = vmatpush.msrb.mxu1 %v2457_v42 }
  0x51   :  { %418 = vmatpush.msrb.mxu2 %v2451_v40  ;;  %438 = vmatpush.msrb.mxu3 %v2459_v43 }
  0x52   :  { %399 = vmatpush.msrb.mxu1 %v2469_v47 }
  0x53   :  { %419 = vmatpush.msrb.mxu2 %v2463_v44  ;;  %439 = vmatpush.msrb.mxu3 %v2471_v48 }
  0x54   :  { %400 = vmatpush.msrb.mxu1 %v2481_v51 }
  0x55   :  { %420 = vmatpush.msrb.mxu2 %v2475_v49  ;;  %440 = vmatpush.msrb.mxu3 %v2483_v52 }
  0x56   :  { %401 = vmatpush.msrb.mxu1 %v2493_v55 }
  0x57   :  { %421 = vmatpush.msrb.mxu2 %v2487_v53  ;;  %441 = vmatpush.msrb.mxu3 %v2495_v56 }
  0x58   :  { %402 = vmatpush.msrb.mxu1 %v2505_v59 }
  0x59   :  { %422 = vmatpush.msrb.mxu2 %v2499_v57  ;;  %442 = vmatpush.msrb.mxu3 %v2507_v60 }
  0x5a   :  { %403 = vmatpush.msrb.mxu1 %v2519_v46 }
  0x5b   :  { %423 = vmatpush.msrb.mxu2 %v2511_v61  ;;  %443 = vmatpush.msrb.mxu3 %v2521_v54 }
  0x5c   :  { %551 = vmatpush.msra.mxu1 %v2525_v50 }
  0x5d   :  { %578 = vmatpush.msra.mxu2 %v2339_v2  ;;  %598 = vmatpush.msra.mxu3 %v2335_v0 }
  0x5e   :  { %552 = vmatpush.msra.mxu1 %v2529_v58 }
  0x5f   :  { %579 = vmatpush.msra.mxu2 %v2351_v6  ;;  %599 = vmatpush.msra.mxu3 %v2343_v3 }
  0x60   :  { %553 = vmatpush.msra.mxu1 %v2533_v45 }
  0x61   :  { %580 = vmatpush.msra.mxu2 %v2361_v10  ;;  %600 = vmatpush.msra.mxu3 %v2353_v7 }
  0x62   :  { %554 = vmatpush.msra.mxu1 %v2619_v63 }
  0x63   :  { %581 = vmatpush.msra.mxu2 %v2373_v14  ;;  %601 = vmatpush.msra.mxu3 %v2365_v11 }
  0x65   :  { %582 = vmatpush.msra.mxu2 %v2385_v18  ;;  %602 = vmatpush.msra.mxu3 %v2379_v16  ;;  %v108_v16 = vld [vmem:[%s3343_s5] sm:$0xf] }
  0x66   :  { %109 = vst [vmem:[#allocation14] sm:$0xf] %v108_v16 }
  0x67   :  { %583 = vmatpush.msra.mxu2 %v2397_v22  ;;  %603 = vmatpush.msra.mxu3 %v2391_v20  ;;  %v2663_v20 = vld [vmem:[#allocation7 + $0x8] sm:$0xff] }
  0x68   :  { %3534 = vst [vmem:[#allocation60_spill] sm:$0xff] %v2663_v20 }
  0x69   :  { %584 = vmatpush.msra.mxu2 %v2409_v26  ;;  %604 = vmatpush.msra.mxu3 %v2403_v24  ;;  %v2659_v24 = vld [vmem:[#allocation7 + $0x10] sm:$0xff] }
  0x6a   :  { %3533 = vst [vmem:[#allocation59_spill] sm:$0xff] %v2659_v24 }
  0x6b   :  { %585 = vmatpush.msra.mxu2 %v2421_v30  ;;  %605 = vmatpush.msra.mxu3 %v2415_v28  ;;  %v2655_v28 = vld [vmem:[#allocation7 + $0x18] sm:$0xff] }
  0x6c   :  { %3532 = vst [vmem:[#allocation58_spill] sm:$0xff] %v2655_v28 }
  0x6d   :  { %586 = vmatpush.msra.mxu2 %v2433_v34  ;;  %606 = vmatpush.msra.mxu3 %v2427_v32  ;;  %v2651_v32 = vld [vmem:[#allocation7 + $0x20] sm:$0xff] }
  0x6e   :  { %3531 = vst [vmem:[#allocation57_spill] sm:$0xff] %v2651_v32 }
  0x6f   :  { %587 = vmatpush.msra.mxu2 %v2445_v38  ;;  %607 = vmatpush.msra.mxu3 %v2439_v36  ;;  %v2647_v36 = vld [vmem:[#allocation7 + $0x28] sm:$0xff] }
  0x70   :  { %3530 = vst [vmem:[#allocation56_spill] sm:$0xff] %v2647_v36 }
  0x71   :  { %588 = vmatpush.msra.mxu2 %v2457_v42  ;;  %608 = vmatpush.msra.mxu3 %v2451_v40  ;;  %v2643_v40 = vld [vmem:[#allocation7 + $0x30] sm:$0xff] }
  0x72   :  { %3529 = vst [vmem:[#allocation55_spill] sm:$0xff] %v2643_v40 }
  0x73   :  { %589 = vmatpush.msra.mxu2 %v2469_v47  ;;  %609 = vmatpush.msra.mxu3 %v2463_v44  ;;  %v2623_v44 = vld [vmem:[#allocation7 + $0x58] sm:$0xff] }
  0x74   :  { %366 = vmatpush.msrb.mxu0 %v2623_v44  ;;  %555 = vmatpush.msra.mxu1 %v2623_v44 }
  0x75   :  { %590 = vmatpush.msra.mxu2 %v2481_v51  ;;  %610 = vmatpush.msra.mxu3 %v2475_v49  ;;  %v2639_v49 = vld [vmem:[#allocation7 + $0x38] sm:$0xff] }
  0x76   :  { %3528 = vst [vmem:[#allocation54_spill] sm:$0xff] %v2639_v49 }
  0x77   :  { %591 = vmatpush.msra.mxu2 %v2493_v55  ;;  %611 = vmatpush.msra.mxu3 %v2487_v53  ;;  %v2627_v53 = vld [vmem:[#allocation7 + $0x50] sm:$0xff] }
  0x78   :  { %367 = vmatpush.msrb.mxu0 %v2627_v53  ;;  %556 = vmatpush.msra.mxu1 %v2627_v53 }
  0x79   :  { %592 = vmatpush.msra.mxu2 %v2505_v59  ;;  %612 = vmatpush.msra.mxu3 %v2499_v57  ;;  %v2631_v57 = vld [vmem:[#allocation7 + $0x48] sm:$0xff] }
  0x7a   :  { %368 = vmatpush.msrb.mxu0 %v2631_v57  ;;  %557 = vmatpush.msra.mxu1 %v2631_v57 }
  0x7b   :  { %593 = vmatpush.msra.mxu2 %v2519_v46  ;;  %613 = vmatpush.msra.mxu3 %v2511_v61  ;;  %v2635_v61 = vld [vmem:[#allocation7 + $0x40] sm:$0xff] }
  0x7c   :  { %369 = vmatpush.msrb.mxu0 %v2635_v61  ;;  %558 = vmatpush.msra.mxu1 %v2635_v61  ;;  %v2667_v46 = vld [vmem:[#allocation7] sm:$0xff] }
  0x7d   :  { %3535 = vst [vmem:[#allocation61_spill] sm:$0xff] %v2667_v46 }
  0x7e   :  { %370 = vmatpush.msrb.mxu0 %v2639_v49  ;;  %559 = vmatpush.msra.mxu1 %v2639_v49 }
  0x80   :  { %371 = vmatpush.msrb.mxu0 %v2643_v40  ;;  %560 = vmatpush.msra.mxu1 %v2643_v40 }
  0x82   :  { %372 = vmatpush.msrb.mxu0 %v2647_v36  ;;  %561 = vmatpush.msra.mxu1 %v2647_v36 }
  0x84   :  { %373 = vmatpush.msrb.mxu0 %v2651_v32  ;;  %562 = vmatpush.msra.mxu1 %v2651_v32  ;;  %v3539_v32 = vld [vmem:[#allocation47_spill] sm:$0xff] }
  0x86   :  { %374 = vmatpush.msrb.mxu0 %v2655_v28  ;;  %563 = vmatpush.msra.mxu1 %v2655_v28  ;;  %v194_v28 = vld [vmem:[#allocation2 + $0x8] sm:$0xff] }
  0x88   :  { %375 = vmatpush.msrb.mxu0 %v2659_v24  ;;  %564 = vmatpush.msra.mxu1 %v2659_v24 }
  0x8a   :  { %376 = vmatpush.msrb.mxu0 %v2663_v20  ;;  %565 = vmatpush.msra.mxu1 %v2663_v20  ;;  %v193_v20 = vld [vmem:[#allocation2] sm:$0xff] }
  0x8c   :  { %377 = vmatpush.msrb.mxu0 %v2667_v46  ;;  %566 = vmatpush.msra.mxu1 %v2667_v46 }
  0x8e   :  { %448 = vmatpush.msra.mxu0 %v2337_v1 }
  0x90   :  { %449 = vmatpush.msra.mxu0 %v2347_v5 }
  0x92   :  { %450 = vmatpush.msra.mxu0 %v2359_v9 }
  0x94   :  { %451 = vmatpush.msra.mxu0 %v2369_v13 }
  0x96   :  { %452 = vmatpush.msra.mxu0 %v2381_v17 }
  0x98   :  { %453 = vmatpush.msra.mxu0 %v2393_v21 }
  0x9a   :  { %454 = vmatpush.msra.mxu0 %v2405_v25 }
  0x9c   :  { %455 = vmatpush.msra.mxu0 %v2417_v29 }
  0x9e   :  { %456 = vmatpush.msra.mxu0 %v2429_v33 }
  0xa0   :  { %457 = vmatpush.msra.mxu0 %v2441_v37 }
  0xa2   :  { %458 = vmatpush.msra.mxu0 %v2453_v41 }
  0xb6   :  { %v232_v59 = vpop.f32.mrf.mxu1 }
  0xb7   :  { %v279_v11 = vrot.slane %v232_v59, 4 }
  0xb8   :  { %v212_v55 = vpop.f32.mrf.mxu0 }
  0xb9   :  { %v282_v46 = vsel %vm281_vm0, %v212_v55, %v279_v11 }
  0xba   :  { %v286_v7 = vadd.f32 %v282_v46, %v193_v20 }
  0xbc   :  { %v1765_v24 = vmul.f32 -1.442695, %v286_v7  ;;  %v308_v51 = vrot.slane %v286_v7, 4  ;;  %v272_v3 = vpop.f32.mrf.mxu3 }
  0xbd   :  { %v280_v16 = vrot.slane %v272_v3, 4 }
  0xbe   :  { %1806 = vpow2.f32 %v1765_v24  ;;  %v1766_v59 = vmul.f32 -1.442695, %v308_v51  ;;  %v252_v47 = vpop.f32.mrf.mxu2  ;;  %v3536_v51 = vld [vmem:[#allocation37_spill] sm:$0xff] }
  0xbf   :  { %v283_v0 = vsel %vm281_vm0, %v252_v47, %v280_v16  ;;  %459 = vmatpush.msra.mxu0 %v3536_v51  ;;  %v3537_v47 = vld [vmem:[#allocation40_spill] sm:$0xff] }
  0xc0   :  { %1808 = vpow2.f32 %v1766_v59  ;;  %v287_v11 = vadd.f32 %v283_v0, %v194_v28  ;;  %v3538_v0 = vld [vmem:[#allocation43_spill] sm:$0xff] }
  0xc1   :  { %460 = vmatpush.msra.mxu0 %v3537_v47 }
  0xc2   :  { %v331_v20 = vrot.slane %v287_v11, 4 }
  0xc3   :  { %461 = vmatpush.msra.mxu0 %v3538_v0 }
  0xc4   :  { %v1807_v7 = vpop.eup %1806  ;;  %v1767_v55 = vmul.f32 -1.442695, %v331_v20 }
  0xc5   :  { %v291_v3 = vadd.f32 1.0, %v1807_v7  ;;  %462 = vmatpush.msra.mxu0 %v3539_v32 }
  0xc6   :  { %v1809_v46 = vpop.eup %1808  ;;  %1810 = vpow2.f32 %v1767_v55 }
  0xc7   :  { %1812 = vrcp.f32 %v291_v3  ;;  %v313_v24 = vadd.f32 1.0, %v1809_v46  ;;  %463 = vmatpush.msra.mxu0 %v2513_v62  ;;  %v303_v46 = vand.u32 2147483648, %v291_v3  ;;  %v301_v36 = vand.u32 2147483647, %v291_v3 }
  0xc8   :  { %vm297_vm2 = vweird.f32 %v291_v3 }
  0xc9   :  { %1814 = vrcp.f32 %v313_v24  ;;  %v325_v47 = vand.u32 2147483648, %v313_v24  ;;  %vm319_vm4 = vweird.f32 %v313_v24  ;;  %v304_v41 = vor.u32 1.1754944e-38, %v303_v46 }
  0xca   :  { %vm302_vm6 = vcmp.eq.f32.partialorder %v301_v36, 8.507059e+37 }
  0xcc   :  { %v1811_v28 = vpop.eup %1810 }
  0xcd   :  { %v1813_v16 = vpop.eup %1812  ;;  %v336_v59 = vadd.f32 1.0, %v1811_v28  ;;  %v323_v28 = vand.u32 2147483647, %v313_v24 }
  0xce   :  { %v293_v20 = vmul.f32 %v1813_v16, %v291_v3  ;;  %vm298_vm1 = vweird.f32 %v1813_v16 }
  0xcf   :  { %v1815_v7 = vpop.eup %1814  ;;  %1816 = vrcp.f32 %v336_v59  ;;  %vm299_vm5 = vmor %vm297_vm2, %vm298_vm1  ;;  %vm324_vm8 = vcmp.eq.f32.partialorder %v323_v28, 8.507059e+37  ;;  %v348_v46 = vand.u32 2147483648, %v336_v59  ;;  %vm342_vm10 = vweird.f32 %v336_v59  ;;  %v3571_v28 = vld [vmem:[#allocation25_spill] sm:$0xff] }
  0xd0   :  { %v294_v55 = vsub.f32 1.0, %v293_v20  ;;  %v315_v54 = vmul.f32 %v1815_v7, %v313_v24  ;;  %1818 = vtanh.f32 %v287_v11  ;;  %vm320_vm3 = vweird.f32 %v1815_v7 }
  0xd1   :  { %vm321_vm7 = vmor %vm319_vm4, %vm320_vm3  ;;  %v346_v36 = vand.u32 2147483647, %v336_v59 }
  0xd2   :  { %v316_v42 = vsub.f32 1.0, %v315_v54  ;;  %v295_v51 = vmul.f32 %v1813_v16, %v294_v55  ;;  %v192_v54 = vld [vmem:[#allocation14] sm:$0xf]  ;;  %v326_v55 = vor.u32 1.1754944e-38, %v325_v47 }
  0xd3   :  { %vm347_vm12 = vcmp.eq.f32.partialorder %v346_v36, 8.507059e+37  ;;  %v3581_v36 = vld [vmem:[#allocation50_spill] sm:$0xff] }
  0xd4   :  { %v317_v0 = vmul.f32 %v1815_v7, %v316_v42  ;;  %v296_v60 = vadd.f32 %v1813_v16, %v295_v51 }
  0xd5   :  { %v1817_v32 = vpop.eup %1816 }
  0xd6   :  { %v300_v38 = vsel %vm299_vm5, %v1813_v16, %v296_v60  ;;  %v318_v20 = vadd.f32 %v1815_v7, %v317_v0  ;;  %v338_v62 = vmul.f32 %v1817_v32, %v336_v59  ;;  %v1819_v11 = vpop.eup %1818  ;;  %vm343_vm9 = vweird.f32 %v1817_v32  ;;  %v3567_v0 = vld [vmem:[#allocation48_spill] sm:$0xff]  ;;  %v3568_v16 = vld [vmem:[#allocation61_spill] sm:$0xff] }
  0xd7   :  { %v305_v40 = vsel %vm302_vm6, %v304_v41, %v300_v38  ;;  %vm344_vm11 = vmor %vm342_vm10, %vm343_vm9  ;;  %v349_v41 = vor.u32 1.1754944e-38, %v348_v46  ;;  %v3569_v59 = vld [vmem:[#allocation24_spill] sm:$0xff]  ;;  %v3580_v46 = vld [vmem:[#allocation46_spill] sm:$0xff] }
  0xd8   :  { %v322_v56 = vsel %vm321_vm7, %v1815_v7, %v318_v20  ;;  %v339_v3 = vsub.f32 1.0, %v338_v62  ;;  %v353_v51 = vmul.f32 %v1819_v11, %v305_v40  ;;  %v3564_v40 = vld [vmem:[#allocation60_spill] sm:$0xff]  ;;  %v3572_v20 = vld [vmem:[#allocation26_spill] sm:$0xff]  ;;  %v3576_v11 = vld [vmem:[#allocation33_spill] sm:$0xff] }
  0xd9   :  { %v327_v42 = vsel %vm324_vm8, %v326_v55, %v322_v56  ;;  %v3566_v56 = vld [vmem:[#allocation51_spill] sm:$0xff]  ;;  %v3570_v7 = vld [vmem:[#allocation52_spill] sm:$0xff] }
  0xda   :  { %v340_v37 = vmul.f32 %v1817_v32, %v339_v3  ;;  %v352_v34 = vmul.f32 %v327_v42, %v192_v54  ;;  %v3573_v54 = vld [vmem:[#allocation27_spill] sm:$0xff]  ;;  %v3574_v55 = vld [vmem:[#allocation28_spill] sm:$0xff]  ;;  %v3575_v3 = vld [vmem:[#allocation30_spill] sm:$0xff] }
  0xdb   :  { %v3577_v42 = vld [vmem:[#allocation36_spill] sm:$0xff] }
  0xdc   :  { %v354_v49 = vadd.f32 %v353_v51, %v352_v34  ;;  %v341_v24 = vadd.f32 %v1817_v32, %v340_v37  ;;  %v3563_v37 = vld [vmem:[#allocation44_spill] sm:$0xff]  ;;  %v3578_v51 = vld [vmem:[#allocation39_spill] sm:$0xff] }
  0xde   :  { %1820 = vtanh.f32 %v354_v49  ;;  %358 = vst [vmem:[#allocation14] sm:$0xf] %v354_v49  ;;  %v345_v38 = vsel %vm344_vm11, %v1817_v32, %v341_v24  ;;  %v3561_v32 = vld [vmem:[#allocation22_spill] sm:$0xff]  ;;  %v3565_v49 = vld [vmem:[#allocation23_spill] sm:$0xff] }
  0xdf   :  { %v350_v47 = vsel %vm347_vm12, %v349_v41, %v345_v38  ;;  %v3579_v24 = vld [vmem:[#allocation42_spill] sm:$0xff] }
  0xe0   :  { %v2772_v38 = vld [vmem:[#allocation8] ss:$0 sm:$0xff] }
  0xe4   :  { %v1821_v60 = vpop.eup %1820 }
  0xe5   :  { %v356_v62 = vmul.f32 %v1821_v60, %v350_v47 }
  0xe7   :  { %357 = vst [vmem:[#allocation12] sm:$0xf] %v356_v62  ;;  %378 = vmatmul.f32.vlgmr.msrb.gmra.mxu0 %v356_v62 }
  0xe8   :  { %618 = vmatpush.msrb.mxu0 %v2345_v4  ;;  %v3542_v4 = vld [vmem:[#allocation31_spill] sm:$0xff] }
  0xea   :  { %619 = vmatpush.msrb.mxu0 %v2355_v8  ;;  %v3545_v8 = vld [vmem:[#allocation32_spill] sm:$0xff] }
  0xec   :  { %620 = vmatpush.msrb.mxu0 %v2367_v12  ;;  %v3548_v12 = vld [vmem:[#allocation56_spill] sm:$0xff] }
  0xee   :  { %v383_v34 = vld [vmem:[#allocation12] sm:$0xf]  ;;  %621 = vmatpush.msrb.mxu0 %v2375_v15  ;;  %v3551_v15 = vld [vmem:[#allocation53_spill] sm:$0xff] }
  0xef   :  { %404 = vmatmul.f32.vlgmr.msrb.gmra.mxu1 %v383_v34  ;;  %424 = vmatmul.f32.vlgmr.msrb.gmra.mxu2 %v383_v34 }
  0xf0   :  { %444 = vmatmul.f32.vlgmr.msrb.gmra.mxu3 %v383_v34  ;;  %464 = vmatmul.f32.vlgmr.msra.gmra.mxu0 %v383_v34 }
  0xf1   :  { %638 = vmatpush.msrb.mxu1 %v2337_v1  ;;  %622 = vmatpush.msrb.mxu0 %v2387_v19  ;;  %v3540_v1 = vld [vmem:[#allocation54_spill] sm:$0xff]  ;;  %v3554_v19 = vld [vmem:[#allocation40_spill] sm:$0xff] }
  0xf2   :  { %741 = vmatpush.msrb.mxu2 %v2525_v50  ;;  %768 = vmatpush.msrb.mxu3 %v2339_v2  ;;  %v3541_v2 = vld [vmem:[#allocation29_spill] sm:$0xff]  ;;  %3582 = vst [vmem:[#allocation54_spill] sm:$0xff] %v2772_v38 }
  0xf3   :  { %639 = vmatpush.msrb.mxu1 %v2347_v5  ;;  %623 = vmatpush.msrb.mxu0 %v2399_v23  ;;  %v3543_v5 = vld [vmem:[#allocation45_spill] sm:$0xff] }
  0xf4   :  { %742 = vmatpush.msrb.mxu2 %v2529_v58  ;;  %769 = vmatpush.msrb.mxu3 %v2351_v6  ;;  %v3544_v6 = vld [vmem:[#allocation55_spill] sm:$0xff] }
  0xf5   :  { %640 = vmatpush.msrb.mxu1 %v2359_v9  ;;  %624 = vmatpush.msrb.mxu0 %v2411_v27  ;;  %v3546_v9 = vld [vmem:[#allocation34_spill] sm:$0xff] }
  0xf6   :  { %743 = vmatpush.msrb.mxu2 %v2533_v45  ;;  %770 = vmatpush.msrb.mxu3 %v2361_v10  ;;  %v3547_v10 = vld [vmem:[#allocation49_spill] sm:$0xff] }
  0xf7   :  { %641 = vmatpush.msrb.mxu1 %v2369_v13  ;;  %625 = vmatpush.msrb.mxu0 %v2423_v31  ;;  %v3549_v13 = vld [vmem:[#allocation35_spill] sm:$0xff] }
  0xf8   :  { %744 = vmatpush.msrb.mxu2 %v2619_v63  ;;  %771 = vmatpush.msrb.mxu3 %v2373_v14  ;;  %v3550_v14 = vld [vmem:[#allocation37_spill] sm:$0xff] }
  0xf9   :  { %642 = vmatpush.msrb.mxu1 %v2381_v17  ;;  %626 = vmatpush.msrb.mxu0 %v2435_v35  ;;  %v3552_v17 = vld [vmem:[#allocation57_spill] sm:$0xff] }
  0xfa   :  { %745 = vmatpush.msrb.mxu2 %v2623_v44  ;;  %772 = vmatpush.msrb.mxu3 %v2385_v18  ;;  %v3553_v18 = vld [vmem:[#allocation20_spill] sm:$0xff] }
  0xfb   :  { %643 = vmatpush.msrb.mxu1 %v2393_v21  ;;  %627 = vmatpush.msrb.mxu0 %v2447_v39  ;;  %v3555_v21 = vld [vmem:[#allocation38_spill] sm:$0xff] }
  0xfc   :  { %746 = vmatpush.msrb.mxu2 %v2627_v53  ;;  %773 = vmatpush.msrb.mxu3 %v2397_v22  ;;  %v3556_v22 = vld [vmem:[#allocation58_spill] sm:$0xff] }
  0xfd   :  { %644 = vmatpush.msrb.mxu1 %v2405_v25  ;;  %628 = vmatpush.msrb.mxu0 %v2459_v43  ;;  %v3557_v25 = vld [vmem:[#allocation21_spill] sm:$0xff] }
  0xfe   :  { %747 = vmatpush.msrb.mxu2 %v2631_v57  ;;  %774 = vmatpush.msrb.mxu3 %v2409_v26  ;;  %v3558_v26 = vld [vmem:[#allocation43_spill] sm:$0xff] }
  0xff   :  { %645 = vmatpush.msrb.mxu1 %v2417_v29  ;;  %629 = vmatpush.msrb.mxu0 %v2471_v48  ;;  %v3559_v29 = vld [vmem:[#allocation41_spill] sm:$0xff] }
 0x100   :  { %748 = vmatpush.msrb.mxu2 %v2635_v61  ;;  %775 = vmatpush.msrb.mxu3 %v2421_v30  ;;  %v3560_v30 = vld [vmem:[#allocation59_spill] sm:$0xff] }
 0x101   :  { %646 = vmatpush.msrb.mxu1 %v2429_v33  ;;  %630 = vmatpush.msrb.mxu0 %v2483_v52  ;;  %v3562_v33 = vld [vmem:[#allocation47_spill] sm:$0xff] }
 0x102   :  { %749 = vmatpush.msrb.mxu2 %v3540_v1  ;;  %776 = vmatpush.msrb.mxu3 %v3541_v2  ;;  %v387_v2 = vld [vmem:[#allocation2 + $0x18] sm:$0xff] }
 0x103   :  { %647 = vmatpush.msrb.mxu1 %v3542_v4  ;;  %631 = vmatpush.msrb.mxu0 %v3543_v5  ;;  %v386_v4 = vld [vmem:[#allocation2 + $0x10] sm:$0xff] }
 0x104   :  { %750 = vmatpush.msrb.mxu2 %v3544_v6  ;;  %777 = vmatpush.msrb.mxu3 %v3545_v8 }
 0x105   :  { %648 = vmatpush.msrb.mxu1 %v3546_v9  ;;  %632 = vmatpush.msrb.mxu0 %v3547_v10 }
 0x106   :  { %751 = vmatpush.msrb.mxu2 %v3548_v12  ;;  %778 = vmatpush.msrb.mxu3 %v3549_v13 }
 0x107   :  { %649 = vmatpush.msrb.mxu1 %v3550_v14  ;;  %633 = vmatpush.msrb.mxu0 %v3551_v15 }
 0x108   :  { %752 = vmatpush.msrb.mxu2 %v3552_v17  ;;  %779 = vmatpush.msrb.mxu3 %v3555_v21 }
 0x109   :  { %788 = vmatpush.msra.mxu0 %v3553_v18  ;;  %650 = vmatpush.msrb.mxu1 %v3554_v19 }
 0x10a   :  { %753 = vmatpush.msrb.mxu2 %v3556_v22  ;;  %780 = vmatpush.msrb.mxu3 %v3559_v29 }
 0x10b   :  { %789 = vmatpush.msra.mxu0 %v3557_v25  ;;  %651 = vmatpush.msrb.mxu1 %v3558_v26 }
 0x10c   :  { %754 = vmatpush.msrb.mxu2 %v3560_v30  ;;  %781 = vmatpush.msrb.mxu3 %v3563_v37 }
 0x10d   :  { %790 = vmatpush.msra.mxu0 %v3561_v32  ;;  %652 = vmatpush.msrb.mxu1 %v3562_v33 }
 0x10e   :  { %755 = vmatpush.msrb.mxu2 %v3564_v40  ;;  %782 = vmatpush.msrb.mxu3 %v3567_v0 }
 0x10f   :  { %791 = vmatpush.msra.mxu0 %v3565_v49  ;;  %653 = vmatpush.msrb.mxu1 %v3566_v56 }
 0x110   :  { %756 = vmatpush.msrb.mxu2 %v3568_v16  ;;  %783 = vmatpush.msrb.mxu3 %v3570_v7 }
 0x111   :  { %792 = vmatpush.msra.mxu0 %v3569_v59 }
 0x113   :  { %793 = vmatpush.msra.mxu0 %v3571_v28 }
 0x115   :  { %794 = vmatpush.msra.mxu0 %v3572_v20 }
 0x117   :  { %795 = vmatpush.msra.mxu0 %v3573_v54 }
 0x119   :  { %796 = vmatpush.msra.mxu0 %v3574_v55 }
 0x11b   :  { %797 = vmatpush.msra.mxu0 %v3575_v3 }
 0x11d   :  { %798 = vmatpush.msra.mxu0 %v3576_v11 }
 0x11f   :  { %799 = vmatpush.msra.mxu0 %v3577_v42 }
 0x121   :  { %800 = vmatpush.msra.mxu0 %v3578_v51 }
 0x123   :  { %801 = vmatpush.msra.mxu0 %v3579_v24 }
 0x125   :  { %802 = vmatpush.msra.mxu0 %v3580_v46 }
 0x127   :  { %803 = vmatpush.msra.mxu0 %v3581_v36 }
 0x164   :  { %v379_v41 = vpop.f32.mrf.mxu0 }
 0x165   :  { %v380_v60 = vadd.f32 %v2772_v38, %v379_v41 }
 0x167   :  { %382 = vst [vmem:[#allocation11] sm:$0xf] %v380_v60 }
 0x16c   :  { %v405_v25 = vpop.f32.mrf.mxu1 }
 0x16d   :  { %v465_v47 = vpop.f32.mrf.mxu0 }
 0x16e   :  { %v473_v62 = vrot.slane %v465_v47, 4 }
 0x172   :  { %v425_v34 = vpop.f32.mrf.mxu2 }
 0x173   :  { %v472_v8 = vrot.slane %v425_v34, 4  ;;  %v445_v18 = vpop.f32.mrf.mxu3 }
 0x174   :  { %v475_v32 = vsel %vm281_vm0, %v445_v18, %v473_v62 }
 0x175   :  { %v474_v49 = vsel %vm281_vm0, %v405_v25, %v472_v8  ;;  %v479_v59 = vadd.f32 %v475_v32, %v387_v2 }
 0x176   :  { %v478_v28 = vadd.f32 %v474_v49, %v386_v4 }
 0x177   :  { %v523_v20 = vrot.slane %v479_v59, 4 }
 0x178   :  { %v1768_v54 = vmul.f32 -1.442695, %v478_v28  ;;  %v500_v55 = vrot.slane %v478_v28, 4 }
 0x179   :  { %v1770_v3 = vmul.f32 -1.442695, %v523_v20 }
 0x17a   :  { %1822 = vpow2.f32 %v1768_v54  ;;  %v1769_v11 = vmul.f32 -1.442695, %v500_v55 }
 0x17b   :  { %1824 = vpow2.f32 %v1770_v3 }
 0x17c   :  { %1826 = vpow2.f32 %v1769_v11 }
 0x180   :  { %v1823_v42 = vpop.eup %1822 }
 0x181   :  { %v1825_v51 = vpop.eup %1824  ;;  %v483_v24 = vadd.f32 1.0, %v1823_v42 }
 0x182   :  { %v1827_v41 = vpop.eup %1826  ;;  %v528_v60 = vadd.f32 1.0, %v1825_v51 }
 0x183   :  { %1828 = vrcp.f32 %v483_v24  ;;  %v505_v47 = vadd.f32 1.0, %v1827_v41  ;;  %v495_v25 = vand.u32 2147483648, %v483_v24  ;;  %v493_v20 = vand.u32 2147483647, %v483_v24 }
 0x184   :  { %1830 = vrcp.f32 %v528_v60  ;;  %vm489_vm14 = vweird.f32 %v483_v24  ;;  %vm534_vm7 = vweird.f32 %v528_v60 }
 0x185   :  { %1832 = vrcp.f32 %v505_v47  ;;  %v517_v54 = vand.u32 2147483648, %v505_v47  ;;  %v515_v11 = vand.u32 2147483647, %v505_v47  ;;  %v496_v42 = vor.u32 1.1754944e-38, %v495_v25 }
 0x186   :  { %1834 = vtanh.f32 %v479_v59  ;;  %vm494_vm2 = vcmp.eq.f32.partialorder %v493_v20, 8.507059e+37  ;;  %vm511_vm3 = vweird.f32 %v505_v47  ;;  %v540_v25 = vand.u32 2147483648, %v528_v60 }
 0x187   :  { %vm516_vm5 = vcmp.eq.f32.partialorder %v515_v11, 8.507059e+37  ;;  %v2804_v11 = vld [vmem:[#allocation5 + $0x1c0] sm:$0xff] }
 0x189   :  { %v1829_v62 = vpop.eup %1828 }
 0x18a   :  { %v1831_v34 = vpop.eup %1830  ;;  %v485_v2 = vmul.f32 %v1829_v62, %v483_v24  ;;  %vm490_vm13 = vweird.f32 %v1829_v62  ;;  %v384_v24 = vld [vmem:[#allocation14] sm:$0xf] }
 0x18b   :  { %v1833_v4 = vpop.eup %1832  ;;  %v530_v32 = vmul.f32 %v1831_v34, %v528_v60  ;;  %vm491_vm1 = vmor %vm489_vm14, %vm490_vm13  ;;  %vm535_vm6 = vweird.f32 %v1831_v34 }
 0x18c   :  { %v486_v8 = vsub.f32 1.0, %v485_v2  ;;  %v507_v18 = vmul.f32 %v1833_v4, %v505_v47  ;;  %vm512_vm15 = vweird.f32 %v1833_v4  ;;  %v1835_v36 = vpop.eup %1834  ;;  %vm536_vm8 = vmor %vm534_vm7, %vm535_vm6 }
 0x18d   :  { %v531_v51 = vsub.f32 1.0, %v530_v32  ;;  %vm513_vm4 = vmor %vm511_vm3, %vm512_vm15  ;;  %v541_v32 = vor.u32 1.1754944e-38, %v540_v25 }
 0x18e   :  { %v508_v49 = vsub.f32 1.0, %v507_v18  ;;  %v487_v28 = vmul.f32 %v1829_v62, %v486_v8  ;;  %v518_v18 = vor.u32 1.1754944e-38, %v517_v54 }
 0x18f   :  { %v532_v59 = vmul.f32 %v1831_v34, %v531_v51  ;;  %v2815_v51 = vld [vmem:[#allocation5 + $0x198] sm:$0xff] }
 0x190   :  { %v488_v55 = vadd.f32 %v1829_v62, %v487_v28  ;;  %v509_v3 = vmul.f32 %v1833_v4, %v508_v49 }
 0x191   :  { %v533_v16 = vadd.f32 %v1831_v34, %v532_v59 }
 0x192   :  { %v492_v41 = vsel %vm491_vm1, %v1829_v62, %v488_v55  ;;  %v510_v2 = vadd.f32 %v1833_v4, %v509_v3  ;;  %v538_v62 = vand.u32 2147483647, %v528_v60  ;;  %v2777_v55 = vld [vmem:[#allocation5 + $0x1f0] sm:$0xff]  ;;  %v2799_v3 = vld [vmem:[#allocation5 + $0x1d8] sm:$0xff] }
 0x193   :  { %v497_v38 = vsel %vm494_vm2, %v496_v42, %v492_v41  ;;  %v537_v47 = vsel %vm536_vm8, %v1831_v34, %v533_v16  ;;  %v2792_v60 = vld [vmem:[#allocation5 + $0x170] sm:$0xff]  ;;  %v2796_v34 = vld [vmem:[#allocation5 + $0x1e0] sm:$0xff]  ;;  %v2807_v42 = vld [vmem:[#allocation5 + $0x1b8] sm:$0xff] }
 0x194   :  { %v514_v8 = vsel %vm513_vm4, %v1833_v4, %v510_v2  ;;  %v545_v49 = vmul.f32 %v1835_v36, %v497_v38  ;;  %vm539_vm9 = vcmp.eq.f32.partialorder %v538_v62, 8.507059e+37  ;;  %v2786_v36 = vld [vmem:[#allocation5 + $0x190] sm:$0xff]  ;;  %v2789_v38 = vld [vmem:[#allocation5 + $0x1f8] sm:$0xff] }
 0x195   :  { %v519_v46 = vsel %vm516_vm5, %v518_v18, %v514_v8  ;;  %v542_v20 = vsel %vm539_vm9, %v541_v32, %v537_v47  ;;  %v2839_v41 = vld [vmem:[#allocation5 + $0x138] sm:$0xff]  ;;  %v576_v32 = vld [vmem:[#allocation2 + $0x20] sm:$0xff] }
 0x196   :  { %v544_v28 = vmul.f32 %v519_v46, %v384_v24  ;;  %v2780_v46 = vld [vmem:[#allocation5 + $0x1d0] sm:$0xff]  ;;  %v2847_v2 = vld [vmem:[#allocation5 + $0x118] sm:$0xff]  ;;  %v577_v24 = vld [vmem:[#allocation2 + $0x28] sm:$0xff] }
 0x197   :  { %v2855_v18 = vld [vmem:[#allocation5 + $0xf8] sm:$0xff] }
 0x198   :  { %v546_v7 = vadd.f32 %v545_v49, %v544_v28  ;;  %v2863_v8 = vld [vmem:[#allocation5 + $0xd8] sm:$0xff] }
 0x19a   :  { %550 = vst [vmem:[#allocation14] sm:$0xf] %v546_v7  ;;  %1836 = vtanh.f32 %v546_v7  ;;  %v2783_v7 = vld [vmem:[#allocation5 + $0x1b0] sm:$0xff] }
 0x1a0   :  { %v1837_v4 = vpop.eup %1836 }
 0x1a1   :  { %v548_v54 = vmul.f32 %v1837_v4, %v542_v20 }
 0x1a3   :  { %549 = vst [vmem:[#allocation12] sm:$0xf] %v548_v54  ;;  %567 = vmatmul.f32.vlgmr.msra.gmra.mxu1 %v548_v54 }
 0x1a4   :  { %808 = vmatpush.msra.mxu1 %v2777_v55 }
 0x1a6   :  { %809 = vmatpush.msra.mxu1 %v2780_v46 }
 0x1a8   :  { %810 = vmatpush.msra.mxu1 %v2783_v7 }
 0x1aa   :  { %v573_v16 = vld [vmem:[#allocation12] sm:$0xf]  ;;  %811 = vmatpush.msra.mxu1 %v2786_v36 }
 0x1ab   :  { %594 = vmatmul.f32.vlgmr.msra.gmra.mxu2 %v573_v16  ;;  %614 = vmatmul.f32.vlgmr.msra.gmra.mxu3 %v573_v16 }
 0x1ac   :  { %634 = vmatmul.f32.vlgmr.msrb.gmra.mxu0 %v573_v16  ;;  %654 = vmatmul.f32.vlgmr.msrb.gmra.mxu1 %v573_v16 }
 0x1ad   :  { %828 = vmatpush.msra.mxu2 %v2789_v38  ;;  %812 = vmatpush.msra.mxu1 %v2792_v60 }
 0x1ae   :  { %931 = vmatpush.msra.mxu3 %v2525_v50  ;;  %958 = vmatpush.msrb.mxu0 %v2796_v34  ;;  %v2812_v50 = vld [vmem:[#allocation5 + $0x1a0] sm:$0xff] }
 0x1af   :  { %829 = vmatpush.msra.mxu2 %v2799_v3  ;;  %813 = vmatpush.msra.mxu1 %v2399_v23  ;;  %v2820_v23 = vld [vmem:[#allocation5 + $0x180] sm:$0xff] }
 0x1b0   :  { %932 = vmatpush.msra.mxu3 %v2529_v58  ;;  %959 = vmatpush.msrb.mxu0 %v2804_v11  ;;  %v2823_v58 = vld [vmem:[#allocation5 + $0x178] sm:$0xff] }
 0x1b1   :  { %830 = vmatpush.msra.mxu2 %v2807_v42  ;;  %814 = vmatpush.msra.mxu1 %v2411_v27  ;;  %v2828_v27 = vld [vmem:[#allocation5 + $0x160] sm:$0xff] }
 0x1b2   :  { %933 = vmatpush.msra.mxu3 %v2533_v45  ;;  %960 = vmatpush.msrb.mxu0 %v2812_v50  ;;  %v2831_v45 = vld [vmem:[#allocation5 + $0x158] sm:$0xff] }
 0x1b3   :  { %831 = vmatpush.msra.mxu2 %v2815_v51  ;;  %815 = vmatpush.msra.mxu1 %v2423_v31  ;;  %v2836_v31 = vld [vmem:[#allocation5 + $0x140] sm:$0xff] }
 0x1b4   :  { %934 = vmatpush.msra.mxu3 %v2619_v63  ;;  %961 = vmatpush.msrb.mxu0 %v2820_v23 }
 0x1b5   :  { %832 = vmatpush.msra.mxu2 %v2823_v58  ;;  %816 = vmatpush.msra.mxu1 %v2435_v35  ;;  %v2844_v35 = vld [vmem:[#allocation5 + $0x120] sm:$0xff] }
 0x1b6   :  { %935 = vmatpush.msra.mxu3 %v2623_v44  ;;  %962 = vmatpush.msrb.mxu0 %v2828_v27 }
 0x1b7   :  { %833 = vmatpush.msra.mxu2 %v2831_v45  ;;  %817 = vmatpush.msra.mxu1 %v2447_v39  ;;  %v2852_v39 = vld [vmem:[#allocation5 + $0x100] sm:$0xff] }
 0x1b8   :  { %936 = vmatpush.msra.mxu3 %v2627_v53  ;;  %963 = vmatpush.msrb.mxu0 %v2836_v31 }
 0x1b9   :  { %834 = vmatpush.msra.mxu2 %v2839_v41  ;;  %818 = vmatpush.msra.mxu1 %v2459_v43  ;;  %v2860_v43 = vld [vmem:[#allocation5 + $0xe0] sm:$0xff] }
 0x1ba   :  { %937 = vmatpush.msra.mxu3 %v2631_v57  ;;  %964 = vmatpush.msrb.mxu0 %v2844_v35 }
 0x1bb   :  { %835 = vmatpush.msra.mxu2 %v2847_v2  ;;  %819 = vmatpush.msra.mxu1 %v2471_v48  ;;  %v2868_v48 = vld [vmem:[#allocation5 + $0xc0] sm:$0xff] }
 0x1bc   :  { %938 = vmatpush.msra.mxu3 %v2635_v61  ;;  %965 = vmatpush.msrb.mxu0 %v2852_v39  ;;  %3583 = vst [vmem:[#allocation29_spill] sm:$0xff] %v2868_v48 }
 0x1bd   :  { %836 = vmatpush.msra.mxu2 %v2855_v18  ;;  %820 = vmatpush.msra.mxu1 %v2483_v52  ;;  %v2878_v52 = vld [vmem:[#allocation5 + $0x1e8] sm:$0xff] }
 0x1be   :  { %939 = vmatpush.msra.mxu3 %v3540_v1  ;;  %966 = vmatpush.msrb.mxu0 %v2860_v43  ;;  %3584 = vst [vmem:[#allocation31_spill] sm:$0xff] %v2878_v52  ;;  %v2884_v1 = vld [vmem:[#allocation5 + $0x1c8] sm:$0xff] }
 0x1bf   :  { %837 = vmatpush.msra.mxu2 %v2863_v8  ;;  %821 = vmatpush.msra.mxu1 %v3543_v5  ;;  %3585 = vst [vmem:[#allocation45_spill] sm:$0xff] %v2884_v1  ;;  %v2890_v5 = vld [vmem:[#allocation5 + $0x1a8] sm:$0xff] }
 0x1c0   :  { %940 = vmatpush.msra.mxu3 %v3544_v6  ;;  %967 = vmatpush.msrb.mxu0 %v2868_v48  ;;  %3586 = vst [vmem:[#allocation55_spill] sm:$0xff] %v2890_v5  ;;  %v2896_v6 = vld [vmem:[#allocation5 + $0x188] sm:$0xff] }
 0x1c1   :  { %838 = vmatpush.msra.mxu2 %v3546_v9  ;;  %822 = vmatpush.msra.mxu1 %v3547_v10  ;;  %3587 = vst [vmem:[#allocation32_spill] sm:$0xff] %v2896_v6  ;;  %v3588_v9 = vld [vmem:[#allocation61_spill] sm:$0xff]  ;;  %v2902_v10 = vld [vmem:[#allocation5 + $0x168] sm:$0xff] }
 0x1c2   :  { %941 = vmatpush.msra.mxu3 %v3548_v12  ;;  %968 = vmatpush.msrb.mxu0 %v3549_v13  ;;  %3589 = vst [vmem:[#allocation34_spill] sm:$0xff] %v2902_v10  ;;  %v3590_v12 = vld [vmem:[#allocation52_spill] sm:$0xff] }
 0x1c3   :  { %839 = vmatpush.msra.mxu2 %v3550_v14  ;;  %823 = vmatpush.msra.mxu1 %v3551_v15  ;;  %v2906_v13 = vld [vmem:[#allocation5 + $0x148] sm:$0xff] }
 0x1c4   :  { %942 = vmatpush.msra.mxu3 %v3552_v17  ;;  %969 = vmatpush.msrb.mxu0 %v3555_v21  ;;  %3591 = vst [vmem:[#allocation49_spill] sm:$0xff] %v2906_v13  ;;  %v2909_v14 = vld [vmem:[#allocation5 + $0x128] sm:$0xff] }
 0x1c5   :  { %978 = vmatpush.msrb.mxu1 %v2878_v52  ;;  %840 = vmatpush.msra.mxu2 %v3554_v19  ;;  %3592 = vst [vmem:[#allocation56_spill] sm:$0xff] %v2909_v14  ;;  %v2912_v15 = vld [vmem:[#allocation5 + $0x108] sm:$0xff] }
 0x1c6   :  { %943 = vmatpush.msra.mxu3 %v3556_v22  ;;  %970 = vmatpush.msrb.mxu0 %v3559_v29  ;;  %3593 = vst [vmem:[#allocation35_spill] sm:$0xff] %v2912_v15  ;;  %v2915_v17 = vld [vmem:[#allocation5 + $0xe8] sm:$0xff] }
 0x1c7   :  { %979 = vmatpush.msrb.mxu1 %v2884_v1  ;;  %841 = vmatpush.msra.mxu2 %v3558_v26  ;;  %3594 = vst [vmem:[#allocation37_spill] sm:$0xff] %v2915_v17  ;;  %v2918_v19 = vld [vmem:[#allocation5 + $0xc8] sm:$0xff] }
 0x1c8   :  { %944 = vmatpush.msra.mxu3 %v3560_v30  ;;  %971 = vmatpush.msrb.mxu0 %v3563_v37  ;;  %3595 = vst [vmem:[#allocation53_spill] sm:$0xff] %v2918_v19  ;;  %v2921_v21 = vld [vmem:[#allocation5 + $0xa8] sm:$0xff]  ;;  %v3600_v30 = vld [vmem:[#allocation46_spill] sm:$0xff] }
 0x1c9   :  { %980 = vmatpush.msrb.mxu1 %v2890_v5  ;;  %842 = vmatpush.msra.mxu2 %v3562_v33  ;;  %3596 = vst [vmem:[#allocation57_spill] sm:$0xff] %v2921_v21  ;;  %v2924_v22 = vld [vmem:[#allocation5 + $0x88] sm:$0xff]  ;;  %v3601_v33 = vld [vmem:[#allocation50_spill] sm:$0xff] }
 0x1ca   :  { %945 = vmatpush.msra.mxu3 %v3564_v40  ;;  %972 = vmatpush.msrb.mxu0 %v3567_v0  ;;  %3597 = vst [vmem:[#allocation20_spill] sm:$0xff] %v2924_v22  ;;  %v2927_v26 = vld [vmem:[#allocation5 + $0x68] sm:$0xff]  ;;  %v3602_v40 = vld [vmem:[#allocation54_spill] sm:$0xff] }
 0x1cb   :  { %981 = vmatpush.msrb.mxu1 %v2896_v6  ;;  %843 = vmatpush.msra.mxu2 %v3566_v56  ;;  %3598 = vst [vmem:[#allocation40_spill] sm:$0xff] %v2927_v26  ;;  %v2930_v29 = vld [vmem:[#allocation5 + $0x48] sm:$0xff] }
 0x1cc   :  { %946 = vmatpush.msra.mxu3 %v3588_v9  ;;  %973 = vmatpush.msrb.mxu0 %v3590_v12  ;;  %3599 = vst [vmem:[#allocation38_spill] sm:$0xff] %v2930_v29 }
 0x1cd   :  { %982 = vmatpush.msrb.mxu1 %v2902_v10 }
 0x1cf   :  { %983 = vmatpush.msrb.mxu1 %v2906_v13 }
 0x1d1   :  { %984 = vmatpush.msrb.mxu1 %v2909_v14 }
 0x1d3   :  { %985 = vmatpush.msrb.mxu1 %v2912_v15 }
 0x1d5   :  { %986 = vmatpush.msrb.mxu1 %v2915_v17 }
 0x1d7   :  { %987 = vmatpush.msrb.mxu1 %v2918_v19 }
 0x1d9   :  { %988 = vmatpush.msrb.mxu1 %v2921_v21 }
 0x1db   :  { %989 = vmatpush.msrb.mxu1 %v2924_v22 }
 0x1dd   :  { %990 = vmatpush.msrb.mxu1 %v2927_v26 }
 0x1df   :  { %991 = vmatpush.msrb.mxu1 %v2930_v29 }
 0x1e1   :  { %992 = vmatpush.msrb.mxu1 %v3600_v30 }
 0x1e3   :  { %993 = vmatpush.msrb.mxu1 %v3601_v33 }
 0x220   :  { %v568_v37 = vpop.f32.mrf.mxu1 }
 0x221   :  { %v569_v56 = vadd.f32 %v3602_v40, %v568_v37 }
 0x223   :  { %572 = vst [vmem:[#allocation11 + $0x4] sm:$0xf] %v569_v56 }
 0x229   :  { %v655_v0 = vpop.f32.mrf.mxu1  ;;  %v635_v28 = vpop.f32.mrf.mxu0 }
 0x22a   :  { %v663_v59 = vrot.slane %v655_v0, 4 }
 0x22c   :  { %v665_v49 = vsel %vm281_vm0, %v635_v28, %v663_v59 }
 0x22d   :  { %v669_v25 = vadd.f32 %v665_v49, %v577_v24 }
 0x22e   :  { %v615_v62 = vpop.f32.mrf.mxu3  ;;  %v595_v20 = vpop.f32.mrf.mxu2 }
 0x22f   :  { %v713_v47 = vrot.slane %v669_v25, 4  ;;  %v662_v4 = vrot.slane %v615_v62, 4 }
 0x231   :  { %v1773_v54 = vmul.f32 -1.442695, %v713_v47  ;;  %v664_v16 = vsel %vm281_vm0, %v595_v20, %v662_v4 }
 0x232   :  { %v668_v9 = vadd.f32 %v664_v16, %v576_v32 }
 0x233   :  { %1838 = vpow2.f32 %v1773_v54 }
 0x234   :  { %v1771_v12 = vmul.f32 -1.442695, %v668_v9  ;;  %v690_v30 = vrot.slane %v668_v9, 4 }
 0x236   :  { %1840 = vpow2.f32 %v1771_v12  ;;  %v1772_v33 = vmul.f32 -1.442695, %v690_v30 }
 0x238   :  { %1842 = vpow2.f32 %v1772_v33 }
 0x239   :  { %v1839_v37 = vpop.eup %1838 }
 0x23a   :  { %v718_v0 = vadd.f32 1.0, %v1839_v37 }
 0x23c   :  { %v1841_v56 = vpop.eup %1840  ;;  %vm724_vm4 = vweird.f32 %v718_v0 }
 0x23d   :  { %v673_v59 = vadd.f32 1.0, %v1841_v56 }
 0x23e   :  { %v1843_v24 = vpop.eup %1842 }
 0x23f   :  { %1844 = vrcp.f32 %v673_v59  ;;  %v695_v28 = vadd.f32 1.0, %v1843_v24  ;;  %v685_v54 = vand.u32 2147483648, %v673_v59  ;;  %v683_v30 = vand.u32 2147483647, %v673_v59 }
 0x240   :  { %1846 = vrcp.f32 %v718_v0  ;;  %vm679_vm11 = vweird.f32 %v673_v59 }
 0x241   :  { %1848 = vrcp.f32 %v695_v28  ;;  %v707_v33 = vand.u32 2147483648, %v695_v28  ;;  %v705_v24 = vand.u32 2147483647, %v695_v28  ;;  %v686_v40 = vor.u32 1.1754944e-38, %v685_v54 }
 0x242   :  { %1850 = vtanh.f32 %v669_v25  ;;  %vm701_vm14 = vweird.f32 %v695_v28  ;;  %vm684_vm15 = vcmp.eq.f32.partialorder %v683_v30, 8.507059e+37  ;;  %v574_v25 = vld [vmem:[#allocation14] sm:$0xf]  ;;  %v730_v54 = vand.u32 2147483648, %v718_v0  ;;  %v2977_v30 = vld [vmem:[#allocation5 + $0xd0] sm:$0xff] }
 0x243   :  { %v708_v22 = vor.u32 1.1754944e-38, %v707_v33  ;;  %vm706_vm2 = vcmp.eq.f32.partialorder %v705_v24, 8.507059e+37  ;;  %v2998_v33 = vld [vmem:[#allocation7 + $0x38] sm:$0xff]  ;;  %v3016_v24 = vld [vmem:[#allocation7 + $0x28] sm:$0xff] }
 0x244   :  { %3606 = vst [vmem:[#allocation41_spill] sm:$0xff] %v3016_v24 }
 0x245   :  { %v1845_v49 = vpop.eup %1844 }
 0x246   :  { %v1847_v62 = vpop.eup %1846  ;;  %v675_v47 = vmul.f32 %v1845_v49, %v673_v59  ;;  %vm680_vm10 = vweird.f32 %v1845_v49 }
 0x247   :  { %v1849_v4 = vpop.eup %1848  ;;  %v720_v16 = vmul.f32 %v1847_v62, %v718_v0  ;;  %vm681_vm13 = vmor %vm679_vm11, %vm680_vm10  ;;  %vm725_vm3 = vweird.f32 %v1847_v62 }
 0x248   :  { %v676_v32 = vsub.f32 1.0, %v675_v47  ;;  %v697_v20 = vmul.f32 %v1849_v4, %v695_v28  ;;  %vm702_vm12 = vweird.f32 %v1849_v4  ;;  %v728_v28 = vand.u32 2147483647, %v718_v0  ;;  %vm726_vm5 = vmor %vm724_vm4, %vm725_vm3  ;;  %v2965_v0 = vld [vmem:[#allocation5 + $0x110] sm:$0xff] }
 0x249   :  { %v721_v29 = vsub.f32 1.0, %v720_v16  ;;  %vm703_vm1 = vmor %vm701_vm14, %vm702_vm12 }
 0x24a   :  { %v677_v9 = vmul.f32 %v1845_v49, %v676_v32  ;;  %v698_v12 = vsub.f32 1.0, %v697_v20  ;;  %v1851_v20 = vpop.eup %1850  ;;  %vm729_vm6 = vcmp.eq.f32.partialorder %v728_v28, 8.507059e+37  ;;  %v3045_v28 = vld [vmem:[#allocation5 + $0x60] sm:$0xff] }
 0x24b   :  { %v722_v19 = vmul.f32 %v1847_v62, %v721_v29  ;;  %v2960_v29 = vld [vmem:[#allocation7 + $0x68] sm:$0xff]  ;;  %3615 = vst [vmem:[#allocation24_spill] sm:$0xff] %v3045_v28 }
 0x24c   :  { %v699_v37 = vmul.f32 %v1849_v4, %v698_v12  ;;  %v678_v56 = vadd.f32 %v1845_v49, %v677_v9 }
 0x24d   :  { %v723_v15 = vadd.f32 %v1847_v62, %v722_v19 }
 0x24e   :  { %v682_v26 = vsel %vm681_vm13, %v1845_v49, %v678_v56  ;;  %v700_v47 = vadd.f32 %v1849_v4, %v699_v37  ;;  %v3010_v37 = vld [vmem:[#allocation5 + $0xb8] sm:$0xff]  ;;  %v3013_v56 = vld [vmem:[#allocation5 + $0x30] sm:$0xff] }
 0x24f   :  { %v687_v21 = vsel %vm684_vm15, %v686_v40, %v682_v26  ;;  %v727_v49 = vsel %vm726_vm5, %v1847_v62, %v723_v15  ;;  %v731_v26 = vor.u32 1.1754944e-38, %v730_v54  ;;  %v2944_v15 = vld [vmem:[#allocation7 + $0x78] sm:$0xff]  ;;  %v2971_v62 = vld [vmem:[#allocation5 + $0xf0] sm:$0xff]  ;;  %3604 = vst [vmem:[#allocation21_spill] sm:$0xff] %v3010_v37 }
 0x250   :  { %v704_v32 = vsel %vm703_vm1, %v1849_v4, %v700_v47  ;;  %v735_v9 = vmul.f32 %v1851_v20, %v687_v21  ;;  %v2952_v21 = vld [vmem:[#allocation7 + $0x70] sm:$0xff]  ;;  %3605 = vst [vmem:[#allocation43_spill] sm:$0xff] %v3013_v56  ;;  %v3019_v47 = vld [vmem:[#allocation5 + $0xa0] sm:$0xff]  ;;  %v3042_v54 = vld [vmem:[#allocation5 + $0x58] sm:$0xff] }
 0x251   :  { %v709_v59 = vsel %vm706_vm2, %v708_v22, %v704_v32  ;;  %v732_v4 = vsel %vm729_vm6, %v731_v26, %v727_v49  ;;  %v2957_v22 = vld [vmem:[#allocation5 + $0x130] sm:$0xff]  ;;  %3607 = vst [vmem:[#allocation59_spill] sm:$0xff] %v3019_v47  ;;  %v3022_v32 = vld [vmem:[#allocation5 + $0x98] sm:$0xff] }
 0x252   :  { %v734_v12 = vmul.f32 %v709_v59, %v574_v25  ;;  %3608 = vst [vmem:[#allocation22_spill] sm:$0xff] %v3022_v32  ;;  %v3025_v20 = vld [vmem:[#allocation5 + $0x10] sm:$0xff]  ;;  %v3028_v25 = vld [vmem:[#allocation7 + $0x20] sm:$0xff]  ;;  %v3032_v59 = vld [vmem:[#allocation5 + $0x78] sm:$0xff] }
 0x253   :  { %3609 = vst [vmem:[#allocation47_spill] sm:$0xff] %v3025_v20  ;;  %v3048_v49 = vld [vmem:[#allocation7 + $0x10] sm:$0xff]  ;;  %v3052_v26 = vld [vmem:[#allocation5 + $0x38] sm:$0xff] }
 0x254   :  { %v736_v17 = vadd.f32 %v735_v9, %v734_v12  ;;  %3610 = vst [vmem:[#allocation44_spill] sm:$0xff] %v3028_v25  ;;  %v3035_v12 = vld [vmem:[#allocation5 + $0x80] sm:$0xff]  ;;  %v3038_v9 = vld [vmem:[#allocation7 + $0x18] sm:$0xff] }
 0x255   :  { %3611 = vst [vmem:[#allocation60_spill] sm:$0xff] %v3032_v59 }
 0x256   :  { %1852 = vtanh.f32 %v736_v17  ;;  %740 = vst [vmem:[#allocation14] sm:$0xf] %v736_v17  ;;  %v2949_v17 = vld [vmem:[#allocation5 + $0x150] sm:$0xff] }
 0x257   :  { %3612 = vst [vmem:[#allocation23_spill] sm:$0xff] %v3035_v12 }
 0x258   :  { %3613 = vst [vmem:[#allocation51_spill] sm:$0xff] %v3038_v9 }
 0x259   :  { %3614 = vst [vmem:[#allocation48_spill] sm:$0xff] %v3042_v54 }
 0x25a   :  { %3616 = vst [vmem:[#allocation25_spill] sm:$0xff] %v3048_v49 }
 0x25b   :  { %3617 = vst [vmem:[#allocation26_spill] sm:$0xff] %v3052_v26 }
 0x25c   :  { %v1853_v40 = vpop.eup %1852 }
 0x25d   :  { %v738_v16 = vmul.f32 %v1853_v40, %v732_v4  ;;  %v3055_v40 = vld [vmem:[#allocation5 + $0x40] sm:$0xff]  ;;  %v3058_v4 = vld [vmem:[#allocation7 + $0x8] sm:$0xff] }
 0x25e   :  { %3618 = vst [vmem:[#allocation27_spill] sm:$0xff] %v3055_v40 }
 0x25f   :  { %739 = vst [vmem:[#allocation12] sm:$0xf] %v738_v16  ;;  %757 = vmatmul.f32.vlgmr.msrb.gmra.mxu2 %v738_v16  ;;  %v3062_v16 = vld [vmem:[#allocation5 + $0x18] sm:$0xff] }
 0x260   :  { %998 = vmatpush.msrb.mxu2 %v2777_v55  ;;  %3619 = vst [vmem:[#allocation28_spill] sm:$0xff] %v3058_v4 }
 0x261   :  { %3620 = vst [vmem:[#allocation30_spill] sm:$0xff] %v3062_v16 }
 0x262   :  { %999 = vmatpush.msrb.mxu2 %v2780_v46 }
 0x264   :  { %1000 = vmatpush.msrb.mxu2 %v2783_v7 }
 0x266   :  { %v763_v19 = vld [vmem:[#allocation12] sm:$0xf]  ;;  %1001 = vmatpush.msrb.mxu2 %v2786_v36 }
 0x267   :  { %784 = vmatmul.f32.vlgmr.msrb.gmra.mxu3 %v763_v19  ;;  %804 = vmatmul.f32.vlgmr.msra.gmra.mxu0 %v763_v19 }
 0x268   :  { %824 = vmatmul.f32.vlgmr.msra.gmra.mxu1 %v763_v19  ;;  %844 = vmatmul.f32.vlgmr.msra.gmra.mxu2 %v763_v19  ;;  %v3065_v19 = vld [vmem:[#allocation5 + $0x20] sm:$0xff] }
 0x269   :  { %1018 = vmatpush.msrb.mxu3 %v2789_v38  ;;  %1002 = vmatpush.msrb.mxu2 %v2792_v60  ;;  %3621 = vst [vmem:[#allocation33_spill] sm:$0xff] %v3065_v19 }
 0x26a   :  { %1121 = vmatpush.msra.mxu0 %v2944_v15  ;;  %1148 = vmatpush.msra.mxu1 %v2796_v34 }
 0x26b   :  { %1019 = vmatpush.msrb.mxu3 %v2799_v3  ;;  %1003 = vmatpush.msrb.mxu2 %v2949_v17 }
 0x26c   :  { %1122 = vmatpush.msra.mxu0 %v2952_v21  ;;  %1149 = vmatpush.msra.mxu1 %v2804_v11 }
 0x26d   :  { %1020 = vmatpush.msrb.mxu3 %v2807_v42  ;;  %1004 = vmatpush.msrb.mxu2 %v2957_v22 }
 0x26e   :  { %1123 = vmatpush.msra.mxu0 %v2960_v29  ;;  %1150 = vmatpush.msra.mxu1 %v2812_v50 }
 0x26f   :  { %1021 = vmatpush.msrb.mxu3 %v2815_v51  ;;  %1005 = vmatpush.msrb.mxu2 %v2965_v0 }
 0x270   :  { %1124 = vmatpush.msra.mxu0 %v2619_v63  ;;  %1151 = vmatpush.msra.mxu1 %v2820_v23  ;;  %v2983_v63 = vld [vmem:[#allocation5 + $0xb0] sm:$0xff] }
 0x271   :  { %1022 = vmatpush.msrb.mxu3 %v2823_v58  ;;  %1006 = vmatpush.msrb.mxu2 %v2971_v62 }
 0x272   :  { %1125 = vmatpush.msra.mxu0 %v2623_v44  ;;  %1152 = vmatpush.msra.mxu1 %v2828_v27  ;;  %v2989_v44 = vld [vmem:[#allocation5 + $0x90] sm:$0xff] }
 0x273   :  { %1023 = vmatpush.msrb.mxu3 %v2831_v45  ;;  %1007 = vmatpush.msrb.mxu2 %v2977_v30 }
 0x274   :  { %1126 = vmatpush.msra.mxu0 %v2627_v53  ;;  %1153 = vmatpush.msra.mxu1 %v2836_v31  ;;  %v2995_v53 = vld [vmem:[#allocation5 + $0x70] sm:$0xff] }
 0x275   :  { %1024 = vmatpush.msrb.mxu3 %v2839_v41  ;;  %1008 = vmatpush.msrb.mxu2 %v2983_v63 }
 0x276   :  { %1127 = vmatpush.msra.mxu0 %v2631_v57  ;;  %1154 = vmatpush.msra.mxu1 %v2844_v35  ;;  %v3003_v57 = vld [vmem:[#allocation5 + $0x50] sm:$0xff] }
 0x277   :  { %1025 = vmatpush.msrb.mxu3 %v2847_v2  ;;  %1009 = vmatpush.msrb.mxu2 %v2989_v44 }
 0x278   :  { %1128 = vmatpush.msra.mxu0 %v2635_v61  ;;  %1155 = vmatpush.msra.mxu1 %v2852_v39  ;;  %v3006_v61 = vld [vmem:[#allocation7 + $0x30] sm:$0xff] }
 0x279   :  { %1026 = vmatpush.msrb.mxu3 %v2855_v18  ;;  %1010 = vmatpush.msrb.mxu2 %v2995_v53  ;;  %3603 = vst [vmem:[#allocation58_spill] sm:$0xff] %v3006_v61 }
 0x27a   :  { %1129 = vmatpush.msra.mxu0 %v2998_v33  ;;  %1156 = vmatpush.msra.mxu1 %v2860_v43 }
 0x27b   :  { %1027 = vmatpush.msrb.mxu3 %v2863_v8  ;;  %1011 = vmatpush.msrb.mxu2 %v3003_v57 }
 0x27c   :  { %1130 = vmatpush.msra.mxu0 %v3006_v61  ;;  %1157 = vmatpush.msra.mxu1 %v2868_v48 }
 0x27d   :  { %1028 = vmatpush.msrb.mxu3 %v3010_v37  ;;  %1012 = vmatpush.msrb.mxu2 %v3013_v56  ;;  %v764_v56 = vld [vmem:[#allocation14] sm:$0xf] }
 0x27e   :  { %1131 = vmatpush.msra.mxu0 %v3016_v24  ;;  %1158 = vmatpush.msra.mxu1 %v3019_v47 }
 0x27f   :  { %1029 = vmatpush.msrb.mxu3 %v3022_v32  ;;  %1013 = vmatpush.msrb.mxu2 %v3025_v20 }
 0x280   :  { %1132 = vmatpush.msra.mxu0 %v3028_v25  ;;  %1159 = vmatpush.msra.mxu1 %v3035_v12 }
 0x281   :  { %1168 = vmatpush.msra.mxu2 %v2878_v52  ;;  %1030 = vmatpush.msrb.mxu3 %v3032_v59 }
 0x282   :  { %1133 = vmatpush.msra.mxu0 %v3038_v9  ;;  %1160 = vmatpush.msra.mxu1 %v3045_v28 }
 0x283   :  { %1169 = vmatpush.msra.mxu2 %v2884_v1  ;;  %1031 = vmatpush.msrb.mxu3 %v3042_v54  ;;  %v767_v54 = vld [vmem:[#allocation2 + $0x38] sm:$0xff] }
 0x284   :  { %1134 = vmatpush.msra.mxu0 %v3048_v49  ;;  %1161 = vmatpush.msra.mxu1 %v3055_v40  ;;  %v3072_v40 = vld [vmem:[#allocation5] sm:$0xff]  ;;  %v3084_v49 = vld [vmem:[#allocation5 + $0x28] sm:$0xff] }
 0x285   :  { %1170 = vmatpush.msra.mxu2 %v2890_v5  ;;  %1032 = vmatpush.msrb.mxu3 %v3052_v26  ;;  %v3068_v5 = vld [vmem:[#allocation7] sm:$0xff]  ;;  %3623 = vst [vmem:[#allocation39_spill] sm:$0xff] %v3072_v40  ;;  %v3628_v26 = vld [vmem:[#allocation20_spill] sm:$0xff] }
 0x286   :  { %1135 = vmatpush.msra.mxu0 %v3058_v4  ;;  %1162 = vmatpush.msra.mxu1 %v3065_v19  ;;  %3622 = vst [vmem:[#allocation36_spill] sm:$0xff] %v3068_v5  ;;  %v3626_v4 = vld [vmem:[#allocation53_spill] sm:$0xff] }
 0x287   :  { %1171 = vmatpush.msra.mxu2 %v2896_v6  ;;  %1033 = vmatpush.msrb.mxu3 %v3062_v16  ;;  %v3624_v6 = vld [vmem:[#allocation35_spill] sm:$0xff]  ;;  %v3625_v16 = vld [vmem:[#allocation37_spill] sm:$0xff]  ;;  %3631 = vst [vmem:[#allocation42_spill] sm:$0xff] %v3084_v49 }
 0x288   :  { %1136 = vmatpush.msra.mxu0 %v3068_v5  ;;  %1163 = vmatpush.msra.mxu1 %v3072_v40  ;;  %v3627_v19 = vld [vmem:[#allocation57_spill] sm:$0xff]  ;;  %v3629_v5 = vld [vmem:[#allocation40_spill] sm:$0xff] }
 0x289   :  { %1172 = vmatpush.msra.mxu2 %v2902_v10  ;;  %v3630_v10 = vld [vmem:[#allocation38_spill] sm:$0xff]  ;;  %v766_v40 = vld [vmem:[#allocation2 + $0x30] sm:$0xff] }
 0x28b   :  { %1173 = vmatpush.msra.mxu2 %v2906_v13  ;;  %v3087_v13 = vld [vmem:[#allocation5 + $0x8] sm:$0xff] }
 0x28c   :  { %3632 = vst [vmem:[#allocation61_spill] sm:$0xff] %v3087_v13 }
 0x28d   :  { %1174 = vmatpush.msra.mxu2 %v2909_v14 }
 0x28f   :  { %1175 = vmatpush.msra.mxu2 %v3624_v6 }
 0x291   :  { %1176 = vmatpush.msra.mxu2 %v3625_v16  ;;  %v3633_v16 = vld [vmem:[#allocation54_spill] sm:$0xff] }
 0x293   :  { %1177 = vmatpush.msra.mxu2 %v3626_v4 }
 0x295   :  { %1178 = vmatpush.msra.mxu2 %v3627_v19 }
 0x297   :  { %1179 = vmatpush.msra.mxu2 %v3628_v26 }
 0x299   :  { %1180 = vmatpush.msra.mxu2 %v3629_v5 }
 0x29b   :  { %1181 = vmatpush.msra.mxu2 %v3630_v10 }
 0x29d   :  { %1182 = vmatpush.msra.mxu2 %v3084_v49 }
 0x29f   :  { %1183 = vmatpush.msra.mxu2 %v3087_v13 }
 0x2e2   :  { %v758_v6 = vpop.f32.mrf.mxu2 }
 0x2e3   :  { %v759_v14 = vadd.f32 %v3633_v16, %v758_v6 }
 0x2e4   :  { %v805_v4 = vpop.f32.mrf.mxu0 }
 0x2e5   :  { %762 = vst [vmem:[#allocation11 + $0x8] sm:$0xf] %v759_v14  ;;  %v852_v19 = vrot.slane %v805_v4, 4  ;;  %v825_v9 = vpop.f32.mrf.mxu1 }
 0x2ea   :  { %v785_v26 = vpop.f32.mrf.mxu3 }
 0x2eb   :  { %v854_v5 = vsel %vm281_vm0, %v785_v26, %v852_v19  ;;  %v845_v28 = vpop.f32.mrf.mxu2 }
 0x2ec   :  { %v858_v10 = vadd.f32 %v854_v5, %v766_v40  ;;  %v853_v1 = vrot.slane %v845_v28, 4 }
 0x2ee   :  { %v1774_v49 = vmul.f32 -1.442695, %v858_v10  ;;  %v880_v12 = vrot.slane %v858_v10, 4  ;;  %v855_v59 = vsel %vm281_vm0, %v825_v9, %v853_v1 }
 0x2ef   :  { %v859_v13 = vadd.f32 %v855_v59, %v767_v54 }
 0x2f0   :  { %1854 = vpow2.f32 %v1774_v49  ;;  %v1775_v52 = vmul.f32 -1.442695, %v880_v12 }
 0x2f1   :  { %v903_v6 = vrot.slane %v859_v13, 4 }
 0x2f2   :  { %1856 = vpow2.f32 %v1775_v52 }
 0x2f3   :  { %v1776_v14 = vmul.f32 -1.442695, %v903_v6 }
 0x2f5   :  { %1858 = vpow2.f32 %v1776_v14 }
 0x2f6   :  { %v1855_v4 = vpop.eup %1854 }
 0x2f7   :  { %v863_v16 = vadd.f32 1.0, %v1855_v4 }
 0x2f8   :  { %v1857_v25 = vpop.eup %1856 }
 0x2f9   :  { %1860 = vrcp.f32 %v863_v16  ;;  %v885_v26 = vadd.f32 1.0, %v1857_v25  ;;  %v875_v9 = vand.u32 2147483648, %v863_v16  ;;  %v873_v49 = vand.u32 2147483647, %v863_v16 }
 0x2fa   :  { %vm869_vm8 = vweird.f32 %v863_v16 }
 0x2fb   :  { %v1859_v5 = vpop.eup %1858  ;;  %1862 = vrcp.f32 %v885_v26  ;;  %v897_v6 = vand.u32 2147483648, %v885_v26  ;;  %v895_v4 = vand.u32 2147483647, %v885_v26  ;;  %v876_v20 = vor.u32 1.1754944e-38, %v875_v9 }
 0x2fc   :  { %v908_v28 = vadd.f32 1.0, %v1859_v5  ;;  %vm891_vm11 = vweird.f32 %v885_v26  ;;  %vm874_vm12 = vcmp.eq.f32.partialorder %v873_v49, 8.507059e+37 }
 0x2fd   :  { %vm896_vm14 = vcmp.eq.f32.partialorder %v895_v4, 8.507059e+37  ;;  %v3663_v4 = vld [vmem:[#allocation35_spill] sm:$0xff] }
 0x2fe   :  { %1864 = vrcp.f32 %v908_v28  ;;  %v920_v9 = vand.u32 2147483648, %v908_v28  ;;  %vm914_vm1 = vweird.f32 %v908_v28 }
 0x2ff   :  { %v1861_v40 = vpop.eup %1860  ;;  %1866 = vtanh.f32 %v859_v13 }
 0x300   :  { %v865_v10 = vmul.f32 %v1861_v40, %v863_v16  ;;  %vm870_vm7 = vweird.f32 %v1861_v40  ;;  %v921_v49 = vor.u32 1.1754944e-38, %v920_v9 }
 0x301   :  { %v1863_v19 = vpop.eup %1862  ;;  %vm871_vm10 = vmor %vm869_vm8, %vm870_vm7 }
 0x302   :  { %v866_v1 = vsub.f32 1.0, %v865_v10  ;;  %v887_v59 = vmul.f32 %v1863_v19, %v885_v26  ;;  %vm892_vm9 = vweird.f32 %v1863_v19  ;;  %v918_v26 = vand.u32 2147483647, %v908_v28 }
 0x303   :  { %vm893_vm13 = vmor %vm891_vm11, %vm892_vm9 }
 0x304   :  { %v1865_v12 = vpop.eup %1864  ;;  %v867_v54 = vmul.f32 %v1861_v40, %v866_v1  ;;  %v888_v52 = vsub.f32 1.0, %v887_v59  ;;  %v898_v1 = vor.u32 1.1754944e-38, %v897_v6  ;;  %vm919_vm3 = vcmp.eq.f32.partialorder %v918_v26, 8.507059e+37  ;;  %v3660_v6 = vld [vmem:[#allocation39_spill] sm:$0xff]  ;;  %v3183_v26 = vld [vmem:[#allocation8] ss:$0 sm:$0xff] }
 0x305   :  { %v910_v14 = vmul.f32 %v1865_v12, %v908_v28  ;;  %v1867_v16 = vpop.eup %1866  ;;  %vm915_vm15 = vweird.f32 %v1865_v12  ;;  %v3658_v28 = vld [vmem:[#allocation36_spill] sm:$0xff]  ;;  %3672 = vst [vmem:[#allocation52_spill] sm:$0xff] %v3183_v26 }
 0x306   :  { %v889_v25 = vmul.f32 %v1863_v19, %v888_v52  ;;  %v868_v5 = vadd.f32 %v1861_v40, %v867_v54  ;;  %vm916_vm2 = vmor %vm914_vm1, %vm915_vm15 }
 0x307   :  { %v911_v32 = vsub.f32 1.0, %v910_v14  ;;  %v3661_v14 = vld [vmem:[#allocation49_spill] sm:$0xff] }
 0x308   :  { %v890_v47 = vadd.f32 %v1863_v19, %v889_v25  ;;  %v872_v10 = vsel %vm871_vm10, %v1861_v40, %v868_v5  ;;  %v3662_v25 = vld [vmem:[#allocation56_spill] sm:$0xff]  ;;  %v3664_v5 = vld [vmem:[#allocation37_spill] sm:$0xff] }
 0x309   :  { %v877_v59 = vsel %vm874_vm12, %v876_v20, %v872_v10  ;;  %v912_v37 = vmul.f32 %v1865_v12, %v911_v32  ;;  %v3657_v32 = vld [vmem:[#allocation33_spill] sm:$0xff] }
 0x30a   :  { %v894_v24 = vsel %vm893_vm13, %v1863_v19, %v890_v47  ;;  %v925_v52 = vmul.f32 %v1867_v16, %v877_v59  ;;  %v3665_v10 = vld [vmem:[#allocation53_spill] sm:$0xff]  ;;  %v3667_v59 = vld [vmem:[#allocation20_spill] sm:$0xff] }
 0x30b   :  { %v899_v13 = vsel %vm896_vm14, %v898_v1, %v894_v24  ;;  %v913_v54 = vadd.f32 %v1865_v12, %v912_v37  ;;  %v3654_v37 = vld [vmem:[#allocation28_spill] sm:$0xff]  ;;  %v3656_v24 = vld [vmem:[#allocation30_spill] sm:$0xff]  ;;  %v3666_v1 = vld [vmem:[#allocation57_spill] sm:$0xff] }
 0x30c   :  { %v924_v48 = vmul.f32 %v899_v13, %v764_v56  ;;  %v3655_v56 = vld [vmem:[#allocation32_spill] sm:$0xff]  ;;  %v3669_v13 = vld [vmem:[#allocation38_spill] sm:$0xff] }
 0x30d   :  { %v917_v40 = vsel %vm916_vm2, %v1865_v12, %v913_v54  ;;  %v3659_v12 = vld [vmem:[#allocation34_spill] sm:$0xff]  ;;  %v3668_v16 = vld [vmem:[#allocation40_spill] sm:$0xff]  ;;  %v3671_v54 = vld [vmem:[#allocation61_spill] sm:$0xff] }
 0x30e   :  { %v926_v61 = vadd.f32 %v925_v52, %v924_v48  ;;  %v922_v47 = vsel %vm919_vm3, %v921_v49, %v917_v40  ;;  %v3670_v52 = vld [vmem:[#allocation42_spill] sm:$0xff] }
 0x310   :  { %1868 = vtanh.f32 %v926_v61  ;;  %930 = vst [vmem:[#allocation14] sm:$0xf] %v926_v61  ;;  %v3653_v61 = vld [vmem:[#allocation27_spill] sm:$0xff] }
 0x316   :  { %v1869_v20 = vpop.eup %1868 }
 0x317   :  { %v928_v19 = vmul.f32 %v1869_v20, %v922_v47  ;;  %v956_v20 = vld [vmem:[#allocation2 + $0x40] sm:$0xff] }
 0x319   :  { %929 = vst [vmem:[#allocation12] sm:$0xf] %v928_v19  ;;  %947 = vmatmul.f32.vlgmr.msra.gmra.mxu3 %v928_v19 }
 0x31a   :  { %1188 = vmatpush.msra.mxu3 %v2777_v55  ;;  %v3111_v55 = vld [vmem:[#allocation7 + $0x60] sm:$0xff] }
 0x31c   :  { %1189 = vmatpush.msra.mxu3 %v2780_v46  ;;  %v3117_v46 = vld [vmem:[#allocation7 + $0x58] sm:$0xff] }
 0x31e   :  { %1190 = vmatpush.msra.mxu3 %v2783_v7  ;;  %v3123_v7 = vld [vmem:[#allocation7 + $0x50] sm:$0xff] }
 0x320   :  { %v953_v48 = vld [vmem:[#allocation12] sm:$0xf]  ;;  %1191 = vmatpush.msra.mxu3 %v2786_v36 }
 0x321   :  { %974 = vmatmul.f32.vlgmr.msrb.gmra.mxu0 %v953_v48  ;;  %994 = vmatmul.f32.vlgmr.msrb.gmra.mxu1 %v953_v48  ;;  %v3129_v36 = vld [vmem:[#allocation7 + $0x48] sm:$0xff] }
 0x322   :  { %1014 = vmatmul.f32.vlgmr.msrb.gmra.mxu2 %v953_v48  ;;  %1034 = vmatmul.f32.vlgmr.msrb.gmra.mxu3 %v953_v48 }
 0x323   :  { %1208 = vmatpush.msrb.mxu0 %v2789_v38  ;;  %1192 = vmatpush.msra.mxu3 %v2792_v60  ;;  %v3135_v38 = vld [vmem:[#allocation7 + $0x40] sm:$0xff] }
 0x324   :  { %1311 = vmatpush.msrb.mxu1 %v2944_v15  ;;  %1338 = vmatpush.msrb.mxu2 %v2796_v34  ;;  %v3634_v60 = vld [vmem:[#allocation58_spill] sm:$0xff]  ;;  %v3635_v34 = vld [vmem:[#allocation29_spill] sm:$0xff] }
 0x325   :  { %1209 = vmatpush.msrb.mxu0 %v2799_v3  ;;  %1193 = vmatpush.msra.mxu3 %v2949_v17  ;;  %v3636_v3 = vld [vmem:[#allocation21_spill] sm:$0xff] }
 0x326   :  { %1312 = vmatpush.msrb.mxu1 %v2952_v21  ;;  %1339 = vmatpush.msrb.mxu2 %v2804_v11  ;;  %v3637_v11 = vld [vmem:[#allocation43_spill] sm:$0xff] }
 0x327   :  { %1210 = vmatpush.msrb.mxu0 %v2807_v42  ;;  %1194 = vmatpush.msra.mxu3 %v2957_v22  ;;  %v3638_v42 = vld [vmem:[#allocation41_spill] sm:$0xff] }
 0x328   :  { %1313 = vmatpush.msrb.mxu1 %v2960_v29  ;;  %1340 = vmatpush.msrb.mxu2 %v2812_v50  ;;  %v3639_v50 = vld [vmem:[#allocation59_spill] sm:$0xff] }
 0x329   :  { %1211 = vmatpush.msrb.mxu0 %v2815_v51  ;;  %1195 = vmatpush.msra.mxu3 %v2965_v0  ;;  %v3640_v51 = vld [vmem:[#allocation22_spill] sm:$0xff] }
 0x32a   :  { %1314 = vmatpush.msrb.mxu1 %v3111_v55  ;;  %1341 = vmatpush.msrb.mxu2 %v2820_v23  ;;  %v3641_v23 = vld [vmem:[#allocation47_spill] sm:$0xff] }
 0x32b   :  { %1212 = vmatpush.msrb.mxu0 %v2823_v58  ;;  %1196 = vmatpush.msra.mxu3 %v2971_v62  ;;  %v3642_v58 = vld [vmem:[#allocation44_spill] sm:$0xff] }
 0x32c   :  { %1315 = vmatpush.msrb.mxu1 %v3117_v46  ;;  %1342 = vmatpush.msrb.mxu2 %v2828_v27  ;;  %v3643_v27 = vld [vmem:[#allocation31_spill] sm:$0xff] }
 0x32d   :  { %1213 = vmatpush.msrb.mxu0 %v2831_v45  ;;  %1197 = vmatpush.msra.mxu3 %v2977_v30  ;;  %v3644_v45 = vld [vmem:[#allocation60_spill] sm:$0xff] }
 0x32e   :  { %1316 = vmatpush.msrb.mxu1 %v3123_v7  ;;  %1343 = vmatpush.msrb.mxu2 %v2836_v31  ;;  %v3645_v31 = vld [vmem:[#allocation23_spill] sm:$0xff] }
 0x32f   :  { %1214 = vmatpush.msrb.mxu0 %v2839_v41  ;;  %1198 = vmatpush.msra.mxu3 %v2983_v63  ;;  %v3646_v41 = vld [vmem:[#allocation51_spill] sm:$0xff] }
 0x330   :  { %1317 = vmatpush.msrb.mxu1 %v3129_v36  ;;  %1344 = vmatpush.msrb.mxu2 %v2844_v35  ;;  %v3647_v35 = vld [vmem:[#allocation45_spill] sm:$0xff] }
 0x331   :  { %1215 = vmatpush.msrb.mxu0 %v2847_v2  ;;  %1199 = vmatpush.msra.mxu3 %v2989_v44  ;;  %v3648_v2 = vld [vmem:[#allocation48_spill] sm:$0xff] }
 0x332   :  { %1318 = vmatpush.msrb.mxu1 %v3135_v38  ;;  %1345 = vmatpush.msrb.mxu2 %v2852_v39  ;;  %v3649_v39 = vld [vmem:[#allocation24_spill] sm:$0xff] }
 0x333   :  { %1216 = vmatpush.msrb.mxu0 %v2855_v18  ;;  %1200 = vmatpush.msra.mxu3 %v2995_v53  ;;  %v3650_v18 = vld [vmem:[#allocation25_spill] sm:$0xff] }
 0x334   :  { %1319 = vmatpush.msrb.mxu1 %v2998_v33  ;;  %1346 = vmatpush.msrb.mxu2 %v2860_v43  ;;  %v3651_v43 = vld [vmem:[#allocation55_spill] sm:$0xff] }
 0x335   :  { %1217 = vmatpush.msrb.mxu0 %v2863_v8  ;;  %1201 = vmatpush.msra.mxu3 %v3003_v57  ;;  %v3652_v8 = vld [vmem:[#allocation26_spill] sm:$0xff] }
 0x336   :  { %1320 = vmatpush.msrb.mxu1 %v3634_v60  ;;  %1347 = vmatpush.msrb.mxu2 %v3635_v34 }
 0x337   :  { %1218 = vmatpush.msrb.mxu0 %v3636_v3  ;;  %1202 = vmatpush.msra.mxu3 %v3637_v11 }
 0x338   :  { %1321 = vmatpush.msrb.mxu1 %v3638_v42  ;;  %1348 = vmatpush.msrb.mxu2 %v3639_v50 }
 0x339   :  { %1219 = vmatpush.msrb.mxu0 %v3640_v51  ;;  %1203 = vmatpush.msra.mxu3 %v3641_v23 }
 0x33a   :  { %1322 = vmatpush.msrb.mxu1 %v3642_v58  ;;  %1349 = vmatpush.msrb.mxu2 %v3645_v31 }
 0x33b   :  { %1358 = vmatpush.msrb.mxu3 %v3643_v27  ;;  %1220 = vmatpush.msrb.mxu0 %v3644_v45 }
 0x33c   :  { %1323 = vmatpush.msrb.mxu1 %v3646_v41  ;;  %1350 = vmatpush.msrb.mxu2 %v3649_v39 }
 0x33d   :  { %1359 = vmatpush.msrb.mxu3 %v3647_v35  ;;  %1221 = vmatpush.msrb.mxu0 %v3648_v2 }
 0x33e   :  { %1324 = vmatpush.msrb.mxu1 %v3650_v18  ;;  %1351 = vmatpush.msrb.mxu2 %v3653_v61 }
 0x33f   :  { %1360 = vmatpush.msrb.mxu3 %v3651_v43  ;;  %1222 = vmatpush.msrb.mxu0 %v3652_v8 }
 0x340   :  { %1325 = vmatpush.msrb.mxu1 %v3654_v37  ;;  %1352 = vmatpush.msrb.mxu2 %v3657_v32 }
 0x341   :  { %1361 = vmatpush.msrb.mxu3 %v3655_v56  ;;  %1223 = vmatpush.msrb.mxu0 %v3656_v24 }
 0x342   :  { %1326 = vmatpush.msrb.mxu1 %v3658_v28  ;;  %1353 = vmatpush.msrb.mxu2 %v3660_v6 }
 0x343   :  { %1362 = vmatpush.msrb.mxu3 %v3659_v12  ;;  %v957_v12 = vld [vmem:[#allocation2 + $0x48] sm:$0xff] }
 0x345   :  { %1363 = vmatpush.msrb.mxu3 %v3661_v14 }
 0x347   :  { %1364 = vmatpush.msrb.mxu3 %v3662_v25 }
 0x349   :  { %1365 = vmatpush.msrb.mxu3 %v3663_v4 }
 0x34b   :  { %1366 = vmatpush.msrb.mxu3 %v3664_v5 }
 0x34d   :  { %1367 = vmatpush.msrb.mxu3 %v3665_v10 }
 0x34f   :  { %1368 = vmatpush.msrb.mxu3 %v3666_v1 }
 0x351   :  { %1369 = vmatpush.msrb.mxu3 %v3667_v59 }
 0x353   :  { %1370 = vmatpush.msrb.mxu3 %v3668_v16 }
 0x355   :  { %1371 = vmatpush.msrb.mxu3 %v3669_v13 }
 0x357   :  { %1372 = vmatpush.msrb.mxu3 %v3670_v52 }
 0x359   :  { %1373 = vmatpush.msrb.mxu3 %v3671_v54 }
 0x39c   :  { %v948_v9 = vpop.f32.mrf.mxu3 }
 0x39d   :  { %v949_v40 = vadd.f32 %v3183_v26, %v948_v9 }
 0x39e   :  { %v995_v49 = vpop.f32.mrf.mxu1  ;;  %v975_v19 = vpop.f32.mrf.mxu0 }
 0x39f   :  { %952 = vst [vmem:[#allocation11 + $0xc] sm:$0xf] %v949_v40  ;;  %v1042_v47 = vrot.slane %v995_v49, 4 }
 0x3a1   :  { %v1044_v48 = vsel %vm281_vm0, %v975_v19, %v1042_v47 }
 0x3a2   :  { %v1048_v34 = vadd.f32 %v1044_v48, %v956_v20 }
 0x3a4   :  { %v1777_v27 = vmul.f32 -1.442695, %v1048_v34  ;;  %v1070_v35 = vrot.slane %v1048_v34, 4 }
 0x3a5   :  { %v1035_v43 = vpop.f32.mrf.mxu3  ;;  %v1015_v25 = vpop.f32.mrf.mxu2 }
 0x3a6   :  { %1870 = vpow2.f32 %v1777_v27  ;;  %v1778_v56 = vmul.f32 -1.442695, %v1070_v35  ;;  %v1043_v14 = vrot.slane %v1035_v43, 4 }
 0x3a8   :  { %1872 = vpow2.f32 %v1778_v56  ;;  %v1045_v4 = vsel %vm281_vm0, %v1015_v25, %v1043_v14 }
 0x3a9   :  { %v1049_v5 = vadd.f32 %v1045_v4, %v957_v12 }
 0x3ab   :  { %v1093_v10 = vrot.slane %v1049_v5, 4 }
 0x3ac   :  { %v1871_v1 = vpop.eup %1870 }
 0x3ad   :  { %v1053_v59 = vadd.f32 1.0, %v1871_v1  ;;  %v1779_v16 = vmul.f32 -1.442695, %v1093_v10 }
 0x3ae   :  { %v1873_v13 = vpop.eup %1872 }
 0x3af   :  { %1874 = vrcp.f32 %v1053_v59  ;;  %v1075_v9 = vadd.f32 1.0, %v1873_v13  ;;  %v1065_v27 = vand.u32 2147483648, %v1053_v59  ;;  %v1063_v56 = vand.u32 2147483647, %v1053_v59 }
 0x3b0   :  { %1876 = vpow2.f32 %v1779_v16  ;;  %vm1059_vm5 = vweird.f32 %v1053_v59 }
 0x3b1   :  { %1878 = vrcp.f32 %v1075_v9  ;;  %v1087_v12 = vand.u32 2147483648, %v1075_v9  ;;  %v1085_v4 = vand.u32 2147483647, %v1075_v9  ;;  %v1066_v10 = vor.u32 1.1754944e-38, %v1065_v27 }
 0x3b2   :  { %vm1081_vm8 = vweird.f32 %v1075_v9  ;;  %vm1064_vm9 = vcmp.eq.f32.partialorder %v1063_v56, 8.507059e+37 }
 0x3b3   :  { %vm1086_vm11 = vcmp.eq.f32.partialorder %v1085_v4, 8.507059e+37  ;;  %v3200_v4 = vld [vmem:[#allocation5 + $0x1f8] sm:$0xff] }
 0x3b5   :  { %v1875_v40 = vpop.eup %1874 }
 0x3b6   :  { %v1877_v49 = vpop.eup %1876  ;;  %v1055_v20 = vmul.f32 %v1875_v40, %v1053_v59  ;;  %vm1060_vm4 = vweird.f32 %v1875_v40  ;;  %v954_v59 = vld [vmem:[#allocation14] sm:$0xf] }
 0x3b7   :  { %v1879_v47 = vpop.eup %1878  ;;  %v1098_v19 = vadd.f32 1.0, %v1877_v49  ;;  %vm1061_vm7 = vmor %vm1059_vm5, %vm1060_vm4  ;;  %v1088_v49 = vor.u32 1.1754944e-38, %v1087_v12 }
 0x3b8   :  { %v1056_v48 = vsub.f32 1.0, %v1055_v20  ;;  %v1077_v34 = vmul.f32 %v1879_v47, %v1075_v9  ;;  %vm1082_vm6 = vweird.f32 %v1879_v47 }
 0x3b9   :  { %1880 = vrcp.f32 %v1098_v19  ;;  %vm1083_vm10 = vmor %vm1081_vm8, %vm1082_vm6  ;;  %vm1104_vm13 = vweird.f32 %v1098_v19  ;;  %v1108_v27 = vand.u32 2147483647, %v1098_v19 }
 0x3ba   :  { %v1078_v35 = vsub.f32 1.0, %v1077_v34  ;;  %v1057_v43 = vmul.f32 %v1875_v40, %v1056_v48  ;;  %1882 = vtanh.f32 %v1049_v5 }
 0x3bb   :  { %vm1109_vm15 = vcmp.eq.f32.partialorder %v1108_v27, 8.507059e+37  ;;  %v2037_v27 = vld [vmem:[#allocation5 + $0xe0] sm:$0xff] }
 0x3bc   :  { %v1079_v14 = vmul.f32 %v1879_v47, %v1078_v35  ;;  %v1058_v25 = vadd.f32 %v1875_v40, %v1057_v43 }
 0x3be   :  { %v1062_v1 = vsel %vm1061_vm7, %v1875_v40, %v1058_v25  ;;  %v1080_v16 = vadd.f32 %v1879_v47, %v1079_v14  ;;  %v1110_v40 = vand.u32 2147483648, %v1098_v19 }
 0x3bf   :  { %v1881_v13 = vpop.eup %1880  ;;  %v1067_v20 = vsel %vm1064_vm9, %v1066_v10, %v1062_v1  ;;  %v3203_v10 = vld [vmem:[#allocation5 + $0x170] sm:$0xff]  ;;  %v2021_v1 = vld [vmem:[#allocation5 + $0x1e0] sm:$0xff] }
 0x3c0   :  { %v1084_v48 = vsel %vm1083_vm10, %v1879_v47, %v1080_v16  ;;  %v1100_v34 = vmul.f32 %v1881_v13, %v1098_v19  ;;  %v1883_v26 = vpop.eup %1882  ;;  %vm1105_vm12 = vweird.f32 %v1881_v13  ;;  %v1111_v47 = vor.u32 1.1754944e-38, %v1110_v40  ;;  %v3197_v19 = vld [vmem:[#allocation5 + $0x190] sm:$0xff]  ;;  %v3207_v16 = vld [vmem:[#allocation5 + $0x1d8] sm:$0xff] }
 0x3c1   :  { %v1089_v5 = vsel %vm1086_vm11, %v1088_v49, %v1084_v48  ;;  %v1115_v35 = vmul.f32 %v1883_v26, %v1067_v20  ;;  %vm1106_vm14 = vmor %vm1104_vm13, %vm1105_vm12  ;;  %v3188_v26 = vld [vmem:[#allocation5 + $0x1f0] sm:$0xff]  ;;  %v3212_v49 = vld [vmem:[#allocation5 + $0x1b8] sm:$0xff] }
 0x3c2   :  { %v1101_v43 = vsub.f32 1.0, %v1100_v34  ;;  %v1114_v54 = vmul.f32 %v1089_v5, %v954_v59  ;;  %v3217_v20 = vld [vmem:[#allocation5 + $0x198] sm:$0xff]  ;;  %v2029_v48 = vld [vmem:[#allocation5 + $0x160] sm:$0xff] }
 0x3c3   :  { %v3227_v34 = vld [vmem:[#allocation5 + $0x158] sm:$0xff]  ;;  %v2031_v59 = vld [vmem:[#allocation5 + $0x140] sm:$0xff] }
 0x3c4   :  { %v1102_v52 = vmul.f32 %v1881_v13, %v1101_v43  ;;  %v1116_v6 = vadd.f32 %v1115_v35, %v1114_v54  ;;  %v3191_v54 = vld [vmem:[#allocation5 + $0x1d0] sm:$0xff]  ;;  %v3232_v5 = vld [vmem:[#allocation5 + $0x138] sm:$0xff]  ;;  %v2033_v35 = vld [vmem:[#allocation5 + $0x120] sm:$0xff] }
 0x3c5   :  { %v3237_v43 = vld [vmem:[#allocation5 + $0x118] sm:$0xff] }
 0x3c6   :  { %v1103_v9 = vadd.f32 %v1881_v13, %v1102_v52  ;;  %1884 = vtanh.f32 %v1116_v6  ;;  %1120 = vst [vmem:[#allocation14] sm:$0xf] %v1116_v6  ;;  %v3194_v6 = vld [vmem:[#allocation5 + $0x1b0] sm:$0xff]  ;;  %v3242_v40 = vld [vmem:[#allocation5 + $0xf8] sm:$0xff] }
 0x3c8   :  { %v1107_v56 = vsel %vm1106_vm14, %v1881_v13, %v1103_v9  ;;  %v2023_v13 = vld [vmem:[#allocation5 + $0x1c0] sm:$0xff] }
 0x3c9   :  { %v1112_v14 = vsel %vm1109_vm15, %v1111_v47, %v1107_v56  ;;  %v2035_v9 = vld [vmem:[#allocation5 + $0x100] sm:$0xff]  ;;  %v3247_v56 = vld [vmem:[#allocation5 + $0xd8] sm:$0xff] }
 0x3ca   :  { %v2039_v47 = vld [vmem:[#allocation5 + $0xc0] sm:$0xff] }
 0x3cc   :  { %v1885_v12 = vpop.eup %1884 }
 0x3cd   :  { %v1118_v25 = vmul.f32 %v1885_v12, %v1112_v14  ;;  %v2040_v12 = vld [vmem:[#allocation5 + $0x1e8] sm:$0xff] }
 0x3ce   :  { %v2041_v14 = vld [vmem:[#allocation5 + $0x1c8] sm:$0xff] }
 0x3cf   :  { %1119 = vst [vmem:[#allocation12] sm:$0xf] %v1118_v25  ;;  %1137 = vmatmul.f32.vlgmr.msra.gmra.mxu0 %v1118_v25  ;;  %v2043_v25 = vld [vmem:[#allocation5 + $0x188] sm:$0xff] }
 0x3d0   :  { %1378 = vmatpush.msra.mxu0 %v3188_v26 }
 0x3d2   :  { %1379 = vmatpush.msra.mxu0 %v3191_v54 }
 0x3d4   :  { %1380 = vmatpush.msra.mxu0 %v3194_v6 }
 0x3d6   :  { %v1143_v52 = vld [vmem:[#allocation12] sm:$0xf]  ;;  %1381 = vmatpush.msra.mxu0 %v3197_v19 }
 0x3d7   :  { %1164 = vmatmul.f32.vlgmr.msra.gmra.mxu1 %v1143_v52  ;;  %1184 = vmatmul.f32.vlgmr.msra.gmra.mxu2 %v1143_v52 }
 0x3d8   :  { %1204 = vmatmul.f32.vlgmr.msra.gmra.mxu3 %v1143_v52  ;;  %1224 = vmatmul.f32.vlgmr.msrb.gmra.mxu0 %v1143_v52  ;;  %v2045_v52 = vld [vmem:[#allocation5 + $0x148] sm:$0xff] }
 0x3d9   :  { %1398 = vmatpush.msra.mxu1 %v3200_v4  ;;  %1382 = vmatpush.msra.mxu0 %v3203_v10 }
 0x3da   :  { %1501 = vmatpush.msra.mxu2 %v2944_v15  ;;  %1528 = vmatpush.msra.mxu3 %v2021_v1  ;;  %v2025_v15 = vld [vmem:[#allocation5 + $0x1a0] sm:$0xff]  ;;  %v2046_v1 = vld [vmem:[#allocation5 + $0x128] sm:$0xff] }
 0x3db   :  { %1399 = vmatpush.msra.mxu1 %v3207_v16  ;;  %1383 = vmatpush.msra.mxu0 %v2949_v17  ;;  %v2027_v17 = vld [vmem:[#allocation5 + $0x180] sm:$0xff] }
 0x3dc   :  { %1502 = vmatpush.msra.mxu2 %v2952_v21  ;;  %1529 = vmatpush.msra.mxu3 %v2023_v13  ;;  %v3222_v21 = vld [vmem:[#allocation5 + $0x178] sm:$0xff]  ;;  %v2047_v13 = vld [vmem:[#allocation5 + $0x108] sm:$0xff] }
 0x3dd   :  { %1400 = vmatpush.msra.mxu1 %v3212_v49  ;;  %1384 = vmatpush.msra.mxu0 %v2957_v22 }
 0x3de   :  { %1503 = vmatpush.msra.mxu2 %v2960_v29  ;;  %1530 = vmatpush.msra.mxu3 %v2025_v15  ;;  %v2049_v15 = vld [vmem:[#allocation5 + $0xc8] sm:$0xff] }
 0x3df   :  { %1401 = vmatpush.msra.mxu1 %v3217_v20  ;;  %1385 = vmatpush.msra.mxu0 %v2965_v0 }
 0x3e0   :  { %1504 = vmatpush.msra.mxu2 %v3111_v55  ;;  %1531 = vmatpush.msra.mxu3 %v2027_v17  ;;  %v2050_v17 = vld [vmem:[#allocation5 + $0xa8] sm:$0xff] }
 0x3e1   :  { %1402 = vmatpush.msra.mxu1 %v3222_v21  ;;  %1386 = vmatpush.msra.mxu0 %v2971_v62 }
 0x3e2   :  { %1505 = vmatpush.msra.mxu2 %v3117_v46  ;;  %1532 = vmatpush.msra.mxu3 %v2029_v48  ;;  %v2051_v48 = vld [vmem:[#allocation5 + $0x88] sm:$0xff] }
 0x3e3   :  { %1403 = vmatpush.msra.mxu1 %v3227_v34  ;;  %1387 = vmatpush.msra.mxu0 %v2977_v30 }
 0x3e4   :  { %1506 = vmatpush.msra.mxu2 %v3123_v7  ;;  %1533 = vmatpush.msra.mxu3 %v2031_v59  ;;  %v2053_v59 = vld [vmem:[#allocation5 + $0x48] sm:$0xff] }
 0x3e5   :  { %1404 = vmatpush.msra.mxu1 %v3232_v5  ;;  %1388 = vmatpush.msra.mxu0 %v2983_v63 }
 0x3e6   :  { %1507 = vmatpush.msra.mxu2 %v3129_v36  ;;  %1534 = vmatpush.msra.mxu3 %v2033_v35  ;;  %v3674_v35 = vld [vmem:[#allocation42_spill] sm:$0xff] }
 0x3e7   :  { %1405 = vmatpush.msra.mxu1 %v3237_v43  ;;  %1389 = vmatpush.msra.mxu0 %v2989_v44 }
 0x3e8   :  { %1508 = vmatpush.msra.mxu2 %v3135_v38  ;;  %1535 = vmatpush.msra.mxu3 %v2035_v9  ;;  %v3675_v9 = vld [vmem:[#allocation61_spill] sm:$0xff] }
 0x3e9   :  { %1406 = vmatpush.msra.mxu1 %v3242_v40  ;;  %1390 = vmatpush.msra.mxu0 %v2995_v53 }
 0x3ea   :  { %1509 = vmatpush.msra.mxu2 %v2998_v33  ;;  %1536 = vmatpush.msra.mxu3 %v2037_v27 }
 0x3eb   :  { %1407 = vmatpush.msra.mxu1 %v3247_v56  ;;  %1391 = vmatpush.msra.mxu0 %v3003_v57 }
 0x3ec   :  { %1510 = vmatpush.msra.mxu2 %v3634_v60  ;;  %1537 = vmatpush.msra.mxu3 %v2039_v47  ;;  %v3676_v47 = vld [vmem:[#allocation52_spill] sm:$0xff] }
 0x3ed   :  { %1408 = vmatpush.msra.mxu1 %v3636_v3  ;;  %1392 = vmatpush.msra.mxu0 %v3637_v11 }
 0x3ee   :  { %1511 = vmatpush.msra.mxu2 %v3638_v42  ;;  %1538 = vmatpush.msra.mxu3 %v3639_v50  ;;  %v2042_v50 = vld [vmem:[#allocation5 + $0x1a8] sm:$0xff] }
 0x3ef   :  { %1409 = vmatpush.msra.mxu1 %v3640_v51  ;;  %1393 = vmatpush.msra.mxu0 %v3641_v23 }
 0x3f0   :  { %1512 = vmatpush.msra.mxu2 %v3642_v58  ;;  %1539 = vmatpush.msra.mxu3 %v3645_v31  ;;  %v2044_v31 = vld [vmem:[#allocation5 + $0x168] sm:$0xff] }
 0x3f1   :  { %1548 = vmatpush.msrb.mxu0 %v2040_v12  ;;  %1410 = vmatpush.msra.mxu1 %v3644_v45 }
 0x3f2   :  { %1513 = vmatpush.msra.mxu2 %v3646_v41  ;;  %1540 = vmatpush.msra.mxu3 %v3649_v39  ;;  %v3673_v39 = vld [vmem:[#allocation39_spill] sm:$0xff] }
 0x3f3   :  { %1549 = vmatpush.msrb.mxu0 %v2041_v14  ;;  %1411 = vmatpush.msra.mxu1 %v3648_v2 }
 0x3f4   :  { %1514 = vmatpush.msra.mxu2 %v3650_v18  ;;  %1541 = vmatpush.msra.mxu3 %v3653_v61  ;;  %v2048_v61 = vld [vmem:[#allocation5 + $0xe8] sm:$0xff] }
 0x3f5   :  { %1550 = vmatpush.msrb.mxu0 %v2042_v50  ;;  %1412 = vmatpush.msra.mxu1 %v3652_v8 }
 0x3f6   :  { %1515 = vmatpush.msra.mxu2 %v3654_v37  ;;  %1542 = vmatpush.msra.mxu3 %v3657_v32  ;;  %v2052_v32 = vld [vmem:[#allocation5 + $0x68] sm:$0xff] }
 0x3f7   :  { %1551 = vmatpush.msrb.mxu0 %v2043_v25  ;;  %1413 = vmatpush.msra.mxu1 %v3656_v24 }
 0x3f8   :  { %1516 = vmatpush.msra.mxu2 %v3658_v28  ;;  %1543 = vmatpush.msra.mxu3 %v3673_v39  ;;  %v1146_v39 = vld [vmem:[#allocation2 + $0x50] sm:$0xff] }
 0x3f9   :  { %1552 = vmatpush.msrb.mxu0 %v2044_v31  ;;  %v1147_v31 = vld [vmem:[#allocation2 + $0x58] sm:$0xff] }
 0x3fb   :  { %1553 = vmatpush.msrb.mxu0 %v2045_v52 }
 0x3fd   :  { %1554 = vmatpush.msrb.mxu0 %v2046_v1 }
 0x3ff   :  { %1555 = vmatpush.msrb.mxu0 %v2047_v13 }
 0x401   :  { %1556 = vmatpush.msrb.mxu0 %v2048_v61 }
 0x403   :  { %1557 = vmatpush.msrb.mxu0 %v2049_v15 }
 0x405   :  { %1558 = vmatpush.msrb.mxu0 %v2050_v17 }
 0x407   :  { %1559 = vmatpush.msrb.mxu0 %v2051_v48 }
 0x409   :  { %1560 = vmatpush.msrb.mxu0 %v2052_v32 }
 0x40b   :  { %1561 = vmatpush.msrb.mxu0 %v2053_v59 }
 0x40d   :  { %1562 = vmatpush.msrb.mxu0 %v3674_v35 }
 0x40f   :  { %1563 = vmatpush.msrb.mxu0 %v3675_v9 }
 0x44c   :  { %v1138_v27 = vpop.f32.mrf.mxu0 }
 0x44d   :  { %v1139_v12 = vadd.f32 %v3676_v47, %v1138_v27 }
 0x44f   :  { %1142 = vst [vmem:[#allocation11 + $0x10] sm:$0xf] %v1139_v12 }
 0x454   :  { %v1165_v13 = vpop.f32.mrf.mxu1 }
 0x455   :  { %v1225_v14 = vpop.f32.mrf.mxu0 }
 0x456   :  { %v1233_v50 = vrot.slane %v1225_v14, 4 }
 0x45a   :  { %v1185_v25 = vpop.f32.mrf.mxu2 }
 0x45b   :  { %v1232_v52 = vrot.slane %v1185_v25, 4  ;;  %v1205_v1 = vpop.f32.mrf.mxu3 }
 0x45c   :  { %v1235_v61 = vsel %vm281_vm0, %v1205_v1, %v1233_v50 }
 0x45d   :  { %v1234_v15 = vsel %vm281_vm0, %v1165_v13, %v1232_v52  ;;  %v1239_v17 = vadd.f32 %v1235_v61, %v1147_v31 }
 0x45e   :  { %v1238_v48 = vadd.f32 %v1234_v15, %v1146_v39 }
 0x45f   :  { %v1283_v32 = vrot.slane %v1239_v17, 4 }
 0x460   :  { %v1780_v59 = vmul.f32 -1.442695, %v1238_v48  ;;  %v1260_v35 = vrot.slane %v1238_v48, 4 }
 0x461   :  { %v1782_v9 = vmul.f32 -1.442695, %v1283_v32 }
 0x462   :  { %1886 = vpow2.f32 %v1780_v59  ;;  %v1781_v27 = vmul.f32 -1.442695, %v1260_v35 }
 0x463   :  { %1888 = vpow2.f32 %v1782_v9 }
 0x464   :  { %1890 = vpow2.f32 %v1781_v27 }
 0x468   :  { %v1887_v12 = vpop.eup %1886 }
 0x469   :  { %v1889_v14 = vpop.eup %1888  ;;  %v1243_v47 = vadd.f32 1.0, %v1887_v12 }
 0x46a   :  { %v1891_v25 = vpop.eup %1890  ;;  %v1288_v28 = vadd.f32 1.0, %v1889_v14 }
 0x46b   :  { %1892 = vrcp.f32 %v1243_v47  ;;  %v1265_v24 = vadd.f32 1.0, %v1891_v25  ;;  %v1255_v61 = vand.u32 2147483648, %v1243_v47  ;;  %v1253_v59 = vand.u32 2147483647, %v1243_v47 }
 0x46c   :  { %1894 = vrcp.f32 %v1288_v28  ;;  %vm1249_vm2 = vweird.f32 %v1243_v47  ;;  %vm1294_vm10 = vweird.f32 %v1288_v28 }
 0x46d   :  { %1896 = vrcp.f32 %v1265_v24  ;;  %v1277_v35 = vand.u32 2147483648, %v1265_v24  ;;  %v1275_v12 = vand.u32 2147483647, %v1265_v24  ;;  %v1256_v14 = vor.u32 1.1754944e-38, %v1255_v61 }
 0x46e   :  { %1898 = vtanh.f32 %v1239_v17  ;;  %vm1254_vm5 = vcmp.eq.f32.partialorder %v1253_v59, 8.507059e+37  ;;  %vm1271_vm6 = vweird.f32 %v1265_v24  ;;  %v1300_v61 = vand.u32 2147483648, %v1288_v28 }
 0x46f   :  { %vm1276_vm8 = vcmp.eq.f32.partialorder %v1275_v12, 8.507059e+37 }
 0x471   :  { %v1893_v50 = vpop.eup %1892 }
 0x472   :  { %v1895_v31 = vpop.eup %1894  ;;  %v1245_v39 = vmul.f32 %v1893_v50, %v1243_v47  ;;  %vm1250_vm1 = vweird.f32 %v1893_v50  ;;  %v1144_v47 = vld [vmem:[#allocation14] sm:$0xf] }
 0x473   :  { %v1897_v52 = vpop.eup %1896  ;;  %v1290_v15 = vmul.f32 %v1895_v31, %v1288_v28  ;;  %vm1251_vm4 = vmor %vm1249_vm2, %vm1250_vm1  ;;  %vm1295_vm9 = vweird.f32 %v1895_v31 }
 0x474   :  { %v1246_v1 = vsub.f32 1.0, %v1245_v39  ;;  %v1267_v13 = vmul.f32 %v1897_v52, %v1265_v24  ;;  %vm1272_vm3 = vweird.f32 %v1897_v52  ;;  %v1899_v18 = vpop.eup %1898  ;;  %vm1296_vm11 = vmor %vm1294_vm10, %vm1295_vm9  ;;  %v1301_v24 = vor.u32 1.1754944e-38, %v1300_v61 }
 0x475   :  { %v1291_v25 = vsub.f32 1.0, %v1290_v15  ;;  %vm1273_vm7 = vmor %vm1271_vm6, %vm1272_vm3 }
 0x476   :  { %v1268_v48 = vsub.f32 1.0, %v1267_v13  ;;  %v1247_v32 = vmul.f32 %v1893_v50, %v1246_v1  ;;  %v1278_v13 = vor.u32 1.1754944e-38, %v1277_v35 }
 0x477   :  { %v1292_v17 = vmul.f32 %v1895_v31, %v1291_v25 }
 0x478   :  { %v1248_v9 = vadd.f32 %v1893_v50, %v1247_v32  ;;  %v1269_v27 = vmul.f32 %v1897_v52, %v1268_v48 }
 0x479   :  { %v1293_v45 = vadd.f32 %v1895_v31, %v1292_v17 }
 0x47a   :  { %v1252_v37 = vsel %vm1251_vm4, %v1893_v50, %v1248_v9  ;;  %v1270_v39 = vadd.f32 %v1897_v52, %v1269_v27  ;;  %v1298_v50 = vand.u32 2147483647, %v1288_v28 }
 0x47b   :  { %v1257_v8 = vsel %vm1254_vm5, %v1256_v14, %v1252_v37  ;;  %v1297_v37 = vsel %vm1296_vm11, %v1895_v31, %v1293_v45  ;;  %v2054_v45 = vld [vmem:[#allocation7 + $0x78] sm:$0xff] }
 0x47c   :  { %v1274_v1 = vsel %vm1273_vm7, %v1897_v52, %v1270_v39  ;;  %v1305_v48 = vmul.f32 %v1899_v18, %v1257_v8  ;;  %vm1299_vm12 = vcmp.eq.f32.partialorder %v1298_v50, 8.507059e+37  ;;  %v2056_v18 = vld [vmem:[#allocation7 + $0x70] sm:$0xff] }
 0x47d   :  { %v1279_v2 = vsel %vm1276_vm8, %v1278_v13, %v1274_v1  ;;  %v1302_v15 = vsel %vm1299_vm12, %v1301_v24, %v1297_v37 }
 0x47e   :  { %v1304_v32 = vmul.f32 %v1279_v2, %v1144_v47 }
 0x480   :  { %v1306_v41 = vadd.f32 %v1305_v48, %v1304_v32 }
 0x482   :  { %1310 = vst [vmem:[#allocation14] sm:$0xf] %v1306_v41  ;;  %1900 = vtanh.f32 %v1306_v41  ;;  %v2055_v41 = vld [vmem:[#allocation5 + $0x150] sm:$0xff] }
 0x488   :  { %v1901_v52 = vpop.eup %1900 }
 0x489   :  { %v1308_v59 = vmul.f32 %v1901_v52, %v1302_v15  ;;  %v1334_v52 = vld [vmem:[#allocation14] sm:$0xf] }
 0x48b   :  { %1327 = vmatmul.f32.vlgmr.msrb.gmra.mxu1 %v1308_v59  ;;  %1309 = vst [vmem:[#allocation12] sm:$0xf] %v1308_v59 }
 0x48c   :  { %1568 = vmatpush.msrb.mxu1 %v3188_v26 }
 0x48e   :  { %1569 = vmatpush.msrb.mxu1 %v3191_v54 }
 0x490   :  { %1570 = vmatpush.msrb.mxu1 %v3194_v6 }
 0x492   :  { %v1333_v2 = vld [vmem:[#allocation12] sm:$0xf]  ;;  %1571 = vmatpush.msrb.mxu1 %v3197_v19 }
 0x493   :  { %1354 = vmatmul.f32.vlgmr.msrb.gmra.mxu2 %v1333_v2  ;;  %1374 = vmatmul.f32.vlgmr.msrb.gmra.mxu3 %v1333_v2 }
 0x494   :  { %1394 = vmatmul.f32.vlgmr.msra.gmra.mxu0 %v1333_v2  ;;  %1414 = vmatmul.f32.vlgmr.msra.gmra.mxu1 %v1333_v2 }
 0x495   :  { %1588 = vmatpush.msrb.mxu2 %v3200_v4  ;;  %1572 = vmatpush.msrb.mxu1 %v3203_v10 }
 0x496   :  { %1691 = vmatpush.msrb.mxu3 %v2054_v45 }
 0x497   :  { %1589 = vmatpush.msrb.mxu2 %v3207_v16  ;;  %1573 = vmatpush.msrb.mxu1 %v2055_v41 }
 0x498   :  { %1692 = vmatpush.msrb.mxu3 %v2056_v18 }
 0x499   :  { %1590 = vmatpush.msrb.mxu2 %v3212_v49  ;;  %1574 = vmatpush.msrb.mxu1 %v2957_v22  ;;  %v3677_v22 = vld [vmem:[#allocation60_spill] sm:$0xff] }
 0x49a   :  { %1693 = vmatpush.msrb.mxu3 %v2960_v29  ;;  %v3678_v29 = vld [vmem:[#allocation51_spill] sm:$0xff] }
 0x49b   :  { %1591 = vmatpush.msrb.mxu2 %v3217_v20  ;;  %1575 = vmatpush.msrb.mxu1 %v2965_v0  ;;  %v3679_v0 = vld [vmem:[#allocation48_spill] sm:$0xff] }
 0x49c   :  { %1694 = vmatpush.msrb.mxu3 %v3111_v55 }
 0x49d   :  { %1592 = vmatpush.msrb.mxu2 %v3222_v21  ;;  %1576 = vmatpush.msrb.mxu1 %v2971_v62  ;;  %v3680_v62 = vld [vmem:[#allocation25_spill] sm:$0xff] }
 0x49e   :  { %1695 = vmatpush.msrb.mxu3 %v3117_v46 }
 0x49f   :  { %1593 = vmatpush.msrb.mxu2 %v3227_v34  ;;  %1577 = vmatpush.msrb.mxu1 %v2977_v30  ;;  %v3681_v30 = vld [vmem:[#allocation26_spill] sm:$0xff] }
 0x4a0   :  { %1696 = vmatpush.msrb.mxu3 %v3123_v7  ;;  %v1337_v7 = vld [vmem:[#allocation2 + $0x68] sm:$0xff] }
 0x4a1   :  { %1594 = vmatpush.msrb.mxu2 %v3232_v5  ;;  %1578 = vmatpush.msrb.mxu1 %v2983_v63  ;;  %v3682_v63 = vld [vmem:[#allocation28_spill] sm:$0xff] }
 0x4a2   :  { %1697 = vmatpush.msrb.mxu3 %v3129_v36 }
 0x4a3   :  { %1595 = vmatpush.msrb.mxu2 %v3237_v43  ;;  %1579 = vmatpush.msrb.mxu1 %v2989_v44  ;;  %v3683_v44 = vld [vmem:[#allocation30_spill] sm:$0xff] }
 0x4a4   :  { %1698 = vmatpush.msrb.mxu3 %v3135_v38 }
 0x4a5   :  { %1596 = vmatpush.msrb.mxu2 %v3242_v40  ;;  %1580 = vmatpush.msrb.mxu1 %v2995_v53  ;;  %v3684_v53 = vld [vmem:[#allocation36_spill] sm:$0xff] }
 0x4a6   :  { %1699 = vmatpush.msrb.mxu3 %v2998_v33 }
 0x4a7   :  { %1597 = vmatpush.msrb.mxu2 %v3247_v56  ;;  %1581 = vmatpush.msrb.mxu1 %v3003_v57  ;;  %v3685_v57 = vld [vmem:[#allocation52_spill] sm:$0xff] }
 0x4a8   :  { %1700 = vmatpush.msrb.mxu3 %v3634_v60 }
 0x4a9   :  { %1598 = vmatpush.msrb.mxu2 %v3636_v3  ;;  %1582 = vmatpush.msrb.mxu1 %v3637_v11 }
 0x4aa   :  { %1701 = vmatpush.msrb.mxu3 %v3638_v42 }
 0x4ab   :  { %1599 = vmatpush.msrb.mxu2 %v3640_v51  ;;  %1583 = vmatpush.msrb.mxu1 %v3641_v23  ;;  %v1336_v51 = vld [vmem:[#allocation2 + $0x60] sm:$0xff] }
 0x4ac   :  { %1702 = vmatpush.msrb.mxu3 %v3642_v58 }
 0x4ad   :  { %1600 = vmatpush.msrb.mxu2 %v3677_v22 }
 0x4ae   :  { %1703 = vmatpush.msrb.mxu3 %v3678_v29 }
 0x4af   :  { %1601 = vmatpush.msrb.mxu2 %v3679_v0 }
 0x4b0   :  { %1704 = vmatpush.msrb.mxu3 %v3680_v62 }
 0x4b1   :  { %1602 = vmatpush.msrb.mxu2 %v3681_v30 }
 0x4b2   :  { %1705 = vmatpush.msrb.mxu3 %v3682_v63 }
 0x4b3   :  { %1603 = vmatpush.msrb.mxu2 %v3683_v44 }
 0x4b4   :  { %1706 = vmatpush.msrb.mxu3 %v3684_v53 }
 0x508   :  { %v1328_v33 = vpop.f32.mrf.mxu1 }
 0x509   :  { %v1329_v55 = vadd.f32 %v3685_v57, %v1328_v33 }
 0x50b   :  { %1332 = vst [vmem:[#allocation11 + $0x14] sm:$0xf] %v1329_v55 }
 0x511   :  { %v1415_v46 = vpop.f32.mrf.mxu1  ;;  %v1395_v38 = vpop.f32.mrf.mxu0 }
 0x512   :  { %v1423_v36 = vrot.slane %v1415_v46, 4 }
 0x514   :  { %v1425_v60 = vsel %vm281_vm0, %v1395_v38, %v1423_v36  ;;  %v1526_v36 = vld [vmem:[#allocation2 + $0x70] sm:$0xff] }
 0x515   :  { %v1429_v3 = vadd.f32 %v1425_v60, %v1337_v7 }
 0x516   :  { %v1375_v11 = vpop.f32.mrf.mxu3  ;;  %v1355_v58 = vpop.f32.mrf.mxu2 }
 0x517   :  { %v1473_v42 = vrot.slane %v1429_v3, 4  ;;  %v1422_v23 = vrot.slane %v1375_v11, 4 }
 0x519   :  { %v1785_v8 = vmul.f32 -1.442695, %v1473_v42  ;;  %v1424_v28 = vsel %vm281_vm0, %v1355_v58, %v1422_v23  ;;  %v1527_v42 = vld [vmem:[#allocation2 + $0x78] sm:$0xff] }
 0x51a   :  { %v1428_v26 = vadd.f32 %v1424_v28, %v1336_v51 }
 0x51b   :  { %1902 = vpow2.f32 %v1785_v8 }
 0x51c   :  { %v1783_v54 = vmul.f32 -1.442695, %v1428_v26  ;;  %v1450_v6 = vrot.slane %v1428_v26, 4 }
 0x51e   :  { %1904 = vpow2.f32 %v1783_v54  ;;  %v1784_v19 = vmul.f32 -1.442695, %v1450_v6 }
 0x520   :  { %1906 = vpow2.f32 %v1784_v19 }
 0x521   :  { %v1903_v4 = vpop.eup %1902 }
 0x522   :  { %v1478_v16 = vadd.f32 1.0, %v1903_v4 }
 0x524   :  { %v1905_v10 = vpop.eup %1904  ;;  %v1490_v22 = vand.u32 2147483648, %v1478_v16  ;;  %vm1484_vm7 = vweird.f32 %v1478_v16  ;;  %v1488_v29 = vand.u32 2147483647, %v1478_v16 }
 0x525   :  { %v1433_v49 = vadd.f32 1.0, %v1905_v10 }
 0x526   :  { %v1907_v20 = vpop.eup %1906  ;;  %v1491_v62 = vor.u32 1.1754944e-38, %v1490_v22  ;;  %vm1489_vm9 = vcmp.eq.f32.partialorder %v1488_v29, 8.507059e+37 }
 0x527   :  { %1908 = vrcp.f32 %v1433_v49  ;;  %v1455_v21 = vadd.f32 1.0, %v1907_v20  ;;  %v1445_v35 = vand.u32 2147483648, %v1433_v49  ;;  %v1443_v14 = vand.u32 2147483647, %v1433_v49 }
 0x528   :  { %1910 = vrcp.f32 %v1478_v16  ;;  %vm1439_vm14 = vweird.f32 %v1433_v49 }
 0x529   :  { %1912 = vrcp.f32 %v1455_v21  ;;  %v1467_v25 = vand.u32 2147483648, %v1455_v21  ;;  %v1465_v1 = vand.u32 2147483647, %v1455_v21  ;;  %v1446_v47 = vor.u32 1.1754944e-38, %v1445_v35 }
 0x52a   :  { %1914 = vtanh.f32 %v1429_v3  ;;  %vm1461_vm2 = vweird.f32 %v1455_v21  ;;  %vm1444_vm3 = vcmp.eq.f32.partialorder %v1443_v14, 8.507059e+37 }
 0x52b   :  { %v1468_v61 = vor.u32 1.1754944e-38, %v1467_v25  ;;  %vm1466_vm5 = vcmp.eq.f32.partialorder %v1465_v1, 8.507059e+37 }
 0x52d   :  { %v1909_v34 = vpop.eup %1908 }
 0x52e   :  { %v1911_v5 = vpop.eup %1910  ;;  %v1435_v43 = vmul.f32 %v1909_v34, %v1433_v49  ;;  %vm1440_vm13 = vweird.f32 %v1909_v34 }
 0x52f   :  { %v1913_v40 = vpop.eup %1912  ;;  %v1480_v9 = vmul.f32 %v1911_v5, %v1478_v16  ;;  %vm1441_vm1 = vmor %vm1439_vm14, %vm1440_vm13  ;;  %vm1485_vm6 = vweird.f32 %v1911_v5 }
 0x530   :  { %v1436_v56 = vsub.f32 1.0, %v1435_v43  ;;  %v1457_v31 = vmul.f32 %v1913_v40, %v1455_v21  ;;  %vm1462_vm15 = vweird.f32 %v1913_v40  ;;  %v1915_v24 = vpop.eup %1914  ;;  %vm1486_vm8 = vmor %vm1484_vm7, %vm1485_vm6 }
 0x531   :  { %v1481_v17 = vsub.f32 1.0, %v1480_v9  ;;  %vm1463_vm4 = vmor %vm1461_vm2, %vm1462_vm15 }
 0x532   :  { %v1437_v27 = vmul.f32 %v1909_v34, %v1436_v56  ;;  %v1458_v12 = vsub.f32 1.0, %v1457_v31 }
 0x533   :  { %v1482_v59 = vmul.f32 %v1911_v5, %v1481_v17 }
 0x534   :  { %v1459_v39 = vmul.f32 %v1913_v40, %v1458_v12  ;;  %v1438_v13 = vadd.f32 %v1909_v34, %v1437_v27 }
 0x535   :  { %v1483_v18 = vadd.f32 %v1911_v5, %v1482_v59 }
 0x536   :  { %v1442_v32 = vsel %vm1441_vm1, %v1909_v34, %v1438_v13  ;;  %v1460_v48 = vadd.f32 %v1913_v40, %v1459_v39 }
 0x537   :  { %v1447_v50 = vsel %vm1444_vm3, %v1446_v47, %v1442_v32  ;;  %v1487_v0 = vsel %vm1486_vm8, %v1911_v5, %v1483_v18 }
 0x538   :  { %v1464_v37 = vsel %vm1463_vm4, %v1913_v40, %v1460_v48  ;;  %v1495_v45 = vmul.f32 %v1915_v24, %v1447_v50  ;;  %v1492_v63 = vsel %vm1489_vm9, %v1491_v62, %v1487_v0 }
 0x539   :  { %v1469_v15 = vsel %vm1466_vm5, %v1468_v61, %v1464_v37 }
 0x53a   :  { %v1494_v2 = vmul.f32 %v1469_v15, %v1334_v52 }
 0x53c   :  { %v1496_v41 = vadd.f32 %v1495_v45, %v1494_v2 }
 0x53e   :  { %1916 = vtanh.f32 %v1496_v41  ;;  %1500 = vst [vmem:[#allocation14] sm:$0xf] %v1496_v41 }
 0x544   :  { %v1917_v30 = vpop.eup %1916 }
 0x545   :  { %v1498_v44 = vmul.f32 %v1917_v30, %v1492_v63  ;;  %v1524_v52 = vld [vmem:[#allocation14] sm:$0xf] }
 0x547   :  { %1517 = vmatmul.f32.vlgmr.msra.gmra.mxu2 %v1498_v44  ;;  %1499 = vst [vmem:[#allocation12] sm:$0xf] %v1498_v44 }
 0x54e   :  { %v1523_v53 = vld [vmem:[#allocation12] sm:$0xf] }
 0x54f   :  { %1544 = vmatmul.f32.vlgmr.msra.gmra.mxu3 %v1523_v53  ;;  %1564 = vmatmul.f32.vlgmr.msrb.gmra.mxu0 %v1523_v53 }
 0x550   :  { %1584 = vmatmul.f32.vlgmr.msrb.gmra.mxu1 %v1523_v53  ;;  %1604 = vmatmul.f32.vlgmr.msrb.gmra.mxu2 %v1523_v53 }
 0x5ca   :  { %v1518_v33 = vpop.f32.mrf.mxu2 }
 0x5cb   :  { %v1519_v55 = vadd.f32 %v3685_v57, %v1518_v33 }
 0x5cc   :  { %v1565_v46 = vpop.f32.mrf.mxu0 }
 0x5cd   :  { %1522 = vst [vmem:[#allocation11 + $0x18] sm:$0xf] %v1519_v55  ;;  %v1612_v7 = vrot.slane %v1565_v46, 4  ;;  %v1585_v23 = vpop.f32.mrf.mxu1 }
 0x5d2   :  { %v1545_v38 = vpop.f32.mrf.mxu3 }
 0x5d3   :  { %v1614_v60 = vsel %vm281_vm0, %v1545_v38, %v1612_v7  ;;  %v1605_v3 = vpop.f32.mrf.mxu2 }
 0x5d4   :  { %v1618_v11 = vadd.f32 %v1614_v60, %v1526_v36  ;;  %v1613_v51 = vrot.slane %v1605_v3, 4 }
 0x5d6   :  { %v1786_v58 = vmul.f32 -1.442695, %v1618_v11  ;;  %v1640_v8 = vrot.slane %v1618_v11, 4  ;;  %v1615_v28 = vsel %vm281_vm0, %v1585_v23, %v1613_v51 }
 0x5d7   :  { %v1619_v26 = vadd.f32 %v1615_v28, %v1527_v42 }
 0x5d8   :  { %1918 = vpow2.f32 %v1786_v58  ;;  %v1787_v54 = vmul.f32 -1.442695, %v1640_v8 }
 0x5d9   :  { %v1663_v6 = vrot.slane %v1619_v26, 4 }
 0x5da   :  { %1920 = vpow2.f32 %v1787_v54 }
 0x5db   :  { %v1788_v19 = vmul.f32 -1.442695, %v1663_v6 }
 0x5dd   :  { %1922 = vpow2.f32 %v1788_v19 }
 0x5de   :  { %v1919_v4 = vpop.eup %1918 }
 0x5df   :  { %v1623_v10 = vadd.f32 1.0, %v1919_v4 }
 0x5e0   :  { %v1921_v16 = vpop.eup %1920 }
 0x5e1   :  { %1924 = vrcp.f32 %v1623_v10  ;;  %v1645_v49 = vadd.f32 1.0, %v1921_v16  ;;  %v1635_v31 = vand.u32 2147483648, %v1623_v10  ;;  %v1633_v12 = vand.u32 2147483647, %v1623_v10 }
 0x5e2   :  { %vm1629_vm10 = vweird.f32 %v1623_v10 }
 0x5e3   :  { %v1923_v20 = vpop.eup %1922  ;;  %1926 = vrcp.f32 %v1645_v49  ;;  %v1657_v14 = vand.u32 2147483648, %v1645_v49  ;;  %v1655_v13 = vand.u32 2147483647, %v1645_v49  ;;  %v1636_v47 = vor.u32 1.1754944e-38, %v1635_v31 }
 0x5e4   :  { %v1668_v21 = vadd.f32 1.0, %v1923_v20  ;;  %vm1651_vm13 = vweird.f32 %v1645_v49  ;;  %vm1634_vm14 = vcmp.eq.f32.partialorder %v1633_v12, 8.507059e+37 }
 0x5e5   :  { %v1658_v61 = vor.u32 1.1754944e-38, %v1657_v14  ;;  %vm1656_vm1 = vcmp.eq.f32.partialorder %v1655_v13, 8.507059e+37 }
 0x5e6   :  { %1928 = vrcp.f32 %v1668_v21  ;;  %v1680_v22 = vand.u32 2147483648, %v1668_v21  ;;  %vm1674_vm3 = vweird.f32 %v1668_v21  ;;  %v1678_v29 = vand.u32 2147483647, %v1668_v21 }
 0x5e7   :  { %v1925_v34 = vpop.eup %1924  ;;  %1930 = vtanh.f32 %v1619_v26 }
 0x5e8   :  { %v1625_v5 = vmul.f32 %v1925_v34, %v1623_v10  ;;  %vm1630_vm0 = vweird.f32 %v1925_v34  ;;  %v1681_v62 = vor.u32 1.1754944e-38, %v1680_v22  ;;  %vm1679_vm5 = vcmp.eq.f32.partialorder %v1678_v29, 8.507059e+37 }
 0x5e9   :  { %v1927_v43 = vpop.eup %1926  ;;  %vm1631_vm12 = vmor %vm1629_vm10, %vm1630_vm0 }
 0x5ea   :  { %v1626_v40 = vsub.f32 1.0, %v1625_v5  ;;  %v1647_v56 = vmul.f32 %v1927_v43, %v1645_v49  ;;  %vm1652_vm11 = vweird.f32 %v1927_v43 }
 0x5eb   :  { %vm1653_vm15 = vmor %vm1651_vm13, %vm1652_vm11 }
 0x5ec   :  { %v1929_v35 = vpop.eup %1928  ;;  %v1627_v9 = vmul.f32 %v1925_v34, %v1626_v40  ;;  %v1648_v27 = vsub.f32 1.0, %v1647_v56 }
 0x5ed   :  { %v1670_v25 = vmul.f32 %v1929_v35, %v1668_v21  ;;  %v1931_v24 = vpop.eup %1930  ;;  %vm1675_vm2 = vweird.f32 %v1929_v35 }
 0x5ee   :  { %v1649_v39 = vmul.f32 %v1927_v43, %v1648_v27  ;;  %v1628_v1 = vadd.f32 %v1925_v34, %v1627_v9  ;;  %vm1676_vm4 = vmor %vm1674_vm3, %vm1675_vm2 }
 0x5ef   :  { %v1671_v17 = vsub.f32 1.0, %v1670_v25 }
 0x5f0   :  { %v1650_v32 = vadd.f32 %v1927_v43, %v1649_v39  ;;  %v1632_v48 = vsel %vm1631_vm12, %v1925_v34, %v1628_v1 }
 0x5f1   :  { %v1637_v50 = vsel %vm1634_vm14, %v1636_v47, %v1632_v48  ;;  %v1672_v59 = vmul.f32 %v1929_v35, %v1671_v17 }
 0x5f2   :  { %v1654_v37 = vsel %vm1653_vm15, %v1927_v43, %v1650_v32  ;;  %v1685_v45 = vmul.f32 %v1931_v24, %v1637_v50 }
 0x5f3   :  { %v1659_v15 = vsel %vm1656_vm1, %v1658_v61, %v1654_v37  ;;  %v1673_v18 = vadd.f32 %v1929_v35, %v1672_v59 }
 0x5f4   :  { %v1684_v2 = vmul.f32 %v1659_v15, %v1524_v52 }
 0x5f5   :  { %v1677_v0 = vsel %vm1676_vm4, %v1929_v35, %v1673_v18 }
 0x5f6   :  { %v1686_v41 = vadd.f32 %v1685_v45, %v1684_v2  ;;  %v1682_v63 = vsel %vm1679_vm5, %v1681_v62, %v1677_v0 }
 0x5f8   :  { %1690 = vst [vmem:[#allocation14] sm:$0xf] %v1686_v41  ;;  %1932 = vtanh.f32 %v1686_v41 }
 0x5fe   :  { %v1933_v30 = vpop.eup %1932 }
 0x5ff   :  { %v1688_v44 = vmul.f32 %v1933_v30, %v1682_v63 }
 0x601   :  { %1707 = vmatmul.f32.vlgmr.msrb.gmra.mxu3 %v1688_v44  ;;  %1689 = vst [vmem:[#allocation12] sm:$0xf] %v1688_v44 }
 0x602   :  { %1736 = dma.vmem_to_hbm [thread:$0]  %s1732_s14, 64, %s1734_s12, [#allocation13]  }
 0x603   :  { %1747 = dma.vmem_to_hbm [thread:$0]  %s1743_s19, 64, %s1745_s17, [#allocation13]  }
 0x684   :  { %v1708_v53 = vpop.f32.mrf.mxu3 }
 0x685   :  { %v1709_v33 = vadd.f32 %v3685_v57, %v1708_v53 }
 0x687   :  { %1712 = vst [vmem:[#allocation11 + $0x1c] sm:$0xf] %v1709_v33 }
 0x688   :  { %1725 = dma.vmem_to_hbm [thread:$0]  %s1718_s20, 512, %s1720_s7, [#allocation4], %s2273_s3, %s2273_s3, %s2274_s23  }
 0x689   :  { %2255 = dma.done.wait [#allocation4], 512  }
 0x68a   :  { %2256 = vsyncadd [#allocation4], 4294966784 }
 0x68b   :  { %2257 = dma.done.wait [#allocation13], 128  }
 0x68c   :  { %2258 = vsyncadd [#allocation13], 4294967168 }
 0x68d   :  { %1760 = vsyncpa [#allocation3], 1 }
 0x68e   :  { %1761 = vsyncpa [#allocation6], 1 }
 0x68f   :  { %1762 = vsyncpa [#allocation9], 1 }
 0x690   :  { %1763 = vsyncpa [#allocation4], 1 }
 0x691   :  { %1764 = vsyncpa [#allocation13], 1 }

</bundles_post_ra>
